<compile_context>
chip_gen: v7x
topology: tpu7x:2x2x1
jax: 0.10.0
libtpu: 0.0.40
codegen_flags: <defaults>
</compile_context>

<pallas_src>
import functools

import jax
import jax.numpy as jnp
from jax.experimental import pallas as pl
from jax.experimental.pallas import tpu as pltpu


TEXT_WINDOWS = (3, 4, 5)
_FULL_N_WEIGHT_BYTES = 8 * 1024 * 1024   # use a single full-N weight block below this


def _round_up(x, m):
    return (x + m - 1) // m * m


def _chip_config():
    """vmem limit / weight-buffer depth per TPU generation (safe fallback)."""
    try:
        info = pltpu.get_tpu_info()
        vmem = int(getattr(info, "vmem_capacity_bytes", 0) or 0)
    except Exception:
        vmem = 0
    if vmem >= (96 << 20):                      # v5e / v6e: 128 MiB physical VMEM
        return {"vmem_limit": 64 << 20, "wbuf_depth": 4}
    return {"vmem_limit": 32 << 20, "wbuf_depth": 3}   # v7x (64 MiB) / unknown


_CFG = _chip_config()


# ---------------------------------------------------------------------------
# Pallas matmul kernels (bias/BN-shift + optional residual + ReLU epilogue)
# ---------------------------------------------------------------------------
def _mm_kernel(a_ref, b_ref, bias_ref, o_ref, *, relu):
    acc = jnp.dot(a_ref[...], b_ref[...], preferred_element_type=jnp.float32)
    r = acc + bias_ref[...]
    if relu:
        r = jnp.maximum(r, 0.0)
    o_ref[...] = r.astype(o_ref.dtype)


def _mm_res_kernel(a_ref, b_ref, bias_ref, res_ref, o_ref, *, relu):
    acc = jnp.dot(a_ref[...], b_ref[...], preferred_element_type=jnp.float32)
    r = acc + bias_ref[...] + res_ref[...].astype(jnp.float32)
    if relu:
        r = jnp.maximum(r, 0.0)
    o_ref[...] = r.astype(o_ref.dtype)


def _pick_tm(M):
    if M <= 512:
        return M                      # full-extent block is always legal
    if M % 256 == 0:
        return 256
    if M % 128 == 0:
        return 128
    return 256                        # remainder handled by padding M


def _pick_tn(M, N, K):
    # tiny-M layers are weight-DMA / launch-overhead bound: one full-N block
    if M <= 128 and K * N * 2 <= _FULL_N_WEIGHT_BYTES:
        return N
    if N % 256 == 0:
        return 256                    # feed the 256-wide MXU on v6e/v7x
    if N % 128 == 0:
        return 128
    return N                          # full-extent block


def _weight_spec(K, tn, use_buffered):
    idx = lambda s, i, j: (s, 0, j)
    if use_buffered and hasattr(pl, "Buffered"):
        try:
            return pl.BlockSpec((None, K, tn), idx,
                                pipeline_mode=pl.Buffered(_CFG["wbuf_depth"]))
        except TypeError:             # older jax without pipeline_mode kwarg
            pass
    return pl.BlockSpec((None, K, tn), idx)


def _matmul_bias_act_3d(a, b, bias, residual, *, relu, out_dtype):
    """out[s] = act(a[s] @ b[s] + bias[s] [+ residual[s]]) for s in 0..S-1."""
    S, M, K = a.shape
    N = b.shape[-1]
    a = a.astype(jnp.bfloat16)
    b = b.astype(jnp.bfloat16)
    bias3 = bias.astype(jnp.float32).reshape(S, 1, N)

    tm = _pick_tm(M)
    tn = _pick_tn(M, N, K)
    Mp = _round_up(M, tm)
    if Mp != M:
        a = jnp.pad(a, ((0, 0), (0, Mp - M), (0, 0)))
    grid = (S, Mp // tm, N // tn)

    # deeper weight pipelining only when several weight tiles stream per row
    use_buf = (M <= 256) and (N // tn >= 2)

    in_specs = [
        pl.BlockSpec((None, tm, K), lambda s, i, j: (s, i, 0)),   # full-K block
        _weight_spec(K, tn, use_buf),
        pl.BlockSpec((None, 1, tn), lambda s, i, j: (s, 0, j)),
    ]
    args = [a, b, bias3]
    if residual is not None:
        res = residual.astype(jnp.bfloat16)
        if Mp != M:
            res = jnp.pad(res, ((0, 0), (0, Mp - M), (0, 0)))
        in_specs.append(pl.BlockSpec((None, tm, tn), lambda s, i, j: (s, i, j)))
        args.append(res)
        kern = functools.partial(_mm_res_kernel, relu=relu)
    else:
        kern = functools.partial(_mm_kernel, relu=relu)

    out = pl.pallas_call(
        kern,
        out_shape=jax.ShapeDtypeStruct((S, Mp, N), out_dtype),
        grid_spec=pltpu.PrefetchScalarGridSpec(
            num_scalar_prefetch=0,
            grid=grid,
            in_specs=in_specs,
            out_specs=pl.BlockSpec((None, tm, tn), lambda s, i, j: (s, i, j)),
        ),
        compiler_params=pltpu.CompilerParams(
            dimension_semantics=("parallel", "parallel", "parallel"),
            vmem_limit_bytes=_CFG["vmem_limit"]),
    )(*args)
    if Mp != M:
        out = out[:, :M]
    return out


def matmul_bias_act(a, b, bias, residual=None, *, relu=False,
                    out_dtype=jnp.bfloat16):
    """2D (M,K)x(K,N) or stacked 3D (S,M,K)x(S,K,N) matmul with fused epilogue."""
    if a.ndim == 2:
        out = _matmul_bias_act_3d(
            a[None], b[None], bias[None],
            None if residual is None else residual[None],
            relu=relu, out_dtype=out_dtype)
        return out[0]
    return _matmul_bias_act_3d(a, b, bias, residual, relu=relu,
                               out_dtype=out_dtype)


# ---------------------------------------------------------------------------
# fused 3x3 conv kernel: padded image tile kept in VMEM, 9 shifted-view matmuls
# (no HBM-materialized im2col for the stride-1 blocks)
# ---------------------------------------------------------------------------
def _conv3x3_kernel(x_ref, w_ref, b_ref, o_ref, *, Ho, Wop, C, relu):
    cout = o_ref.shape[-1]
    acc = jnp.zeros((Ho * Wop, cout), jnp.float32)
    for t in range(9):
        di, dj = divmod(t, 3)
        # sublane-aligned collapse: Wop is a multiple of 8 by construction
        a = x_ref[di:di + Ho, dj:dj + Wop, :].reshape(Ho * Wop, C)
        acc = acc + jnp.dot(a, w_ref[t * C:(t + 1) * C, :],
                            preferred_element_type=jnp.float32)
    r = acc + b_ref[...]
    if relu:
        r = jnp.maximum(r, 0.0)
    o_ref[...] = r.astype(o_ref.dtype)


def conv3x3_dual(x, w, b, *, stride, relu):
    """x: (S,B,H,W,C) bf16; w: (S,9*C,Cout); b: (S,Cout)."""
    S, B, H, W, C = x.shape
    Cout = w.shape[-1]
    if stride != 1:
        # TODO(synk): the 3 stride-2 blocks per stream still use HBM im2col;
        # an in-kernel strided-tap variant would remove the last 9x inflation.
        patches, Ho, Wo = _im2col_5d(x, 3, 3, stride, 1)
        out = matmul_bias_act(patches, w, b, relu=relu)
        return out.reshape(S, B, Ho, Wo, Cout)

    Ho, Wo = H, W
    Wop = _round_up(Wo, 8)            # pad output width so reshapes stay aligned
    xp = jnp.pad(x, ((0, 0), (0, 0), (1, 1), (1, 1 + (Wop - Wo)), (0, 0)))
    kern = functools.partial(_conv3x3_kernel, Ho=Ho, Wop=Wop, C=C, relu=relu)
    out = pl.pallas_call(
        kern,
        out_shape=jax.ShapeDtypeStruct((S, B, Ho * Wop, Cout), jnp.bfloat16),
        grid_spec=pltpu.PrefetchScalarGridSpec(
            num_scalar_prefetch=0,
            grid=(S, B),
            in_specs=[
                pl.BlockSpec((None, None, Ho + 2, Wop + 2, C),
                             lambda s, bi: (s, bi, 0, 0, 0)),
                pl.BlockSpec((None, 9 * C, Cout), lambda s, bi: (s, 0, 0)),
                pl.BlockSpec((None, 1, Cout), lambda s, bi: (s, 0, 0)),
            ],
            out_specs=pl.BlockSpec((None, None, Ho * Wop, Cout),
                                   lambda s, bi: (s, bi, 0, 0)),
        ),
        compiler_params=pltpu.CompilerParams(
            dimension_semantics=("parallel", "parallel"),
            vmem_limit_bytes=_CFG["vmem_limit"]),
    )(xp, w, b.astype(jnp.float32).reshape(S, 1, Cout))
    out = out.reshape(S, B, Ho, Wop, Cout)
    if Wop != Wo:
        out = out[:, :, :, :Wo, :]
    return out


# ---------------------------------------------------------------------------
# gridded elementwise / reduction kernels
# ---------------------------------------------------------------------------
def _avgpool_kernel(x_ref, o_ref):
    o_ref[...] = jnp.mean(x_ref[...].astype(jnp.float32), axis=1, keepdims=True)


def dual_global_avgpool(x):
    S, B, H, W, C = x.shape
    xr = x.reshape(S * B, H * W, C)
    out = pl.pallas_call(
        _avgpool_kernel,
        out_shape=jax.ShapeDtypeStruct((S * B, 1, C), jnp.float32),
        grid_spec=pltpu.PrefetchScalarGridSpec(
            num_scalar_prefetch=0,
            grid=(S * B,),
            in_specs=[pl.BlockSpec((1, H * W, C), lambda b: (b, 0, 0))],
            out_specs=pl.BlockSpec((1, 1, C), lambda b: (b, 0, 0)),
        ),
        compiler_params=pltpu.CompilerParams(
            dimension_semantics=("parallel",)),
    )(xr)
    return out.reshape(S, B, C)


def _seqmax_kernel(x_ref, o_ref):
    o_ref[...] = jnp.max(x_ref[...], axis=1, keepdims=True).astype(o_ref.dtype)


def seq_max(h):
    B, L, F = h.shape
    out = pl.pallas_call(
        _seqmax_kernel,
        out_shape=jax.ShapeDtypeStruct((B, 1, F), h.dtype),
        grid_spec=pltpu.PrefetchScalarGridSpec(
            num_scalar_prefetch=0,
            grid=(B,),
            in_specs=[pl.BlockSpec((1, L, F), lambda b: (b, 0, 0))],
            out_specs=pl.BlockSpec((1, 1, F), lambda b: (b, 0, 0)),
        ),
        compiler_params=pltpu.CompilerParams(
            dimension_semantics=("parallel",)),
    )(h)
    return out.reshape(B, F)


def _merge_kernel(x0_ref, x1_ref, x2_ref, o_ref, d_ref, acc_ref, *, w0, w1, w2):
    i = pl.program_id(0)

    @pl.when(i == 0)
    def _():
        acc_ref[...] = jnp.zeros_like(acc_ref)

    x0 = x0_ref[...]
    x1 = x1_ref[...]
    x2 = x2_ref[...]
    m = w0 * x0 + w1 * x1 + w2 * x2
    o_ref[...] = m
    diff = x0 - m
    ss = jnp.sum(diff * diff, axis=1, keepdims=True)
    acc_ref[...] += jnp.sum(ss, axis=0, keepdims=True)

    @pl.when(i == pl.num_programs(0) - 1)
    def _():
        d_ref[...] = jnp.sqrt(acc_ref[...])


def merge_features(tensors, alphas):
    # TODO(synk): the original `merge` helper is not shipped with the module;
    # kept the side-tuning blend weights=[a0, a1, 1-sum(alphas)] over
    # [base, side_image, text] with d = ||base - merged||_F (cf. torch.dist).
    x0, x1, x2 = [t.astype(jnp.float32) for t in tensors]
    w = [float(a) for a in alphas]
    w = w + [1.0 - sum(w)]
    B, F = x0.shape
    tb = B if B <= 256 else 256
    Bp = _round_up(B, tb)
    if Bp != B:
        pad = ((0, Bp - B), (0, 0))
        x0, x1, x2 = (jnp.pad(t, pad) for t in (x0, x1, x2))
    merged, d = pl.pallas_call(
        functools.partial(_merge_kernel, w0=w[0], w1=w[1], w2=w[2]),
        out_shape=(jax.ShapeDtypeStruct((Bp, F), jnp.float32),
                   jax.ShapeDtypeStruct((1, 1), jnp.float32)),
        grid_spec=pltpu.PrefetchScalarGridSpec(
            num_scalar_prefetch=0,
            grid=(Bp // tb,),
            in_specs=[pl.BlockSpec((tb, F), lambda i: (i, 0)),
                      pl.BlockSpec((tb, F), lambda i: (i, 0)),
                      pl.BlockSpec((tb, F), lambda i: (i, 0))],
            out_specs=[pl.BlockSpec((tb, F), lambda i: (i, 0)),
                       pl.BlockSpec((1, 1), lambda i: (0, 0))],
            scratch_shapes=[pltpu.VMEM((1, 1), jnp.float32)],
        ),
        compiler_params=pltpu.CompilerParams(
            dimension_semantics=("arbitrary",)),
    )(x0, x1, x2)
    return merged[:B], d[0, 0]


# ---------------------------------------------------------------------------
# conv / pooling glue (patch extraction in XLA only where unavoidable)
# ---------------------------------------------------------------------------
def _im2col(x, kh, kw, stride, pad):
    """x: (B,H,W,C) -> patches (B*Ho*Wo, kh*kw*C), (kh,kw,C) row-major."""
    B, H, W, C = x.shape
    if pad > 0:
        x = jnp.pad(x, ((0, 0), (pad, pad), (pad, pad), (0, 0)))
    Hp, Wp = H + 2 * pad, W + 2 * pad
    Ho = (Hp - kh) // stride + 1
    Wo = (Wp - kw) // stride + 1
    cols = []
    for i in range(kh):
        for j in range(kw):
            cols.append(jax.lax.slice(
                x, (0, i, j, 0),
                (B, i + (Ho - 1) * stride + 1, j + (Wo - 1) * stride + 1, C),
                (1, stride, stride, 1)))
    patches = jnp.stack(cols, axis=3)
    return patches.reshape(B * Ho * Wo, kh * kw * C), Ho, Wo


def _im2col_5d(x, kh, kw, stride, pad):
    """x: (S,B,H,W,C) -> patches (S, B*Ho*Wo, kh*kw*C)."""
    S, B, H, W, C = x.shape
    if pad > 0:
        x = jnp.pad(x, ((0, 0), (0, 0), (pad, pad), (pad, pad), (0, 0)))
    Hp, Wp = H + 2 * pad, W + 2 * pad
    Ho = (Hp - kh) // stride + 1
    Wo = (Wp - kw) // stride + 1
    cols = []
    for i in range(kh):
        for j in range(kw):
            cols.append(jax.lax.slice(
                x, (0, 0, i, j, 0),
                (S, B, i + (Ho - 1) * stride + 1, j + (Wo - 1) * stride + 1, C),
                (1, 1, stride, stride, 1)))
    patches = jnp.stack(cols, axis=4)                # (S,B,Ho,Wo,kh*kw,C)
    return patches.reshape(S, B * Ho * Wo, kh * kw * C), Ho, Wo


def maxpool_3x3_s2_p1(x):
    # XLA-fused tree of maximums over strided slices (no 9x stacked HBM tensor).
    S, B, H, W, C = x.shape
    xp = jnp.pad(x, ((0, 0), (0, 0), (1, 1), (1, 1), (0, 0)),
                 constant_values=-jnp.inf)
    Ho = (H + 2 - 3) // 2 + 1
    Wo = (W + 2 - 3) // 2 + 1
    out = None
    for i in range(3):
        for j in range(3):
            win = jax.lax.slice(
                xp, (0, 0, i, j, 0),
                (S, B, i + (Ho - 1) * 2 + 1, j + (Wo - 1) * 2 + 1, C),
                (1, 1, 2, 2, 1))
            out = win if out is None else jnp.maximum(out, win)
    return out


def conv1x1_dual(x, w, b, *, stride=1, relu=False, residual=None):
    S, B, H, W, C = x.shape
    if stride > 1:
        x = x[:, :, ::stride, ::stride, :]
    Ho, Wo = x.shape[2], x.shape[3]
    N = w.shape[-1]
    a = x.reshape(S, B * Ho * Wo, C)
    res = None if residual is None else residual.reshape(S, B * Ho * Wo, N)
    out = matmul_bias_act(a, w, b, residual=res, relu=relu)
    return out.reshape(S, B, Ho, Wo, N)


# ---------------------------------------------------------------------------
# deterministic synthetic parameters (BN folded + bf16-cast at creation time)
# ---------------------------------------------------------------------------
class KeyGen:
    def __init__(self, seed):
        self._key = jax.random.PRNGKey(seed)

    def __call__(self):
        self._key, sub = jax.random.split(self._key)
        return sub


def _fold_conv(kg, kh, kw, cin, cout, eps=1e-5):
    """He-init conv + synthetic BN folded (eval mode) -> bf16 weight, f32 bias."""
    std = (2.0 / (kh * kw * cin)) ** 0.5
    w = std * jax.random.normal(kg(), (kh, kw, cin, cout), jnp.float32)
    gamma = 1.0 + 0.05 * jax.random.normal(kg(), (cout,), jnp.float32)
    beta = 0.05 * jax.random.normal(kg(), (cout,), jnp.float32)
    mean = 0.05 * jax.random.normal(kg(), (cout,), jnp.float32)
    var = 1.0 + 0.1 * jax.random.uniform(kg(), (cout,), jnp.float32)
    scale = gamma / jnp.sqrt(var + eps)
    shift = beta - mean * scale
    w2 = (w.reshape(kh * kw * cin, cout) * scale[None, :]).astype(jnp.bfloat16)
    return w2, shift.astype(jnp.float32)


def _make_linear(kg, din, dout):
    std = (1.0 / din) ** 0.5
    w = (std * jax.random.normal(kg(), (din, dout), jnp.float32)
         ).astype(jnp.bfloat16)
    b = 0.01 * jax.random.normal(kg(), (dout,), jnp.float32)
    return w, b


def make_resnet50_params(kg):
    p = {}
    p["conv1_w"], p["conv1_b"] = _fold_conv(kg, 7, 7, 3, 64)
    layers = []
    inplanes = 64
    for planes, nblocks in [(64, 3), (128, 4), (256, 6), (512, 3)]:
        blocks = []
        for bi in range(nblocks):
            blk = {}
            blk["w1"], blk["b1"] = _fold_conv(kg, 1, 1, inplanes, planes)
            blk["w2"], blk["b2"] = _fold_conv(kg, 3, 3, planes, planes)
            blk["w3"], blk["b3"] = _fold_conv(kg, 1, 1, planes, planes * 4)
            if bi == 0:   # torchvision: downsample iff stride!=1 or cin!=4*planes
                blk["wd"], blk["bd"] = _fold_conv(kg, 1, 1, inplanes, planes * 4)
            blocks.append(blk)
            inplanes = planes * 4
        layers.append(blocks)
    p["layers"] = layers
    return p


def make_dual_resnet_params(kg):
    """Stack the base (frozen) and side-image ResNet-50 weights per layer."""
    # TODO(synk): on v7x the frozen base stream could be cast to fp8 (e4m3) to
    # halve its weight-DMA bytes; kept bf16 for cross-generation portability.
    base = make_resnet50_params(kg)       # stream 0 = base
    side = make_resnet50_params(kg)       # stream 1 = side_image
    kpad = _round_up(7 * 7 * 3, 128)      # 147 -> 256 lane-aligned K

    def _padk(w):
        return jnp.pad(w, ((0, kpad - w.shape[0]), (0, 0)))

    dual = {
        # conv1 fused across streams along N: (256, 128) -> lane-dense output
        "conv1_w": jnp.concatenate([_padk(base["conv1_w"]),
                                    _padk(side["conv1_w"])], axis=1),
        "conv1_b": jnp.concatenate([base["conv1_b"], side["conv1_b"]], axis=0),
    }
    layers = []
    for lb, ls in zip(base["layers"], side["layers"]):
        blocks = []
        for bb, bs in zip(lb, ls):
            blocks.append({k: jnp.stack([bb[k], bs[k]], axis=0) for k in bb})
        layers.append(blocks)
    dual["layers"] = layers
    return dual


def make_shawn_params(kg, emb, num_filters=512):
    convs = []
    for w in TEXT_WINDOWS:
        k = w * emb
        kp = _round_up(k, 128)            # lane-aligned K
        std = (2.0 / k) ** 0.5
        wt = std * jax.random.normal(kg(), (k, num_filters), jnp.float32)
        wt = jnp.pad(wt, ((0, kp - k), (0, 0))).astype(jnp.bfloat16)
        convs.append(dict(
            weight=wt,
            bias=0.01 * jax.random.normal(kg(), (num_filters,), jnp.float32)))
    return convs


def make_fusion_params(seed, embedding_dim, num_classes, side_fc=512):
    kg = KeyGen(seed)
    p = {}
    p["dual"] = make_dual_resnet_params(kg)
    p["side_text"] = make_shawn_params(kg, embedding_dim)
    p["fc1fus_w"], p["fc1fus_b"] = _make_linear(kg, 512 * len(TEXT_WINDOWS), 2048)
    p["cls1_w"], p["cls1_b"] = _make_linear(kg, 2048, side_fc)
    w2, b2 = _make_linear(kg, side_fc, num_classes)
    npad = _round_up(num_classes, 128)    # 128-lane classifier head, sliced later
    p["cls2_w"] = jnp.pad(w2, ((0, 0), (0, npad - num_classes)))
    p["cls2_b"] = jnp.pad(b2, ((0, npad - num_classes),))
    return p


# ---------------------------------------------------------------------------
# forward passes
# ---------------------------------------------------------------------------
def dual_bottleneck(x, blk, stride):
    # TODO(synk): the tiny-M layer3/layer4 blocks could be fused into a single
    # pallas_call keeping the activation resident in VMEM with streamed weights;
    # kept as two 1x1 matmuls + one in-VMEM 3x3 kernel (residual fused in conv3).
    out = conv1x1_dual(x, blk["w1"], blk["b1"], stride=1, relu=True)
    out = conv3x3_dual(out, blk["w2"], blk["b2"], stride=stride, relu=True)
    if "wd" in blk:
        identity = conv1x1_dual(x, blk["wd"], blk["bd"], stride=stride,
                                relu=False)
    else:
        identity = x
    return conv1x1_dual(out, blk["w3"], blk["b3"], stride=1, relu=True,
                        residual=identity)


def dual_resnet_features(patches1, bhw, p):
    """Runs both ResNet-50 streams (base, side_image) together; returns (2,B,2048)."""
    B, Ho, Wo = bhw
    # fused dual-stream conv1: (M, 256) x (256, 128) -> lane-dense 128 output
    x = matmul_bias_act(patches1, p["conv1_w"], p["conv1_b"], relu=True)
    xb, xs = x[:, :64], x[:, 64:]
    x = jnp.stack([xb, xs], axis=0).reshape(2, B, Ho, Wo, 64)
    x = maxpool_3x3_s2_p1(x)
    for li, blocks in enumerate(p["layers"]):
        for bi, blk in enumerate(blocks):
            stride = 2 if (li >= 1 and bi == 0) else 1
            x = dual_bottleneck(x, blk, stride)
    return dual_global_avgpool(x)                 # (2, B, 2048) f32


def shawn_features(x, convs):
    B, S, E = x.shape
    feats = []
    for w, conv in zip(TEXT_WINDOWS, convs):
        L = S - w + 1
        patches = jnp.stack([x[:, t:t + w, :] for t in range(L)], axis=1)
        patches = patches.reshape(B * L, w * E)
        kp = conv["weight"].shape[0]
        if kp != w * E:
            patches = jnp.pad(patches, ((0, 0), (0, kp - w * E)))
        nf = conv["weight"].shape[1]
        h = matmul_bias_act(patches, conv["weight"], conv["bias"], relu=True)
        feats.append(seq_max(h.reshape(B, L, nf)))   # global max over sequence
    return jnp.concatenate(feats, axis=1)            # (B, 3*512)


def fusion_sidenet_fc_resnet_forward(b_x_nchw, s_text_x, params, *,
                                     alphas=(0.3, 0.3), num_classes=10):
    # Dropout layers run in eval mode (identity); BN is folded (eval mode).
    x_nhwc = jnp.transpose(b_x_nchw, (0, 2, 3, 1)).astype(jnp.bfloat16)
    B = x_nhwc.shape[0]
    # conv1 7x7 im2col patches are shared by both streams (built once, K-padded)
    patches1, Ho, Wo = _im2col(x_nhwc, 7, 7, 2, 3)
    kp = params["dual"]["conv1_w"].shape[0]
    if kp != patches1.shape[1]:
        patches1 = jnp.pad(patches1, ((0, 0), (0, kp - patches1.shape[1])))

    feats = dual_resnet_features(patches1, (B, Ho, Wo), params["dual"])
    base_feat, s_image_feat = feats[0], feats[1]

    text_feat = shawn_features(s_text_x.astype(jnp.bfloat16),
                               params["side_text"])
    text_feat = matmul_bias_act(text_feat, params["fc1fus_w"],
                                params["fc1fus_b"], relu=False,
                                out_dtype=jnp.float32)

    merged, d = merge_features([base_feat, s_image_feat, text_feat], alphas)
    h = matmul_bias_act(merged, params["cls1_w"], params["cls1_b"],
                        relu=False, out_dtype=jnp.float32)
    logits = matmul_bias_act(h, params["cls2_w"], params["cls2_b"],
                             relu=False, out_dtype=jnp.float32)
    return logits[:, :num_classes], d


# ---------------------------------------------------------------------------
# main
# ---------------------------------------------------------------------------
if __name__ == "__main__":
    B = 2
    H = W = 32           # smallest size that survives ResNet-50 downsampling
    SEQ = 8
    EMB = 32             # embedding_dim
    NUM_CLASSES = 10

    key = jax.random.PRNGKey(0)
    k_img, k_txt = jax.random.split(key)
    b_x = jax.random.normal(k_img, (B, 3, H, W), jnp.float32)       # NCHW
    s_text_x = jax.random.normal(k_txt, (B, SEQ, EMB), jnp.float32)

    params = make_fusion_params(seed=1, embedding_dim=EMB,
                                num_classes=NUM_CLASSES, side_fc=512)

    forward = jax.jit(functools.partial(fusion_sidenet_fc_resnet_forward,
                                        alphas=(0.3, 0.3),
                                        num_classes=NUM_CLASSES))
    logits, d = forward(b_x, s_text_x, params)
    jax.block_until_ready((logits, d))

    assert logits.shape == (B, NUM_CLASSES)
    assert jnp.isfinite(logits).all() and jnp.isfinite(d)
    print("KERNEL_OK")
</pallas_src>

<mosaic_0001>
module attributes {stable_mosaic.version = 11 : i64} {
  func.func @_mm_kernel(%arg0: i32, %arg1: i32, %arg2: i32, %arg3: memref<1x512x256xbf16, #tpu.memory_space<vmem>>, %arg4: memref<1x256x128xbf16, #tpu.memory_space<vmem>>, %arg5: memref<1x1x128xf32, #tpu.memory_space<vmem>>, %arg6: memref<1x512x128xbf16, #tpu.memory_space<vmem>>) attributes {dimension_semantics = [#tpu.dimension_semantics<parallel>, #tpu.dimension_semantics<parallel>, #tpu.dimension_semantics<parallel>], iteration_bounds = array<i64: 1, 1, 1>, scalar_prefetch = 0 : i64, scratch_operands = 0 : i64, tpu.core_type = #tpu.core_type<tc>, window_params = [{transform_indices = @transform_0, window_bounds = array<i64: 1, 512, 256>}, {transform_indices = @transform_1, window_bounds = array<i64: 1, 256, 128>}, {transform_indices = @transform_2, window_bounds = array<i64: 1, 1, 128>}, {transform_indices = @transform_3, window_bounds = array<i64: 1, 512, 128>}]} {
    %c0 = arith.constant 0 : index
    %c0_0 = arith.constant 0 : index
    %c0_1 = arith.constant 0 : index
    %0 = vector.load %arg3[%c0, %c0_0, %c0_1] : memref<1x512x256xbf16, #tpu.memory_space<vmem>>, vector<1x512x256xbf16>
    %1 = vector.shape_cast %0 : vector<1x512x256xbf16> to vector<512x256xbf16>
    %c0_2 = arith.constant 0 : index
    %c0_3 = arith.constant 0 : index
    %c0_4 = arith.constant 0 : index
    %2 = vector.load %arg4[%c0_2, %c0_3, %c0_4] : memref<1x256x128xbf16, #tpu.memory_space<vmem>>, vector<1x256x128xbf16>
    %3 = vector.shape_cast %2 : vector<1x256x128xbf16> to vector<256x128xbf16>
    %cst = arith.constant dense<0.000000e+00> : vector<512x128xf32>
    %4 = tpu.matmul %1, %3, %cst {dimension_numbers = #tpu.dot_dimension_numbers<[1], [0], [0], [1], [0, 0, 1, 1], [], []>} : vector<512x256xbf16>, vector<256x128xbf16>, vector<512x128xf32> -> vector<512x128xf32>
    %c0_5 = arith.constant 0 : index
    %c0_6 = arith.constant 0 : index
    %c0_7 = arith.constant 0 : index
    %5 = vector.load %arg5[%c0_5, %c0_6, %c0_7] : memref<1x1x128xf32, #tpu.memory_space<vmem>>, vector<1x1x128xf32>
    %6 = vector.shape_cast %5 : vector<1x1x128xf32> to vector<1x128xf32>
    %7 = vector.broadcast %6 : vector<1x128xf32> to vector<512x128xf32>
    %8 = arith.addf %4, %7 : vector<512x128xf32>
    %cst_8 = arith.constant 0.000000e+00 : f32
    %9 = vector.broadcast %cst_8 : f32 to vector<512x128xf32>
    %10 = arith.maximumf %8, %9 : vector<512x128xf32>
    %11 = arith.truncf %10 : vector<512x128xf32> to vector<512x128xbf16>
    %c0_9 = arith.constant 0 : index
    %c0_10 = arith.constant 0 : index
    %c0_11 = arith.constant 0 : index
    %12 = vector.load %arg6[%c0_9, %c0_10, %c0_11] : memref<1x512x128xbf16, #tpu.memory_space<vmem>>, vector<1x512x128xbf16>
    %13 = vector.shape_cast %12 : vector<1x512x128xbf16> to vector<512x128xbf16>
    %14 = vector.shape_cast %11 : vector<512x128xbf16> to vector<1x512x128xbf16>
    tpu.vector_store %arg6[%c0_9, %c0_10, %c0_11], %14 {strides = array<i32>} : memref<1x512x128xbf16, #tpu.memory_space<vmem>>, vector<1x512x128xbf16>,
    return
  }
  func.func @transform_0(%arg0: i32, %arg1: i32, %arg2: i32) -> (i32, i32, i32) {
    %c0_i32 = arith.constant 0 : i32
    %c0_i32_0 = arith.constant 0 : i32
    return %arg0, %arg1, %c0_i32 : i32, i32, i32
  }
  func.func @transform_1(%arg0: i32, %arg1: i32, %arg2: i32) -> (i32, i32, i32) {
    %c0_i32 = arith.constant 0 : i32
    %c0_i32_0 = arith.constant 0 : i32
    return %arg0, %c0_i32, %arg2 : i32, i32, i32
  }
  func.func @transform_2(%arg0: i32, %arg1: i32, %arg2: i32) -> (i32, i32, i32) {
    %c0_i32 = arith.constant 0 : i32
    %c0_i32_0 = arith.constant 0 : i32
    return %arg0, %c0_i32, %arg2 : i32, i32, i32
  }
  func.func @transform_3(%arg0: i32, %arg1: i32, %arg2: i32) -> (i32, i32, i32) {
    %c0_i32 = arith.constant 0 : i32
    return %arg0, %arg1, %arg2 : i32, i32, i32
  }
}

module attributes {stable_mosaic.version = 11 : i64} {
  func.func @_mm_kernel(%arg0: i32, %arg1: i32, %arg2: i32, %arg3: memref<1x128x64xbf16, #tpu.memory_space<vmem>>, %arg4: memref<1x64x64xbf16, #tpu.memory_space<vmem>>, %arg5: memref<1x1x64xf32, #tpu.memory_space<vmem>>, %arg6: memref<1x128x64xbf16, #tpu.memory_space<vmem>>) attributes {dimension_semantics = [#tpu.dimension_semantics<parallel>, #tpu.dimension_semantics<parallel>, #tpu.dimension_semantics<parallel>], iteration_bounds = array<i64: 2, 1, 1>, scalar_prefetch = 0 : i64, scratch_operands = 0 : i64, tpu.core_type = #tpu.core_type<tc>, window_params = [{transform_indices = @transform_0, window_bounds = array<i64: 1, 128, 64>}, {transform_indices = @transform_1, window_bounds = array<i64: 1, 64, 64>}, {transform_indices = @transform_2, window_bounds = array<i64: 1, 1, 64>}, {transform_indices = @transform_3, window_bounds = array<i64: 1, 128, 64>}]} {
    %c0 = arith.constant 0 : index
    %c0_0 = arith.constant 0 : index
    %c0_1 = arith.constant 0 : index
    %0 = vector.load %arg3[%c0, %c0_0, %c0_1] : memref<1x128x64xbf16, #tpu.memory_space<vmem>>, vector<1x128x64xbf16>
    %1 = vector.shape_cast %0 : vector<1x128x64xbf16> to vector<128x64xbf16>
    %c0_2 = arith.constant 0 : index
    %c0_3 = arith.constant 0 : index
    %c0_4 = arith.constant 0 : index
    %2 = vector.load %arg4[%c0_2, %c0_3, %c0_4] : memref<1x64x64xbf16, #tpu.memory_space<vmem>>, vector<1x64x64xbf16>
    %3 = vector.shape_cast %2 : vector<1x64x64xbf16> to vector<64x64xbf16>
    %cst = arith.constant dense<0.000000e+00> : vector<128x64xf32>
    %4 = tpu.matmul %1, %3, %cst {dimension_numbers = #tpu.dot_dimension_numbers<[1], [0], [0], [1], [0, 0, 1, 1], [], []>} : vector<128x64xbf16>, vector<64x64xbf16>, vector<128x64xf32> -> vector<128x64xf32>
    %c0_5 = arith.constant 0 : index
    %c0_6 = arith.constant 0 : index
    %c0_7 = arith.constant 0 : index
    %5 = vector.load %arg5[%c0_5, %c0_6, %c0_7] : memref<1x1x64xf32, #tpu.memory_space<vmem>>, vector<1x1x64xf32>
    %6 = vector.shape_cast %5 : vector<1x1x64xf32> to vector<1x64xf32>
    %7 = vector.broadcast %6 : vector<1x64xf32> to vector<128x64xf32>
    %8 = arith.addf %4, %7 : vector<128x64xf32>
    %cst_8 = arith.constant 0.000000e+00 : f32
    %9 = vector.broadcast %cst_8 : f32 to vector<128x64xf32>
    %10 = arith.maximumf %8, %9 : vector<128x64xf32>
    %11 = arith.truncf %10 : vector<128x64xf32> to vector<128x64xbf16>
    %c0_9 = arith.constant 0 : index
    %c0_10 = arith.constant 0 : index
    %c0_11 = arith.constant 0 : index
    %12 = vector.load %arg6[%c0_9, %c0_10, %c0_11] : memref<1x128x64xbf16, #tpu.memory_space<vmem>>, vector<1x128x64xbf16>
    %13 = vector.shape_cast %12 : vector<1x128x64xbf16> to vector<128x64xbf16>
    %14 = vector.shape_cast %11 : vector<128x64xbf16> to vector<1x128x64xbf16>
    tpu.vector_store %arg6[%c0_9, %c0_10, %c0_11], %14 {strides = array<i32>} : memref<1x128x64xbf16, #tpu.memory_space<vmem>>, vector<1x128x64xbf16>,
    return
  }
  func.func @transform_0(%arg0: i32, %arg1: i32, %arg2: i32) -> (i32, i32, i32) {
    %c0_i32 = arith.constant 0 : i32
    %c0_i32_0 = arith.constant 0 : i32
    return %arg0, %arg1, %c0_i32 : i32, i32, i32
  }
  func.func @transform_1(%arg0: i32, %arg1: i32, %arg2: i32) -> (i32, i32, i32) {
    %c0_i32 = arith.constant 0 : i32
    %c0_i32_0 = arith.constant 0 : i32
    return %arg0, %c0_i32, %arg2 : i32, i32, i32
  }
  func.func @transform_2(%arg0: i32, %arg1: i32, %arg2: i32) -> (i32, i32, i32) {
    %c0_i32 = arith.constant 0 : i32
    %c0_i32_0 = arith.constant 0 : i32
    return %arg0, %c0_i32, %arg2 : i32, i32, i32
  }
  func.func @transform_3(%arg0: i32, %arg1: i32, %arg2: i32) -> (i32, i32, i32) {
    %c0_i32 = arith.constant 0 : i32
    return %arg0, %arg1, %arg2 : i32, i32, i32
  }
}

module attributes {stable_mosaic.version = 11 : i64} {
  func.func @_mm_kernel(%arg0: i32, %arg1: i32, %arg2: i32, %arg3: memref<1x128x64xbf16, #tpu.memory_space<vmem>>, %arg4: memref<1x64x256xbf16, #tpu.memory_space<vmem>>, %arg5: memref<1x1x256xf32, #tpu.memory_space<vmem>>, %arg6: memref<1x128x256xbf16, #tpu.memory_space<vmem>>) attributes {dimension_semantics = [#tpu.dimension_semantics<parallel>, #tpu.dimension_semantics<parallel>, #tpu.dimension_semantics<parallel>], iteration_bounds = array<i64: 2, 1, 1>, scalar_prefetch = 0 : i64, scratch_operands = 0 : i64, tpu.core_type = #tpu.core_type<tc>, window_params = [{transform_indices = @transform_0, window_bounds = array<i64: 1, 128, 64>}, {transform_indices = @transform_1, window_bounds = array<i64: 1, 64, 256>}, {transform_indices = @transform_2, window_bounds = array<i64: 1, 1, 256>}, {transform_indices = @transform_3, window_bounds = array<i64: 1, 128, 256>}]} {
    %c0 = arith.constant 0 : index
    %c0_0 = arith.constant 0 : index
    %c0_1 = arith.constant 0 : index
    %0 = vector.load %arg3[%c0, %c0_0, %c0_1] : memref<1x128x64xbf16, #tpu.memory_space<vmem>>, vector<1x128x64xbf16>
    %1 = vector.shape_cast %0 : vector<1x128x64xbf16> to vector<128x64xbf16>
    %c0_2 = arith.constant 0 : index
    %c0_3 = arith.constant 0 : index
    %c0_4 = arith.constant 0 : index
    %2 = vector.load %arg4[%c0_2, %c0_3, %c0_4] : memref<1x64x256xbf16, #tpu.memory_space<vmem>>, vector<1x64x256xbf16>
    %3 = vector.shape_cast %2 : vector<1x64x256xbf16> to vector<64x256xbf16>
    %cst = arith.constant dense<0.000000e+00> : vector<128x256xf32>
    %4 = tpu.matmul %1, %3, %cst {dimension_numbers = #tpu.dot_dimension_numbers<[1], [0], [0], [1], [0, 0, 1, 1], [], []>} : vector<128x64xbf16>, vector<64x256xbf16>, vector<128x256xf32> -> vector<128x256xf32>
    %c0_5 = arith.constant 0 : index
    %c0_6 = arith.constant 0 : index
    %c0_7 = arith.constant 0 : index
    %5 = vector.load %arg5[%c0_5, %c0_6, %c0_7] : memref<1x1x256xf32, #tpu.memory_space<vmem>>, vector<1x1x256xf32>
    %6 = vector.shape_cast %5 : vector<1x1x256xf32> to vector<1x256xf32>
    %7 = vector.broadcast %6 : vector<1x256xf32> to vector<128x256xf32>
    %8 = arith.addf %4, %7 : vector<128x256xf32>
    %9 = arith.truncf %8 : vector<128x256xf32> to vector<128x256xbf16>
    %c0_8 = arith.constant 0 : index
    %c0_9 = arith.constant 0 : index
    %c0_10 = arith.constant 0 : index
    %10 = vector.load %arg6[%c0_8, %c0_9, %c0_10] : memref<1x128x256xbf16, #tpu.memory_space<vmem>>, vector<1x128x256xbf16>
    %11 = vector.shape_cast %10 : vector<1x128x256xbf16> to vector<128x256xbf16>
    %12 = vector.shape_cast %9 : vector<128x256xbf16> to vector<1x128x256xbf16>
    tpu.vector_store %arg6[%c0_8, %c0_9, %c0_10], %12 {strides = array<i32>} : memref<1x128x256xbf16, #tpu.memory_space<vmem>>, vector<1x128x256xbf16>,
    return
  }
  func.func @transform_0(%arg0: i32, %arg1: i32, %arg2: i32) -> (i32, i32, i32) {
    %c0_i32 = arith.constant 0 : i32
    %c0_i32_0 = arith.constant 0 : i32
    return %arg0, %arg1, %c0_i32 : i32, i32, i32
  }
  func.func @transform_1(%arg0: i32, %arg1: i32, %arg2: i32) -> (i32, i32, i32) {
    %c0_i32 = arith.constant 0 : i32
    %c0_i32_0 = arith.constant 0 : i32
    return %arg0, %c0_i32, %arg2 : i32, i32, i32
  }
  func.func @transform_2(%arg0: i32, %arg1: i32, %arg2: i32) -> (i32, i32, i32) {
    %c0_i32 = arith.constant 0 : i32
    %c0_i32_0 = arith.constant 0 : i32
    return %arg0, %c0_i32, %arg2 : i32, i32, i32
  }
  func.func @transform_3(%arg0: i32, %arg1: i32, %arg2: i32) -> (i32, i32, i32) {
    %c0_i32 = arith.constant 0 : i32
    return %arg0, %arg1, %arg2 : i32, i32, i32
  }
}

module attributes {stable_mosaic.version = 11 : i64} {
  func.func @_conv3x3_kernel(%arg0: i32, %arg1: i32, %arg2: memref<1x1x10x10x64xbf16, #tpu.memory_space<vmem>>, %arg3: memref<1x576x64xbf16, #tpu.memory_space<vmem>>, %arg4: memref<1x1x64xf32, #tpu.memory_space<vmem>>, %arg5: memref<1x1x64x64xbf16, #tpu.memory_space<vmem>>) attributes {dimension_semantics = [#tpu.dimension_semantics<parallel>, #tpu.dimension_semantics<parallel>], iteration_bounds = array<i64: 2, 2>, scalar_prefetch = 0 : i64, scratch_operands = 0 : i64, tpu.core_type = #tpu.core_type<tc>, window_params = [{transform_indices = @transform_0, window_bounds = array<i64: 1, 1, 10, 10, 64>}, {transform_indices = @transform_1, window_bounds = array<i64: 1, 576, 64>}, {transform_indices = @transform_2, window_bounds = array<i64: 1, 1, 64>}, {transform_indices = @transform_3, window_bounds = array<i64: 1, 1, 64, 64>}]} {
    %cst = arith.constant 0.000000e+00 : f32
    %0 = vector.broadcast %cst : f32 to vector<64x64xf32>
    %c0 = arith.constant 0 : index
    %c0_0 = arith.constant 0 : index
    %c0_1 = arith.constant 0 : index
    %c0_2 = arith.constant 0 : index
    %c0_3 = arith.constant 0 : index
    %1 = vector.load %arg2[%c0, %c0_0, %c0_1, %c0_2, %c0_3] : memref<1x1x10x10x64xbf16, #tpu.memory_space<vmem>>, vector<1x1x8x8x64xbf16>
    %2 = vector.shape_cast %1 : vector<1x1x8x8x64xbf16> to vector<8x8x64xbf16>
    %3 = vector.shape_cast %2 : vector<8x8x64xbf16> to vector<64x64xbf16>
    %c0_4 = arith.constant 0 : index
    %c0_5 = arith.constant 0 : index
    %c0_6 = arith.constant 0 : index
    %4 = vector.load %arg3[%c0_4, %c0_5, %c0_6] : memref<1x576x64xbf16, #tpu.memory_space<vmem>>, vector<1x64x64xbf16>
    %5 = vector.shape_cast %4 : vector<1x64x64xbf16> to vector<64x64xbf16>
    %cst_7 = arith.constant dense<0.000000e+00> : vector<64x64xf32>
    %6 = tpu.matmul %3, %5, %cst_7 {dimension_numbers = #tpu.dot_dimension_numbers<[1], [0], [0], [1], [0, 0, 1, 1], [], []>} : vector<64x64xbf16>, vector<64x64xbf16>, vector<64x64xf32> -> vector<64x64xf32>
    %7 = arith.addf %0, %6 : vector<64x64xf32>
    %c0_8 = arith.constant 0 : index
    %c0_9 = arith.constant 0 : index
    %c0_10 = arith.constant 0 : index
    %c1 = arith.constant 1 : index
    %c0_11 = arith.constant 0 : index
    %8 = vector.load %arg2[%c0_8, %c0_9, %c0_10, %c1, %c0_11] : memref<1x1x10x10x64xbf16, #tpu.memory_space<vmem>>, vector<1x1x8x8x64xbf16>
    %9 = vector.shape_cast %8 : vector<1x1x8x8x64xbf16> to vector<8x8x64xbf16>
    %10 = vector.shape_cast %9 : vector<8x8x64xbf16> to vector<64x64xbf16>
    %c0_12 = arith.constant 0 : index
    %c64 = arith.constant 64 : index
    %c0_13 = arith.constant 0 : index
    %11 = vector.load %arg3[%c0_12, %c64, %c0_13] : memref<1x576x64xbf16, #tpu.memory_space<vmem>>, vector<1x64x64xbf16>
    %12 = vector.shape_cast %11 : vector<1x64x64xbf16> to vector<64x64xbf16>
    %cst_14 = arith.constant dense<0.000000e+00> : vector<64x64xf32>
    %13 = tpu.matmul %10, %12, %cst_14 {dimension_numbers = #tpu.dot_dimension_numbers<[1], [0], [0], [1], [0, 0, 1, 1], [], []>} : vector<64x64xbf16>, vector<64x64xbf16>, vector<64x64xf32> -> vector<64x64xf32>
    %14 = arith.addf %7, %13 : vector<64x64xf32>
    %c0_15 = arith.constant 0 : index
    %c0_16 = arith.constant 0 : index
    %c0_17 = arith.constant 0 : index
    %c2 = arith.constant 2 : index
    %c0_18 = arith.constant 0 : index
    %15 = vector.load %arg2[%c0_15, %c0_16, %c0_17, %c2, %c0_18] : memref<1x1x10x10x64xbf16, #tpu.memory_space<vmem>>, vector<1x1x8x8x64xbf16>
    %16 = vector.shape_cast %15 : vector<1x1x8x8x64xbf16> to vector<8x8x64xbf16>
    %17 = vector.shape_cast %16 : vector<8x8x64xbf16> to vector<64x64xbf16>
    %c0_19 = arith.constant 0 : index
    %c128 = arith.constant 128 : index
    %c0_20 = arith.constant 0 : index
    %18 = vector.load %arg3[%c0_19, %c128, %c0_20] : memref<1x576x64xbf16, #tpu.memory_space<vmem>>, vector<1x64x64xbf16>
    %19 = vector.shape_cast %18 : vector<1x64x64xbf16> to vector<64x64xbf16>
    %cst_21 = arith.constant dense<0.000000e+00> : vector<64x64xf32>
    %20 = tpu.matmul %17, %19, %cst_21 {dimension_numbers = #tpu.dot_dimension_numbers<[1], [0], [0], [1], [0, 0, 1, 1], [], []>} : vector<64x64xbf16>, vector<64x64xbf16>, vector<64x64xf32> -> vector<64x64xf32>
    %21 = arith.addf %14, %20 : vector<64x64xf32>
    %c0_22 = arith.constant 0 : index
    %c0_23 = arith.constant 0 : index
    %c1_24 = arith.constant 1 : index
    %c0_25 = arith.constant 0 : index
    %c0_26 = arith.constant 0 : index
    %22 = vector.load %arg2[%c0_22, %c0_23, %c1_24, %c0_25, %c0_26] : memref<1x1x10x10x64xbf16, #tpu.memory_space<vmem>>, vector<1x1x8x8x64xbf16>
    %23 = vector.shape_cast %22 : vector<1x1x8x8x64xbf16> to vector<8x8x64xbf16>
    %24 = vector.shape_cast %23 : vector<8x8x64xbf16> to vector<64x64xbf16>
    %c0_27 = arith.constant 0 : index
    %c192 = arith.constant 192 : index
    %c0_28 = arith.constant 0 : index
    %25 = vector.load %arg3[%c0_27, %c192, %c0_28] : memref<1x576x64xbf16, #tpu.memory_space<vmem>>, vector<1x64x64xbf16>
    %26 = vector.shape_cast %25 : vector<1x64x64xbf16> to vector<64x64xbf16>
    %cst_29 = arith.constant dense<0.000000e+00> : vector<64x64xf32>
    %27 = tpu.matmul %24, %26, %cst_29 {dimension_numbers = #tpu.dot_dimension_numbers<[1], [0], [0], [1], [0, 0, 1, 1], [], []>} : vector<64x64xbf16>, vector<64x64xbf16>, vector<64x64xf32> -> vector<64x64xf32>
    %28 = arith.addf %21, %27 : vector<64x64xf32>
    %c0_30 = arith.constant 0 : index
    %c0_31 = arith.constant 0 : index
    %c1_32 = arith.constant 1 : index
    %c1_33 = arith.constant 1 : index
    %c0_34 = arith.constant 0 : index
    %29 = vector.load %arg2[%c0_30, %c0_31, %c1_32, %c1_33, %c0_34] : memref<1x1x10x10x64xbf16, #tpu.memory_space<vmem>>, vector<1x1x8x8x64xbf16>
    %30 = vector.shape_cast %29 : vector<1x1x8x8x64xbf16> to vector<8x8x64xbf16>
    %31 = vector.shape_cast %30 : vector<8x8x64xbf16> to vector<64x64xbf16>
    %c0_35 = arith.constant 0 : index
    %c256 = arith.constant 256 : index
    %c0_36 = arith.constant 0 : index
    %32 = vector.load %arg3[%c0_35, %c256, %c0_36] : memref<1x576x64xbf16, #tpu.memory_space<vmem>>, vector<1x64x64xbf16>
    %33 = vector.shape_cast %32 : vector<1x64x64xbf16> to vector<64x64xbf16>
    %cst_37 = arith.constant dense<0.000000e+00> : vector<64x64xf32>
    %34 = tpu.matmul %31, %33, %cst_37 {dimension_numbers = #tpu.dot_dimension_numbers<[1], [0], [0], [1], [0, 0, 1, 1], [], []>} : vector<64x64xbf16>, vector<64x64xbf16>, vector<64x64xf32> -> vector<64x64xf32>
    %35 = arith.addf %28, %34 : vector<64x64xf32>
    %c0_38 = arith.constant 0 : index
    %c0_39 = arith.constant 0 : index
    %c1_40 = arith.constant 1 : index
    %c2_41 = arith.constant 2 : index
    %c0_42 = arith.constant 0 : index
    %36 = vector.load %arg2[%c0_38, %c0_39, %c1_40, %c2_41, %c0_42] : memref<1x1x10x10x64xbf16, #tpu.memory_space<vmem>>, vector<1x1x8x8x64xbf16>
    %37 = vector.shape_cast %36 : vector<1x1x8x8x64xbf16> to vector<8x8x64xbf16>
    %38 = vector.shape_cast %37 : vector<8x8x64xbf16> to vector<64x64xbf16>
    %c0_43 = arith.constant 0 : index
    %c320 = arith.constant 320 : index
    %c0_44 = arith.constant 0 : index
    %39 = vector.load %arg3[%c0_43, %c320, %c0_44] : memref<1x576x64xbf16, #tpu.memory_space<vmem>>, vector<1x64x64xbf16>
    %40 = vector.shape_cast %39 : vector<1x64x64xbf16> to vector<64x64xbf16>
    %cst_45 = arith.constant dense<0.000000e+00> : vector<64x64xf32>
    %41 = tpu.matmul %38, %40, %cst_45 {dimension_numbers = #tpu.dot_dimension_numbers<[1], [0], [0], [1], [0, 0, 1, 1], [], []>} : vector<64x64xbf16>, vector<64x64xbf16>, vector<64x64xf32> -> vector<64x64xf32>
    %42 = arith.addf %35, %41 : vector<64x64xf32>
    %c0_46 = arith.constant 0 : index
    %c0_47 = arith.constant 0 : index
    %c2_48 = arith.constant 2 : index
    %c0_49 = arith.constant 0 : index
    %c0_50 = arith.constant 0 : index
    %43 = vector.load %arg2[%c0_46, %c0_47, %c2_48, %c0_49, %c0_50] : memref<1x1x10x10x64xbf16, #tpu.memory_space<vmem>>, vector<1x1x8x8x64xbf16>
    %44 = vector.shape_cast %43 : vector<1x1x8x8x64xbf16> to vector<8x8x64xbf16>
    %45 = vector.shape_cast %44 : vector<8x8x64xbf16> to vector<64x64xbf16>
    %c0_51 = arith.constant 0 : index
    %c384 = arith.constant 384 : index
    %c0_52 = arith.constant 0 : index
    %46 = vector.load %arg3[%c0_51, %c384, %c0_52] : memref<1x576x64xbf16, #tpu.memory_space<vmem>>, vector<1x64x64xbf16>
    %47 = vector.shape_cast %46 : vector<1x64x64xbf16> to vector<64x64xbf16>
    %cst_53 = arith.constant dense<0.000000e+00> : vector<64x64xf32>
    %48 = tpu.matmul %45, %47, %cst_53 {dimension_numbers = #tpu.dot_dimension_numbers<[1], [0], [0], [1], [0, 0, 1, 1], [], []>} : vector<64x64xbf16>, vector<64x64xbf16>, vector<64x64xf32> -> vector<64x64xf32>
    %49 = arith.addf %42, %48 : vector<64x64xf32>
    %c0_54 = arith.constant 0 : index
    %c0_55 = arith.constant 0 : index
    %c2_56 = arith.constant 2 : index
    %c1_57 = arith.constant 1 : index
    %c0_58 = arith.constant 0 : index
    %50 = vector.load %arg2[%c0_54, %c0_55, %c2_56, %c1_57, %c0_58] : memref<1x1x10x10x64xbf16, #tpu.memory_space<vmem>>, vector<1x1x8x8x64xbf16>
    %51 = vector.shape_cast %50 : vector<1x1x8x8x64xbf16> to vector<8x8x64xbf16>
    %52 = vector.shape_cast %51 : vector<8x8x64xbf16> to vector<64x64xbf16>
    %c0_59 = arith.constant 0 : index
    %c448 = arith.constant 448 : index
    %c0_60 = arith.constant 0 : index
    %53 = vector.load %arg3[%c0_59, %c448, %c0_60] : memref<1x576x64xbf16, #tpu.memory_space<vmem>>, vector<1x64x64xbf16>
    %54 = vector.shape_cast %53 : vector<1x64x64xbf16> to vector<64x64xbf16>
    %cst_61 = arith.constant dense<0.000000e+00> : vector<64x64xf32>
    %55 = tpu.matmul %52, %54, %cst_61 {dimension_numbers = #tpu.dot_dimension_numbers<[1], [0], [0], [1], [0, 0, 1, 1], [], []>} : vector<64x64xbf16>, vector<64x64xbf16>, vector<64x64xf32> -> vector<64x64xf32>
    %56 = arith.addf %49, %55 : vector<64x64xf32>
    %c0_62 = arith.constant 0 : index
    %c0_63 = arith.constant 0 : index
    %c2_64 = arith.constant 2 : index
    %c2_65 = arith.constant 2 : index
    %c0_66 = arith.constant 0 : index
    %57 = vector.load %arg2[%c0_62, %c0_63, %c2_64, %c2_65, %c0_66] : memref<1x1x10x10x64xbf16, #tpu.memory_space<vmem>>, vector<1x1x8x8x64xbf16>
    %58 = vector.shape_cast %57 : vector<1x1x8x8x64xbf16> to vector<8x8x64xbf16>
    %59 = vector.shape_cast %58 : vector<8x8x64xbf16> to vector<64x64xbf16>
    %c0_67 = arith.constant 0 : index
    %c512 = arith.constant 512 : index
    %c0_68 = arith.constant 0 : index
    %60 = vector.load %arg3[%c0_67, %c512, %c0_68] : memref<1x576x64xbf16, #tpu.memory_space<vmem>>, vector<1x64x64xbf16>
    %61 = vector.shape_cast %60 : vector<1x64x64xbf16> to vector<64x64xbf16>
    %cst_69 = arith.constant dense<0.000000e+00> : vector<64x64xf32>
    %62 = tpu.matmul %59, %61, %cst_69 {dimension_numbers = #tpu.dot_dimension_numbers<[1], [0], [0], [1], [0, 0, 1, 1], [], []>} : vector<64x64xbf16>, vector<64x64xbf16>, vector<64x64xf32> -> vector<64x64xf32>
    %63 = arith.addf %56, %62 : vector<64x64xf32>
    %c0_70 = arith.constant 0 : index
    %c0_71 = arith.constant 0 : index
    %c0_72 = arith.constant 0 : index
    %64 = vector.load %arg4[%c0_70, %c0_71, %c0_72] : memref<1x1x64xf32, #tpu.memory_space<vmem>>, vector<1x1x64xf32>
    %65 = vector.shape_cast %64 : vector<1x1x64xf32> to vector<1x64xf32>
    %66 = vector.broadcast %65 : vector<1x64xf32> to vector<64x64xf32>
    %67 = arith.addf %63, %66 : vector<64x64xf32>
    %cst_73 = arith.constant 0.000000e+00 : f32
    %68 = vector.broadcast %cst_73 : f32 to vector<64x64xf32>
    %69 = arith.maximumf %67, %68 : vector<64x64xf32>
    %70 = arith.truncf %69 : vector<64x64xf32> to vector<64x64xbf16>
    %c0_74 = arith.constant 0 : index
    %c0_75 = arith.constant 0 : index
    %c0_76 = arith.constant 0 : index
    %c0_77 = arith.constant 0 : index
    %71 = vector.load %arg5[%c0_74, %c0_75, %c0_76, %c0_77] : memref<1x1x64x64xbf16, #tpu.memory_space<vmem>>, vector<1x1x64x64xbf16>
    %72 = vector.shape_cast %71 : vector<1x1x64x64xbf16> to vector<64x64xbf16>
    %73 = vector.shape_cast %70 : vector<64x64xbf16> to vector<1x1x64x64xbf16>
    tpu.vector_store %arg5[%c0_74, %c0_75, %c0_76, %c0_77], %73 {strides = array<i32>} : memref<1x1x64x64xbf16, #tpu.memory_space<vmem>>, vector<1x1x64x64xbf16>,
    return
  }
  func.func @transform_0(%arg0: i32, %arg1: i32) -> (i32, i32, i32, i32, i32) {
    %c0_i32 = arith.constant 0 : i32
    %c0_i32_0 = arith.constant 0 : i32
    %c0_i32_1 = arith.constant 0 : i32
    %c0_i32_2 = arith.constant 0 : i32
    return %arg0, %arg1, %c0_i32, %c0_i32_0, %c0_i32_1 : i32, i32, i32, i32, i32
  }
  func.func @transform_1(%arg0: i32, %arg1: i32) -> (i32, i32, i32) {
    %c0_i32 = arith.constant 0 : i32
    %c0_i32_0 = arith.constant 0 : i32
    %c0_i32_1 = arith.constant 0 : i32
    return %arg0, %c0_i32, %c0_i32_0 : i32, i32, i32
  }
  func.func @transform_2(%arg0: i32, %arg1: i32) -> (i32, i32, i32) {
    %c0_i32 = arith.constant 0 : i32
    %c0_i32_0 = arith.constant 0 : i32
    %c0_i32_1 = arith.constant 0 : i32
    return %arg0, %c0_i32, %c0_i32_0 : i32, i32, i32
  }
  func.func @transform_3(%arg0: i32, %arg1: i32) -> (i32, i32, i32, i32) {
    %c0_i32 = arith.constant 0 : i32
    %c0_i32_0 = arith.constant 0 : i32
    %c0_i32_1 = arith.constant 0 : i32
    return %arg0, %arg1, %c0_i32, %c0_i32_0 : i32, i32, i32, i32
  }
}

module attributes {stable_mosaic.version = 11 : i64} {
  func.func @_mm_res_kernel(%arg0: i32, %arg1: i32, %arg2: i32, %arg3: memref<1x128x64xbf16, #tpu.memory_space<vmem>>, %arg4: memref<1x64x256xbf16, #tpu.memory_space<vmem>>, %arg5: memref<1x1x256xf32, #tpu.memory_space<vmem>>, %arg6: memref<1x128x256xbf16, #tpu.memory_space<vmem>>, %arg7: memref<1x128x256xbf16, #tpu.memory_space<vmem>>) attributes {dimension_semantics = [#tpu.dimension_semantics<parallel>, #tpu.dimension_semantics<parallel>, #tpu.dimension_semantics<parallel>], iteration_bounds = array<i64: 2, 1, 1>, scalar_prefetch = 0 : i64, scratch_operands = 0 : i64, tpu.core_type = #tpu.core_type<tc>, window_params = [{transform_indices = @transform_0, window_bounds = array<i64: 1, 128, 64>}, {transform_indices = @transform_1, window_bounds = array<i64: 1, 64, 256>}, {transform_indices = @transform_2, window_bounds = array<i64: 1, 1, 256>}, {transform_indices = @transform_3, window_bounds = array<i64: 1, 128, 256>}, {transform_indices = @transform_4, window_bounds = array<i64: 1, 128, 256>}]} {
    %c0 = arith.constant 0 : index
    %c0_0 = arith.constant 0 : index
    %c0_1 = arith.constant 0 : index
    %0 = vector.load %arg3[%c0, %c0_0, %c0_1] : memref<1x128x64xbf16, #tpu.memory_space<vmem>>, vector<1x128x64xbf16>
    %1 = vector.shape_cast %0 : vector<1x128x64xbf16> to vector<128x64xbf16>
    %c0_2 = arith.constant 0 : index
    %c0_3 = arith.constant 0 : index
    %c0_4 = arith.constant 0 : index
    %2 = vector.load %arg4[%c0_2, %c0_3, %c0_4] : memref<1x64x256xbf16, #tpu.memory_space<vmem>>, vector<1x64x256xbf16>
    %3 = vector.shape_cast %2 : vector<1x64x256xbf16> to vector<64x256xbf16>
    %cst = arith.constant dense<0.000000e+00> : vector<128x256xf32>
    %4 = tpu.matmul %1, %3, %cst {dimension_numbers = #tpu.dot_dimension_numbers<[1], [0], [0], [1], [0, 0, 1, 1], [], []>} : vector<128x64xbf16>, vector<64x256xbf16>, vector<128x256xf32> -> vector<128x256xf32>
    %c0_5 = arith.constant 0 : index
    %c0_6 = arith.constant 0 : index
    %c0_7 = arith.constant 0 : index
    %5 = vector.load %arg5[%c0_5, %c0_6, %c0_7] : memref<1x1x256xf32, #tpu.memory_space<vmem>>, vector<1x1x256xf32>
    %6 = vector.shape_cast %5 : vector<1x1x256xf32> to vector<1x256xf32>
    %7 = vector.broadcast %6 : vector<1x256xf32> to vector<128x256xf32>
    %8 = arith.addf %4, %7 : vector<128x256xf32>
    %c0_8 = arith.constant 0 : index
    %c0_9 = arith.constant 0 : index
    %c0_10 = arith.constant 0 : index
    %9 = vector.load %arg6[%c0_8, %c0_9, %c0_10] : memref<1x128x256xbf16, #tpu.memory_space<vmem>>, vector<1x128x256xbf16>
    %10 = vector.shape_cast %9 : vector<1x128x256xbf16> to vector<128x256xbf16>
    %11 = arith.extf %10 : vector<128x256xbf16> to vector<128x256xf32>
    %12 = arith.addf %8, %11 : vector<128x256xf32>
    %cst_11 = arith.constant 0.000000e+00 : f32
    %13 = vector.broadcast %cst_11 : f32 to vector<128x256xf32>
    %14 = arith.maximumf %12, %13 : vector<128x256xf32>
    %15 = arith.truncf %14 : vector<128x256xf32> to vector<128x256xbf16>
    %c0_12 = arith.constant 0 : index
    %c0_13 = arith.constant 0 : index
    %c0_14 = arith.constant 0 : index
    %16 = vector.load %arg7[%c0_12, %c0_13, %c0_14] : memref<1x128x256xbf16, #tpu.memory_space<vmem>>, vector<1x128x256xbf16>
    %17 = vector.shape_cast %16 : vector<1x128x256xbf16> to vector<128x256xbf16>
    %18 = vector.shape_cast %15 : vector<128x256xbf16> to vector<1x128x256xbf16>
    tpu.vector_store %arg7[%c0_12, %c0_13, %c0_14], %18 {strides = array<i32>} : memref<1x128x256xbf16, #tpu.memory_space<vmem>>, vector<1x128x256xbf16>,
    return
  }
  func.func @transform_0(%arg0: i32, %arg1: i32, %arg2: i32) -> (i32, i32, i32) {
    %c0_i32 = arith.constant 0 : i32
    %c0_i32_0 = arith.constant 0 : i32
    return %arg0, %arg1, %c0_i32 : i32, i32, i32
  }
  func.func @transform_1(%arg0: i32, %arg1: i32, %arg2: i32) -> (i32, i32, i32) {
    %c0_i32 = arith.constant 0 : i32
    %c0_i32_0 = arith.constant 0 : i32
    return %arg0, %c0_i32, %arg2 : i32, i32, i32
  }
  func.func @transform_2(%arg0: i32, %arg1: i32, %arg2: i32) -> (i32, i32, i32) {
    %c0_i32 = arith.constant 0 : i32
    %c0_i32_0 = arith.constant 0 : i32
    return %arg0, %c0_i32, %arg2 : i32, i32, i32
  }
  func.func @transform_3(%arg0: i32, %arg1: i32, %arg2: i32) -> (i32, i32, i32) {
    %c0_i32 = arith.constant 0 : i32
    return %arg0, %arg1, %arg2 : i32, i32, i32
  }
  func.func @transform_4(%arg0: i32, %arg1: i32, %arg2: i32) -> (i32, i32, i32) {
    %c0_i32 = arith.constant 0 : i32
    return %arg0, %arg1, %arg2 : i32, i32, i32
  }
}

module attributes {stable_mosaic.version = 11 : i64} {
  func.func @_mm_kernel(%arg0: i32, %arg1: i32, %arg2: i32, %arg3: memref<1x128x256xbf16, #tpu.memory_space<vmem>>, %arg4: memref<1x256x64xbf16, #tpu.memory_space<vmem>>, %arg5: memref<1x1x64xf32, #tpu.memory_space<vmem>>, %arg6: memref<1x128x64xbf16, #tpu.memory_space<vmem>>) attributes {dimension_semantics = [#tpu.dimension_semantics<parallel>, #tpu.dimension_semantics<parallel>, #tpu.dimension_semantics<parallel>], iteration_bounds = array<i64: 2, 1, 1>, scalar_prefetch = 0 : i64, scratch_operands = 0 : i64, tpu.core_type = #tpu.core_type<tc>, window_params = [{transform_indices = @transform_0, window_bounds = array<i64: 1, 128, 256>}, {transform_indices = @transform_1, window_bounds = array<i64: 1, 256, 64>}, {transform_indices = @transform_2, window_bounds = array<i64: 1, 1, 64>}, {transform_indices = @transform_3, window_bounds = array<i64: 1, 128, 64>}]} {
    %c0 = arith.constant 0 : index
    %c0_0 = arith.constant 0 : index
    %c0_1 = arith.constant 0 : index
    %0 = vector.load %arg3[%c0, %c0_0, %c0_1] : memref<1x128x256xbf16, #tpu.memory_space<vmem>>, vector<1x128x256xbf16>
    %1 = vector.shape_cast %0 : vector<1x128x256xbf16> to vector<128x256xbf16>
    %c0_2 = arith.constant 0 : index
    %c0_3 = arith.constant 0 : index
    %c0_4 = arith.constant 0 : index
    %2 = vector.load %arg4[%c0_2, %c0_3, %c0_4] : memref<1x256x64xbf16, #tpu.memory_space<vmem>>, vector<1x256x64xbf16>
    %3 = vector.shape_cast %2 : vector<1x256x64xbf16> to vector<256x64xbf16>
    %cst = arith.constant dense<0.000000e+00> : vector<128x64xf32>
    %4 = tpu.matmul %1, %3, %cst {dimension_numbers = #tpu.dot_dimension_numbers<[1], [0], [0], [1], [0, 0, 1, 1], [], []>} : vector<128x256xbf16>, vector<256x64xbf16>, vector<128x64xf32> -> vector<128x64xf32>
    %c0_5 = arith.constant 0 : index
    %c0_6 = arith.constant 0 : index
    %c0_7 = arith.constant 0 : index
    %5 = vector.load %arg5[%c0_5, %c0_6, %c0_7] : memref<1x1x64xf32, #tpu.memory_space<vmem>>, vector<1x1x64xf32>
    %6 = vector.shape_cast %5 : vector<1x1x64xf32> to vector<1x64xf32>
    %7 = vector.broadcast %6 : vector<1x64xf32> to vector<128x64xf32>
    %8 = arith.addf %4, %7 : vector<128x64xf32>
    %cst_8 = arith.constant 0.000000e+00 : f32
    %9 = vector.broadcast %cst_8 : f32 to vector<128x64xf32>
    %10 = arith.maximumf %8, %9 : vector<128x64xf32>
    %11 = arith.truncf %10 : vector<128x64xf32> to vector<128x64xbf16>
    %c0_9 = arith.constant 0 : index
    %c0_10 = arith.constant 0 : index
    %c0_11 = arith.constant 0 : index
    %12 = vector.load %arg6[%c0_9, %c0_10, %c0_11] : memref<1x128x64xbf16, #tpu.memory_space<vmem>>, vector<1x128x64xbf16>
    %13 = vector.shape_cast %12 : vector<1x128x64xbf16> to vector<128x64xbf16>
    %14 = vector.shape_cast %11 : vector<128x64xbf16> to vector<1x128x64xbf16>
    tpu.vector_store %arg6[%c0_9, %c0_10, %c0_11], %14 {strides = array<i32>} : memref<1x128x64xbf16, #tpu.memory_space<vmem>>, vector<1x128x64xbf16>,
    return
  }
  func.func @transform_0(%arg0: i32, %arg1: i32, %arg2: i32) -> (i32, i32, i32) {
    %c0_i32 = arith.constant 0 : i32
    %c0_i32_0 = arith.constant 0 : i32
    return %arg0, %arg1, %c0_i32 : i32, i32, i32
  }
  func.func @transform_1(%arg0: i32, %arg1: i32, %arg2: i32) -> (i32, i32, i32) {
    %c0_i32 = arith.constant 0 : i32
    %c0_i32_0 = arith.constant 0 : i32
    return %arg0, %c0_i32, %arg2 : i32, i32, i32
  }
  func.func @transform_2(%arg0: i32, %arg1: i32, %arg2: i32) -> (i32, i32, i32) {
    %c0_i32 = arith.constant 0 : i32
    %c0_i32_0 = arith.constant 0 : i32
    return %arg0, %c0_i32, %arg2 : i32, i32, i32
  }
  func.func @transform_3(%arg0: i32, %arg1: i32, %arg2: i32) -> (i32, i32, i32) {
    %c0_i32 = arith.constant 0 : i32
    return %arg0, %arg1, %arg2 : i32, i32, i32
  }
}

module attributes {stable_mosaic.version = 11 : i64} {
  func.func @_mm_kernel(%arg0: i32, %arg1: i32, %arg2: i32, %arg3: memref<1x128x256xbf16, #tpu.memory_space<vmem>>, %arg4: memref<1x256x128xbf16, #tpu.memory_space<vmem>>, %arg5: memref<1x1x128xf32, #tpu.memory_space<vmem>>, %arg6: memref<1x128x128xbf16, #tpu.memory_space<vmem>>) attributes {dimension_semantics = [#tpu.dimension_semantics<parallel>, #tpu.dimension_semantics<parallel>, #tpu.dimension_semantics<parallel>], iteration_bounds = array<i64: 2, 1, 1>, scalar_prefetch = 0 : i64, scratch_operands = 0 : i64, tpu.core_type = #tpu.core_type<tc>, window_params = [{transform_indices = @transform_0, window_bounds = array<i64: 1, 128, 256>}, {transform_indices = @transform_1, window_bounds = array<i64: 1, 256, 128>}, {transform_indices = @transform_2, window_bounds = array<i64: 1, 1, 128>}, {transform_indices = @transform_3, window_bounds = array<i64: 1, 128, 128>}]} {
    %c0 = arith.constant 0 : index
    %c0_0 = arith.constant 0 : index
    %c0_1 = arith.constant 0 : index
    %0 = vector.load %arg3[%c0, %c0_0, %c0_1] : memref<1x128x256xbf16, #tpu.memory_space<vmem>>, vector<1x128x256xbf16>
    %1 = vector.shape_cast %0 : vector<1x128x256xbf16> to vector<128x256xbf16>
    %c0_2 = arith.constant 0 : index
    %c0_3 = arith.constant 0 : index
    %c0_4 = arith.constant 0 : index
    %2 = vector.load %arg4[%c0_2, %c0_3, %c0_4] : memref<1x256x128xbf16, #tpu.memory_space<vmem>>, vector<1x256x128xbf16>
    %3 = vector.shape_cast %2 : vector<1x256x128xbf16> to vector<256x128xbf16>
    %cst = arith.constant dense<0.000000e+00> : vector<128x128xf32>
    %4 = tpu.matmul %1, %3, %cst {dimension_numbers = #tpu.dot_dimension_numbers<[1], [0], [0], [1], [0, 0, 1, 1], [], []>} : vector<128x256xbf16>, vector<256x128xbf16>, vector<128x128xf32> -> vector<128x128xf32>
    %c0_5 = arith.constant 0 : index
    %c0_6 = arith.constant 0 : index
    %c0_7 = arith.constant 0 : index
    %5 = vector.load %arg5[%c0_5, %c0_6, %c0_7] : memref<1x1x128xf32, #tpu.memory_space<vmem>>, vector<1x1x128xf32>
    %6 = vector.shape_cast %5 : vector<1x1x128xf32> to vector<1x128xf32>
    %7 = vector.broadcast %6 : vector<1x128xf32> to vector<128x128xf32>
    %8 = arith.addf %4, %7 : vector<128x128xf32>
    %cst_8 = arith.constant 0.000000e+00 : f32
    %9 = vector.broadcast %cst_8 : f32 to vector<128x128xf32>
    %10 = arith.maximumf %8, %9 : vector<128x128xf32>
    %11 = arith.truncf %10 : vector<128x128xf32> to vector<128x128xbf16>
    %c0_9 = arith.constant 0 : index
    %c0_10 = arith.constant 0 : index
    %c0_11 = arith.constant 0 : index
    %12 = vector.load %arg6[%c0_9, %c0_10, %c0_11] : memref<1x128x128xbf16, #tpu.memory_space<vmem>>, vector<1x128x128xbf16>
    %13 = vector.shape_cast %12 : vector<1x128x128xbf16> to vector<128x128xbf16>
    %14 = vector.shape_cast %11 : vector<128x128xbf16> to vector<1x128x128xbf16>
    tpu.vector_store %arg6[%c0_9, %c0_10, %c0_11], %14 {strides = array<i32>} : memref<1x128x128xbf16, #tpu.memory_space<vmem>>, vector<1x128x128xbf16>,
    return
  }
  func.func @transform_0(%arg0: i32, %arg1: i32, %arg2: i32) -> (i32, i32, i32) {
    %c0_i32 = arith.constant 0 : i32
    %c0_i32_0 = arith.constant 0 : i32
    return %arg0, %arg1, %c0_i32 : i32, i32, i32
  }
  func.func @transform_1(%arg0: i32, %arg1: i32, %arg2: i32) -> (i32, i32, i32) {
    %c0_i32 = arith.constant 0 : i32
    %c0_i32_0 = arith.constant 0 : i32
    return %arg0, %c0_i32, %arg2 : i32, i32, i32
  }
  func.func @transform_2(%arg0: i32, %arg1: i32, %arg2: i32) -> (i32, i32, i32) {
    %c0_i32 = arith.constant 0 : i32
    %c0_i32_0 = arith.constant 0 : i32
    return %arg0, %c0_i32, %arg2 : i32, i32, i32
  }
  func.func @transform_3(%arg0: i32, %arg1: i32, %arg2: i32) -> (i32, i32, i32) {
    %c0_i32 = arith.constant 0 : i32
    return %arg0, %arg1, %arg2 : i32, i32, i32
  }
}

module attributes {stable_mosaic.version = 11 : i64} {
  func.func @_mm_kernel(%arg0: i32, %arg1: i32, %arg2: i32, %arg3: memref<1x32x1152xbf16, #tpu.memory_space<vmem>>, %arg4: memref<1x1152x128xbf16, #tpu.memory_space<vmem>>, %arg5: memref<1x1x128xf32, #tpu.memory_space<vmem>>, %arg6: memref<1x32x128xbf16, #tpu.memory_space<vmem>>) attributes {dimension_semantics = [#tpu.dimension_semantics<parallel>, #tpu.dimension_semantics<parallel>, #tpu.dimension_semantics<parallel>], iteration_bounds = array<i64: 2, 1, 1>, scalar_prefetch = 0 : i64, scratch_operands = 0 : i64, tpu.core_type = #tpu.core_type<tc>, window_params = [{transform_indices = @transform_0, window_bounds = array<i64: 1, 32, 1152>}, {transform_indices = @transform_1, window_bounds = array<i64: 1, 1152, 128>}, {transform_indices = @transform_2, window_bounds = array<i64: 1, 1, 128>}, {transform_indices = @transform_3, window_bounds = array<i64: 1, 32, 128>}]} {
    %c0 = arith.constant 0 : index
    %c0_0 = arith.constant 0 : index
    %c0_1 = arith.constant 0 : index
    %0 = vector.load %arg3[%c0, %c0_0, %c0_1] : memref<1x32x1152xbf16, #tpu.memory_space<vmem>>, vector<1x32x1152xbf16>
    %1 = vector.shape_cast %0 : vector<1x32x1152xbf16> to vector<32x1152xbf16>
    %c0_2 = arith.constant 0 : index
    %c0_3 = arith.constant 0 : index
    %c0_4 = arith.constant 0 : index
    %2 = vector.load %arg4[%c0_2, %c0_3, %c0_4] : memref<1x1152x128xbf16, #tpu.memory_space<vmem>>, vector<1x1152x128xbf16>
    %3 = vector.shape_cast %2 : vector<1x1152x128xbf16> to vector<1152x128xbf16>
    %cst = arith.constant dense<0.000000e+00> : vector<32x128xf32>
    %4 = tpu.matmul %1, %3, %cst {dimension_numbers = #tpu.dot_dimension_numbers<[1], [0], [0], [1], [0, 0, 1, 1], [], []>} : vector<32x1152xbf16>, vector<1152x128xbf16>, vector<32x128xf32> -> vector<32x128xf32>
    %c0_5 = arith.constant 0 : index
    %c0_6 = arith.constant 0 : index
    %c0_7 = arith.constant 0 : index
    %5 = vector.load %arg5[%c0_5, %c0_6, %c0_7] : memref<1x1x128xf32, #tpu.memory_space<vmem>>, vector<1x1x128xf32>
    %6 = vector.shape_cast %5 : vector<1x1x128xf32> to vector<1x128xf32>
    %7 = vector.broadcast %6 : vector<1x128xf32> to vector<32x128xf32>
    %8 = arith.addf %4, %7 : vector<32x128xf32>
    %cst_8 = arith.constant 0.000000e+00 : f32
    %9 = vector.broadcast %cst_8 : f32 to vector<32x128xf32>
    %10 = arith.maximumf %8, %9 : vector<32x128xf32>
    %11 = arith.truncf %10 : vector<32x128xf32> to vector<32x128xbf16>
    %c0_9 = arith.constant 0 : index
    %c0_10 = arith.constant 0 : index
    %c0_11 = arith.constant 0 : index
    %12 = vector.load %arg6[%c0_9, %c0_10, %c0_11] : memref<1x32x128xbf16, #tpu.memory_space<vmem>>, vector<1x32x128xbf16>
    %13 = vector.shape_cast %12 : vector<1x32x128xbf16> to vector<32x128xbf16>
    %14 = vector.shape_cast %11 : vector<32x128xbf16> to vector<1x32x128xbf16>
    tpu.vector_store %arg6[%c0_9, %c0_10, %c0_11], %14 {strides = array<i32>} : memref<1x32x128xbf16, #tpu.memory_space<vmem>>, vector<1x32x128xbf16>,
    return
  }
  func.func @transform_0(%arg0: i32, %arg1: i32, %arg2: i32) -> (i32, i32, i32) {
    %c0_i32 = arith.constant 0 : i32
    %c0_i32_0 = arith.constant 0 : i32
    return %arg0, %arg1, %c0_i32 : i32, i32, i32
  }
  func.func @transform_1(%arg0: i32, %arg1: i32, %arg2: i32) -> (i32, i32, i32) {
    %c0_i32 = arith.constant 0 : i32
    %c0_i32_0 = arith.constant 0 : i32
    return %arg0, %c0_i32, %arg2 : i32, i32, i32
  }
  func.func @transform_2(%arg0: i32, %arg1: i32, %arg2: i32) -> (i32, i32, i32) {
    %c0_i32 = arith.constant 0 : i32
    %c0_i32_0 = arith.constant 0 : i32
    return %arg0, %c0_i32, %arg2 : i32, i32, i32
  }
  func.func @transform_3(%arg0: i32, %arg1: i32, %arg2: i32) -> (i32, i32, i32) {
    %c0_i32 = arith.constant 0 : i32
    return %arg0, %arg1, %arg2 : i32, i32, i32
  }
}

module attributes {stable_mosaic.version = 11 : i64} {
  func.func @_mm_kernel(%arg0: i32, %arg1: i32, %arg2: i32, %arg3: memref<1x32x256xbf16, #tpu.memory_space<vmem>>, %arg4: memref<1x256x512xbf16, #tpu.memory_space<vmem>>, %arg5: memref<1x1x512xf32, #tpu.memory_space<vmem>>, %arg6: memref<1x32x512xbf16, #tpu.memory_space<vmem>>) attributes {dimension_semantics = [#tpu.dimension_semantics<parallel>, #tpu.dimension_semantics<parallel>, #tpu.dimension_semantics<parallel>], iteration_bounds = array<i64: 2, 1, 1>, scalar_prefetch = 0 : i64, scratch_operands = 0 : i64, tpu.core_type = #tpu.core_type<tc>, window_params = [{transform_indices = @transform_0, window_bounds = array<i64: 1, 32, 256>}, {transform_indices = @transform_1, window_bounds = array<i64: 1, 256, 512>}, {transform_indices = @transform_2, window_bounds = array<i64: 1, 1, 512>}, {transform_indices = @transform_3, window_bounds = array<i64: 1, 32, 512>}]} {
    %c0 = arith.constant 0 : index
    %c0_0 = arith.constant 0 : index
    %c0_1 = arith.constant 0 : index
    %0 = vector.load %arg3[%c0, %c0_0, %c0_1] : memref<1x32x256xbf16, #tpu.memory_space<vmem>>, vector<1x32x256xbf16>
    %1 = vector.shape_cast %0 : vector<1x32x256xbf16> to vector<32x256xbf16>
    %c0_2 = arith.constant 0 : index
    %c0_3 = arith.constant 0 : index
    %c0_4 = arith.constant 0 : index
    %2 = vector.load %arg4[%c0_2, %c0_3, %c0_4] : memref<1x256x512xbf16, #tpu.memory_space<vmem>>, vector<1x256x512xbf16>
    %3 = vector.shape_cast %2 : vector<1x256x512xbf16> to vector<256x512xbf16>
    %cst = arith.constant dense<0.000000e+00> : vector<32x512xf32>
    %4 = tpu.matmul %1, %3, %cst {dimension_numbers = #tpu.dot_dimension_numbers<[1], [0], [0], [1], [0, 0, 1, 1], [], []>} : vector<32x256xbf16>, vector<256x512xbf16>, vector<32x512xf32> -> vector<32x512xf32>
    %c0_5 = arith.constant 0 : index
    %c0_6 = arith.constant 0 : index
    %c0_7 = arith.constant 0 : index
    %5 = vector.load %arg5[%c0_5, %c0_6, %c0_7] : memref<1x1x512xf32, #tpu.memory_space<vmem>>, vector<1x1x512xf32>
    %6 = vector.shape_cast %5 : vector<1x1x512xf32> to vector<1x512xf32>
    %7 = vector.broadcast %6 : vector<1x512xf32> to vector<32x512xf32>
    %8 = arith.addf %4, %7 : vector<32x512xf32>
    %9 = arith.truncf %8 : vector<32x512xf32> to vector<32x512xbf16>
    %c0_8 = arith.constant 0 : index
    %c0_9 = arith.constant 0 : index
    %c0_10 = arith.constant 0 : index
    %10 = vector.load %arg6[%c0_8, %c0_9, %c0_10] : memref<1x32x512xbf16, #tpu.memory_space<vmem>>, vector<1x32x512xbf16>
    %11 = vector.shape_cast %10 : vector<1x32x512xbf16> to vector<32x512xbf16>
    %12 = vector.shape_cast %9 : vector<32x512xbf16> to vector<1x32x512xbf16>
    tpu.vector_store %arg6[%c0_8, %c0_9, %c0_10], %12 {strides = array<i32>} : memref<1x32x512xbf16, #tpu.memory_space<vmem>>, vector<1x32x512xbf16>,
    return
  }
  func.func @transform_0(%arg0: i32, %arg1: i32, %arg2: i32) -> (i32, i32, i32) {
    %c0_i32 = arith.constant 0 : i32
    %c0_i32_0 = arith.constant 0 : i32
    return %arg0, %arg1, %c0_i32 : i32, i32, i32
  }
  func.func @transform_1(%arg0: i32, %arg1: i32, %arg2: i32) -> (i32, i32, i32) {
    %c0_i32 = arith.constant 0 : i32
    %c0_i32_0 = arith.constant 0 : i32
    return %arg0, %c0_i32, %arg2 : i32, i32, i32
  }
  func.func @transform_2(%arg0: i32, %arg1: i32, %arg2: i32) -> (i32, i32, i32) {
    %c0_i32 = arith.constant 0 : i32
    %c0_i32_0 = arith.constant 0 : i32
    return %arg0, %c0_i32, %arg2 : i32, i32, i32
  }
  func.func @transform_3(%arg0: i32, %arg1: i32, %arg2: i32) -> (i32, i32, i32) {
    %c0_i32 = arith.constant 0 : i32
    return %arg0, %arg1, %arg2 : i32, i32, i32
  }
}

module attributes {stable_mosaic.version = 11 : i64} {
  func.func @_mm_res_kernel(%arg0: i32, %arg1: i32, %arg2: i32, %arg3: memref<1x32x128xbf16, #tpu.memory_space<vmem>>, %arg4: memref<1x128x512xbf16, #tpu.memory_space<vmem>>, %arg5: memref<1x1x512xf32, #tpu.memory_space<vmem>>, %arg6: memref<1x32x512xbf16, #tpu.memory_space<vmem>>, %arg7: memref<1x32x512xbf16, #tpu.memory_space<vmem>>) attributes {dimension_semantics = [#tpu.dimension_semantics<parallel>, #tpu.dimension_semantics<parallel>, #tpu.dimension_semantics<parallel>], iteration_bounds = array<i64: 2, 1, 1>, scalar_prefetch = 0 : i64, scratch_operands = 0 : i64, tpu.core_type = #tpu.core_type<tc>, window_params = [{transform_indices = @transform_0, window_bounds = array<i64: 1, 32, 128>}, {transform_indices = @transform_1, window_bounds = array<i64: 1, 128, 512>}, {transform_indices = @transform_2, window_bounds = array<i64: 1, 1, 512>}, {transform_indices = @transform_3, window_bounds = array<i64: 1, 32, 512>}, {transform_indices = @transform_4, window_bounds = array<i64: 1, 32, 512>}]} {
    %c0 = arith.constant 0 : index
    %c0_0 = arith.constant 0 : index
    %c0_1 = arith.constant 0 : index
    %0 = vector.load %arg3[%c0, %c0_0, %c0_1] : memref<1x32x128xbf16, #tpu.memory_space<vmem>>, vector<1x32x128xbf16>
    %1 = vector.shape_cast %0 : vector<1x32x128xbf16> to vector<32x128xbf16>
    %c0_2 = arith.constant 0 : index
    %c0_3 = arith.constant 0 : index
    %c0_4 = arith.constant 0 : index
    %2 = vector.load %arg4[%c0_2, %c0_3, %c0_4] : memref<1x128x512xbf16, #tpu.memory_space<vmem>>, vector<1x128x512xbf16>
    %3 = vector.shape_cast %2 : vector<1x128x512xbf16> to vector<128x512xbf16>
    %cst = arith.constant dense<0.000000e+00> : vector<32x512xf32>
    %4 = tpu.matmul %1, %3, %cst {dimension_numbers = #tpu.dot_dimension_numbers<[1], [0], [0], [1], [0, 0, 1, 1], [], []>} : vector<32x128xbf16>, vector<128x512xbf16>, vector<32x512xf32> -> vector<32x512xf32>
    %c0_5 = arith.constant 0 : index
    %c0_6 = arith.constant 0 : index
    %c0_7 = arith.constant 0 : index
    %5 = vector.load %arg5[%c0_5, %c0_6, %c0_7] : memref<1x1x512xf32, #tpu.memory_space<vmem>>, vector<1x1x512xf32>
    %6 = vector.shape_cast %5 : vector<1x1x512xf32> to vector<1x512xf32>
    %7 = vector.broadcast %6 : vector<1x512xf32> to vector<32x512xf32>
    %8 = arith.addf %4, %7 : vector<32x512xf32>
    %c0_8 = arith.constant 0 : index
    %c0_9 = arith.constant 0 : index
    %c0_10 = arith.constant 0 : index
    %9 = vector.load %arg6[%c0_8, %c0_9, %c0_10] : memref<1x32x512xbf16, #tpu.memory_space<vmem>>, vector<1x32x512xbf16>
    %10 = vector.shape_cast %9 : vector<1x32x512xbf16> to vector<32x512xbf16>
    %11 = arith.extf %10 : vector<32x512xbf16> to vector<32x512xf32>
    %12 = arith.addf %8, %11 : vector<32x512xf32>
    %cst_11 = arith.constant 0.000000e+00 : f32
    %13 = vector.broadcast %cst_11 : f32 to vector<32x512xf32>
    %14 = arith.maximumf %12, %13 : vector<32x512xf32>
    %15 = arith.truncf %14 : vector<32x512xf32> to vector<32x512xbf16>
    %c0_12 = arith.constant 0 : index
    %c0_13 = arith.constant 0 : index
    %c0_14 = arith.constant 0 : index
    %16 = vector.load %arg7[%c0_12, %c0_13, %c0_14] : memref<1x32x512xbf16, #tpu.memory_space<vmem>>, vector<1x32x512xbf16>
    %17 = vector.shape_cast %16 : vector<1x32x512xbf16> to vector<32x512xbf16>
    %18 = vector.shape_cast %15 : vector<32x512xbf16> to vector<1x32x512xbf16>
    tpu.vector_store %arg7[%c0_12, %c0_13, %c0_14], %18 {strides = array<i32>} : memref<1x32x512xbf16, #tpu.memory_space<vmem>>, vector<1x32x512xbf16>,
    return
  }
  func.func @transform_0(%arg0: i32, %arg1: i32, %arg2: i32) -> (i32, i32, i32) {
    %c0_i32 = arith.constant 0 : i32
    %c0_i32_0 = arith.constant 0 : i32
    return %arg0, %arg1, %c0_i32 : i32, i32, i32
  }
  func.func @transform_1(%arg0: i32, %arg1: i32, %arg2: i32) -> (i32, i32, i32) {
    %c0_i32 = arith.constant 0 : i32
    %c0_i32_0 = arith.constant 0 : i32
    return %arg0, %c0_i32, %arg2 : i32, i32, i32
  }
  func.func @transform_2(%arg0: i32, %arg1: i32, %arg2: i32) -> (i32, i32, i32) {
    %c0_i32 = arith.constant 0 : i32
    %c0_i32_0 = arith.constant 0 : i32
    return %arg0, %c0_i32, %arg2 : i32, i32, i32
  }
  func.func @transform_3(%arg0: i32, %arg1: i32, %arg2: i32) -> (i32, i32, i32) {
    %c0_i32 = arith.constant 0 : i32
    return %arg0, %arg1, %arg2 : i32, i32, i32
  }
  func.func @transform_4(%arg0: i32, %arg1: i32, %arg2: i32) -> (i32, i32, i32) {
    %c0_i32 = arith.constant 0 : i32
    return %arg0, %arg1, %arg2 : i32, i32, i32
  }
}

module attributes {stable_mosaic.version = 11 : i64} {
  func.func @_mm_kernel(%arg0: i32, %arg1: i32, %arg2: i32, %arg3: memref<1x32x512xbf16, #tpu.memory_space<vmem>>, %arg4: memref<1x512x128xbf16, #tpu.memory_space<vmem>>, %arg5: memref<1x1x128xf32, #tpu.memory_space<vmem>>, %arg6: memref<1x32x128xbf16, #tpu.memory_space<vmem>>) attributes {dimension_semantics = [#tpu.dimension_semantics<parallel>, #tpu.dimension_semantics<parallel>, #tpu.dimension_semantics<parallel>], iteration_bounds = array<i64: 2, 1, 1>, scalar_prefetch = 0 : i64, scratch_operands = 0 : i64, tpu.core_type = #tpu.core_type<tc>, window_params = [{transform_indices = @transform_0, window_bounds = array<i64: 1, 32, 512>}, {transform_indices = @transform_1, window_bounds = array<i64: 1, 512, 128>}, {transform_indices = @transform_2, window_bounds = array<i64: 1, 1, 128>}, {transform_indices = @transform_3, window_bounds = array<i64: 1, 32, 128>}]} {
    %c0 = arith.constant 0 : index
    %c0_0 = arith.constant 0 : index
    %c0_1 = arith.constant 0 : index
    %0 = vector.load %arg3[%c0, %c0_0, %c0_1] : memref<1x32x512xbf16, #tpu.memory_space<vmem>>, vector<1x32x512xbf16>
    %1 = vector.shape_cast %0 : vector<1x32x512xbf16> to vector<32x512xbf16>
    %c0_2 = arith.constant 0 : index
    %c0_3 = arith.constant 0 : index
    %c0_4 = arith.constant 0 : index
    %2 = vector.load %arg4[%c0_2, %c0_3, %c0_4] : memref<1x512x128xbf16, #tpu.memory_space<vmem>>, vector<1x512x128xbf16>
    %3 = vector.shape_cast %2 : vector<1x512x128xbf16> to vector<512x128xbf16>
    %cst = arith.constant dense<0.000000e+00> : vector<32x128xf32>
    %4 = tpu.matmul %1, %3, %cst {dimension_numbers = #tpu.dot_dimension_numbers<[1], [0], [0], [1], [0, 0, 1, 1], [], []>} : vector<32x512xbf16>, vector<512x128xbf16>, vector<32x128xf32> -> vector<32x128xf32>
    %c0_5 = arith.constant 0 : index
    %c0_6 = arith.constant 0 : index
    %c0_7 = arith.constant 0 : index
    %5 = vector.load %arg5[%c0_5, %c0_6, %c0_7] : memref<1x1x128xf32, #tpu.memory_space<vmem>>, vector<1x1x128xf32>
    %6 = vector.shape_cast %5 : vector<1x1x128xf32> to vector<1x128xf32>
    %7 = vector.broadcast %6 : vector<1x128xf32> to vector<32x128xf32>
    %8 = arith.addf %4, %7 : vector<32x128xf32>
    %cst_8 = arith.constant 0.000000e+00 : f32
    %9 = vector.broadcast %cst_8 : f32 to vector<32x128xf32>
    %10 = arith.maximumf %8, %9 : vector<32x128xf32>
    %11 = arith.truncf %10 : vector<32x128xf32> to vector<32x128xbf16>
    %c0_9 = arith.constant 0 : index
    %c0_10 = arith.constant 0 : index
    %c0_11 = arith.constant 0 : index
    %12 = vector.load %arg6[%c0_9, %c0_10, %c0_11] : memref<1x32x128xbf16, #tpu.memory_space<vmem>>, vector<1x32x128xbf16>
    %13 = vector.shape_cast %12 : vector<1x32x128xbf16> to vector<32x128xbf16>
    %14 = vector.shape_cast %11 : vector<32x128xbf16> to vector<1x32x128xbf16>
    tpu.vector_store %arg6[%c0_9, %c0_10, %c0_11], %14 {strides = array<i32>} : memref<1x32x128xbf16, #tpu.memory_space<vmem>>, vector<1x32x128xbf16>,
    return
  }
  func.func @transform_0(%arg0: i32, %arg1: i32, %arg2: i32) -> (i32, i32, i32) {
    %c0_i32 = arith.constant 0 : i32
    %c0_i32_0 = arith.constant 0 : i32
    return %arg0, %arg1, %c0_i32 : i32, i32, i32
  }
  func.func @transform_1(%arg0: i32, %arg1: i32, %arg2: i32) -> (i32, i32, i32) {
    %c0_i32 = arith.constant 0 : i32
    %c0_i32_0 = arith.constant 0 : i32
    return %arg0, %c0_i32, %arg2 : i32, i32, i32
  }
  func.func @transform_2(%arg0: i32, %arg1: i32, %arg2: i32) -> (i32, i32, i32) {
    %c0_i32 = arith.constant 0 : i32
    %c0_i32_0 = arith.constant 0 : i32
    return %arg0, %c0_i32, %arg2 : i32, i32, i32
  }
  func.func @transform_3(%arg0: i32, %arg1: i32, %arg2: i32) -> (i32, i32, i32) {
    %c0_i32 = arith.constant 0 : i32
    return %arg0, %arg1, %arg2 : i32, i32, i32
  }
}

module attributes {stable_mosaic.version = 11 : i64} {
  func.func @_conv3x3_kernel(%arg0: i32, %arg1: i32, %arg2: memref<1x1x6x10x128xbf16, #tpu.memory_space<vmem>>, %arg3: memref<1x1152x128xbf16, #tpu.memory_space<vmem>>, %arg4: memref<1x1x128xf32, #tpu.memory_space<vmem>>, %arg5: memref<1x1x32x128xbf16, #tpu.memory_space<vmem>>) attributes {dimension_semantics = [#tpu.dimension_semantics<parallel>, #tpu.dimension_semantics<parallel>], iteration_bounds = array<i64: 2, 2>, scalar_prefetch = 0 : i64, scratch_operands = 0 : i64, tpu.core_type = #tpu.core_type<tc>, window_params = [{transform_indices = @transform_0, window_bounds = array<i64: 1, 1, 6, 10, 128>}, {transform_indices = @transform_1, window_bounds = array<i64: 1, 1152, 128>}, {transform_indices = @transform_2, window_bounds = array<i64: 1, 1, 128>}, {transform_indices = @transform_3, window_bounds = array<i64: 1, 1, 32, 128>}]} {
    %cst = arith.constant 0.000000e+00 : f32
    %0 = vector.broadcast %cst : f32 to vector<32x128xf32>
    %c0 = arith.constant 0 : index
    %c0_0 = arith.constant 0 : index
    %c0_1 = arith.constant 0 : index
    %c0_2 = arith.constant 0 : index
    %c0_3 = arith.constant 0 : index
    %1 = vector.load %arg2[%c0, %c0_0, %c0_1, %c0_2, %c0_3] : memref<1x1x6x10x128xbf16, #tpu.memory_space<vmem>>, vector<1x1x4x8x128xbf16>
    %2 = vector.shape_cast %1 : vector<1x1x4x8x128xbf16> to vector<4x8x128xbf16>
    %3 = vector.shape_cast %2 : vector<4x8x128xbf16> to vector<32x128xbf16>
    %c0_4 = arith.constant 0 : index
    %c0_5 = arith.constant 0 : index
    %c0_6 = arith.constant 0 : index
    %4 = vector.load %arg3[%c0_4, %c0_5, %c0_6] : memref<1x1152x128xbf16, #tpu.memory_space<vmem>>, vector<1x128x128xbf16>
    %5 = vector.shape_cast %4 : vector<1x128x128xbf16> to vector<128x128xbf16>
    %cst_7 = arith.constant dense<0.000000e+00> : vector<32x128xf32>
    %6 = tpu.matmul %3, %5, %cst_7 {dimension_numbers = #tpu.dot_dimension_numbers<[1], [0], [0], [1], [0, 0, 1, 1], [], []>} : vector<32x128xbf16>, vector<128x128xbf16>, vector<32x128xf32> -> vector<32x128xf32>
    %7 = arith.addf %0, %6 : vector<32x128xf32>
    %c0_8 = arith.constant 0 : index
    %c0_9 = arith.constant 0 : index
    %c0_10 = arith.constant 0 : index
    %c1 = arith.constant 1 : index
    %c0_11 = arith.constant 0 : index
    %8 = vector.load %arg2[%c0_8, %c0_9, %c0_10, %c1, %c0_11] : memref<1x1x6x10x128xbf16, #tpu.memory_space<vmem>>, vector<1x1x4x8x128xbf16>
    %9 = vector.shape_cast %8 : vector<1x1x4x8x128xbf16> to vector<4x8x128xbf16>
    %10 = vector.shape_cast %9 : vector<4x8x128xbf16> to vector<32x128xbf16>
    %c0_12 = arith.constant 0 : index
    %c128 = arith.constant 128 : index
    %c0_13 = arith.constant 0 : index
    %11 = vector.load %arg3[%c0_12, %c128, %c0_13] : memref<1x1152x128xbf16, #tpu.memory_space<vmem>>, vector<1x128x128xbf16>
    %12 = vector.shape_cast %11 : vector<1x128x128xbf16> to vector<128x128xbf16>
    %cst_14 = arith.constant dense<0.000000e+00> : vector<32x128xf32>
    %13 = tpu.matmul %10, %12, %cst_14 {dimension_numbers = #tpu.dot_dimension_numbers<[1], [0], [0], [1], [0, 0, 1, 1], [], []>} : vector<32x128xbf16>, vector<128x128xbf16>, vector<32x128xf32> -> vector<32x128xf32>
    %14 = arith.addf %7, %13 : vector<32x128xf32>
    %c0_15 = arith.constant 0 : index
    %c0_16 = arith.constant 0 : index
    %c0_17 = arith.constant 0 : index
    %c2 = arith.constant 2 : index
    %c0_18 = arith.constant 0 : index
    %15 = vector.load %arg2[%c0_15, %c0_16, %c0_17, %c2, %c0_18] : memref<1x1x6x10x128xbf16, #tpu.memory_space<vmem>>, vector<1x1x4x8x128xbf16>
    %16 = vector.shape_cast %15 : vector<1x1x4x8x128xbf16> to vector<4x8x128xbf16>
    %17 = vector.shape_cast %16 : vector<4x8x128xbf16> to vector<32x128xbf16>
    %c0_19 = arith.constant 0 : index
    %c256 = arith.constant 256 : index
    %c0_20 = arith.constant 0 : index
    %18 = vector.load %arg3[%c0_19, %c256, %c0_20] : memref<1x1152x128xbf16, #tpu.memory_space<vmem>>, vector<1x128x128xbf16>
    %19 = vector.shape_cast %18 : vector<1x128x128xbf16> to vector<128x128xbf16>
    %cst_21 = arith.constant dense<0.000000e+00> : vector<32x128xf32>
    %20 = tpu.matmul %17, %19, %cst_21 {dimension_numbers = #tpu.dot_dimension_numbers<[1], [0], [0], [1], [0, 0, 1, 1], [], []>} : vector<32x128xbf16>, vector<128x128xbf16>, vector<32x128xf32> -> vector<32x128xf32>
    %21 = arith.addf %14, %20 : vector<32x128xf32>
    %c0_22 = arith.constant 0 : index
    %c0_23 = arith.constant 0 : index
    %c1_24 = arith.constant 1 : index
    %c0_25 = arith.constant 0 : index
    %c0_26 = arith.constant 0 : index
    %22 = vector.load %arg2[%c0_22, %c0_23, %c1_24, %c0_25, %c0_26] : memref<1x1x6x10x128xbf16, #tpu.memory_space<vmem>>, vector<1x1x4x8x128xbf16>
    %23 = vector.shape_cast %22 : vector<1x1x4x8x128xbf16> to vector<4x8x128xbf16>
    %24 = vector.shape_cast %23 : vector<4x8x128xbf16> to vector<32x128xbf16>
    %c0_27 = arith.constant 0 : index
    %c384 = arith.constant 384 : index
    %c0_28 = arith.constant 0 : index
    %25 = vector.load %arg3[%c0_27, %c384, %c0_28] : memref<1x1152x128xbf16, #tpu.memory_space<vmem>>, vector<1x128x128xbf16>
    %26 = vector.shape_cast %25 : vector<1x128x128xbf16> to vector<128x128xbf16>
    %cst_29 = arith.constant dense<0.000000e+00> : vector<32x128xf32>
    %27 = tpu.matmul %24, %26, %cst_29 {dimension_numbers = #tpu.dot_dimension_numbers<[1], [0], [0], [1], [0, 0, 1, 1], [], []>} : vector<32x128xbf16>, vector<128x128xbf16>, vector<32x128xf32> -> vector<32x128xf32>
    %28 = arith.addf %21, %27 : vector<32x128xf32>
    %c0_30 = arith.constant 0 : index
    %c0_31 = arith.constant 0 : index
    %c1_32 = arith.constant 1 : index
    %c1_33 = arith.constant 1 : index
    %c0_34 = arith.constant 0 : index
    %29 = vector.load %arg2[%c0_30, %c0_31, %c1_32, %c1_33, %c0_34] : memref<1x1x6x10x128xbf16, #tpu.memory_space<vmem>>, vector<1x1x4x8x128xbf16>
    %30 = vector.shape_cast %29 : vector<1x1x4x8x128xbf16> to vector<4x8x128xbf16>
    %31 = vector.shape_cast %30 : vector<4x8x128xbf16> to vector<32x128xbf16>
    %c0_35 = arith.constant 0 : index
    %c512 = arith.constant 512 : index
    %c0_36 = arith.constant 0 : index
    %32 = vector.load %arg3[%c0_35, %c512, %c0_36] : memref<1x1152x128xbf16, #tpu.memory_space<vmem>>, vector<1x128x128xbf16>
    %33 = vector.shape_cast %32 : vector<1x128x128xbf16> to vector<128x128xbf16>
    %cst_37 = arith.constant dense<0.000000e+00> : vector<32x128xf32>
    %34 = tpu.matmul %31, %33, %cst_37 {dimension_numbers = #tpu.dot_dimension_numbers<[1], [0], [0], [1], [0, 0, 1, 1], [], []>} : vector<32x128xbf16>, vector<128x128xbf16>, vector<32x128xf32> -> vector<32x128xf32>
    %35 = arith.addf %28, %34 : vector<32x128xf32>
    %c0_38 = arith.constant 0 : index
    %c0_39 = arith.constant 0 : index
    %c1_40 = arith.constant 1 : index
    %c2_41 = arith.constant 2 : index
    %c0_42 = arith.constant 0 : index
    %36 = vector.load %arg2[%c0_38, %c0_39, %c1_40, %c2_41, %c0_42] : memref<1x1x6x10x128xbf16, #tpu.memory_space<vmem>>, vector<1x1x4x8x128xbf16>
    %37 = vector.shape_cast %36 : vector<1x1x4x8x128xbf16> to vector<4x8x128xbf16>
    %38 = vector.shape_cast %37 : vector<4x8x128xbf16> to vector<32x128xbf16>
    %c0_43 = arith.constant 0 : index
    %c640 = arith.constant 640 : index
    %c0_44 = arith.constant 0 : index
    %39 = vector.load %arg3[%c0_43, %c640, %c0_44] : memref<1x1152x128xbf16, #tpu.memory_space<vmem>>, vector<1x128x128xbf16>
    %40 = vector.shape_cast %39 : vector<1x128x128xbf16> to vector<128x128xbf16>
    %cst_45 = arith.constant dense<0.000000e+00> : vector<32x128xf32>
    %41 = tpu.matmul %38, %40, %cst_45 {dimension_numbers = #tpu.dot_dimension_numbers<[1], [0], [0], [1], [0, 0, 1, 1], [], []>} : vector<32x128xbf16>, vector<128x128xbf16>, vector<32x128xf32> -> vector<32x128xf32>
    %42 = arith.addf %35, %41 : vector<32x128xf32>
    %c0_46 = arith.constant 0 : index
    %c0_47 = arith.constant 0 : index
    %c2_48 = arith.constant 2 : index
    %c0_49 = arith.constant 0 : index
    %c0_50 = arith.constant 0 : index
    %43 = vector.load %arg2[%c0_46, %c0_47, %c2_48, %c0_49, %c0_50] : memref<1x1x6x10x128xbf16, #tpu.memory_space<vmem>>, vector<1x1x4x8x128xbf16>
    %44 = vector.shape_cast %43 : vector<1x1x4x8x128xbf16> to vector<4x8x128xbf16>
    %45 = vector.shape_cast %44 : vector<4x8x128xbf16> to vector<32x128xbf16>
    %c0_51 = arith.constant 0 : index
    %c768 = arith.constant 768 : index
    %c0_52 = arith.constant 0 : index
    %46 = vector.load %arg3[%c0_51, %c768, %c0_52] : memref<1x1152x128xbf16, #tpu.memory_space<vmem>>, vector<1x128x128xbf16>
    %47 = vector.shape_cast %46 : vector<1x128x128xbf16> to vector<128x128xbf16>
    %cst_53 = arith.constant dense<0.000000e+00> : vector<32x128xf32>
    %48 = tpu.matmul %45, %47, %cst_53 {dimension_numbers = #tpu.dot_dimension_numbers<[1], [0], [0], [1], [0, 0, 1, 1], [], []>} : vector<32x128xbf16>, vector<128x128xbf16>, vector<32x128xf32> -> vector<32x128xf32>
    %49 = arith.addf %42, %48 : vector<32x128xf32>
    %c0_54 = arith.constant 0 : index
    %c0_55 = arith.constant 0 : index
    %c2_56 = arith.constant 2 : index
    %c1_57 = arith.constant 1 : index
    %c0_58 = arith.constant 0 : index
    %50 = vector.load %arg2[%c0_54, %c0_55, %c2_56, %c1_57, %c0_58] : memref<1x1x6x10x128xbf16, #tpu.memory_space<vmem>>, vector<1x1x4x8x128xbf16>
    %51 = vector.shape_cast %50 : vector<1x1x4x8x128xbf16> to vector<4x8x128xbf16>
    %52 = vector.shape_cast %51 : vector<4x8x128xbf16> to vector<32x128xbf16>
    %c0_59 = arith.constant 0 : index
    %c896 = arith.constant 896 : index
    %c0_60 = arith.constant 0 : index
    %53 = vector.load %arg3[%c0_59, %c896, %c0_60] : memref<1x1152x128xbf16, #tpu.memory_space<vmem>>, vector<1x128x128xbf16>
    %54 = vector.shape_cast %53 : vector<1x128x128xbf16> to vector<128x128xbf16>
    %cst_61 = arith.constant dense<0.000000e+00> : vector<32x128xf32>
    %55 = tpu.matmul %52, %54, %cst_61 {dimension_numbers = #tpu.dot_dimension_numbers<[1], [0], [0], [1], [0, 0, 1, 1], [], []>} : vector<32x128xbf16>, vector<128x128xbf16>, vector<32x128xf32> -> vector<32x128xf32>
    %56 = arith.addf %49, %55 : vector<32x128xf32>
    %c0_62 = arith.constant 0 : index
    %c0_63 = arith.constant 0 : index
    %c2_64 = arith.constant 2 : index
    %c2_65 = arith.constant 2 : index
    %c0_66 = arith.constant 0 : index
    %57 = vector.load %arg2[%c0_62, %c0_63, %c2_64, %c2_65, %c0_66] : memref<1x1x6x10x128xbf16, #tpu.memory_space<vmem>>, vector<1x1x4x8x128xbf16>
    %58 = vector.shape_cast %57 : vector<1x1x4x8x128xbf16> to vector<4x8x128xbf16>
    %59 = vector.shape_cast %58 : vector<4x8x128xbf16> to vector<32x128xbf16>
    %c0_67 = arith.constant 0 : index
    %c1024 = arith.constant 1024 : index
    %c0_68 = arith.constant 0 : index
    %60 = vector.load %arg3[%c0_67, %c1024, %c0_68] : memref<1x1152x128xbf16, #tpu.memory_space<vmem>>, vector<1x128x128xbf16>
    %61 = vector.shape_cast %60 : vector<1x128x128xbf16> to vector<128x128xbf16>
    %cst_69 = arith.constant dense<0.000000e+00> : vector<32x128xf32>
    %62 = tpu.matmul %59, %61, %cst_69 {dimension_numbers = #tpu.dot_dimension_numbers<[1], [0], [0], [1], [0, 0, 1, 1], [], []>} : vector<32x128xbf16>, vector<128x128xbf16>, vector<32x128xf32> -> vector<32x128xf32>
    %63 = arith.addf %56, %62 : vector<32x128xf32>
    %c0_70 = arith.constant 0 : index
    %c0_71 = arith.constant 0 : index
    %c0_72 = arith.constant 0 : index
    %64 = vector.load %arg4[%c0_70, %c0_71, %c0_72] : memref<1x1x128xf32, #tpu.memory_space<vmem>>, vector<1x1x128xf32>
    %65 = vector.shape_cast %64 : vector<1x1x128xf32> to vector<1x128xf32>
    %66 = vector.broadcast %65 : vector<1x128xf32> to vector<32x128xf32>
    %67 = arith.addf %63, %66 : vector<32x128xf32>
    %cst_73 = arith.constant 0.000000e+00 : f32
    %68 = vector.broadcast %cst_73 : f32 to vector<32x128xf32>
    %69 = arith.maximumf %67, %68 : vector<32x128xf32>
    %70 = arith.truncf %69 : vector<32x128xf32> to vector<32x128xbf16>
    %c0_74 = arith.constant 0 : index
    %c0_75 = arith.constant 0 : index
    %c0_76 = arith.constant 0 : index
    %c0_77 = arith.constant 0 : index
    %71 = vector.load %arg5[%c0_74, %c0_75, %c0_76, %c0_77] : memref<1x1x32x128xbf16, #tpu.memory_space<vmem>>, vector<1x1x32x128xbf16>
    %72 = vector.shape_cast %71 : vector<1x1x32x128xbf16> to vector<32x128xbf16>
    %73 = vector.shape_cast %70 : vector<32x128xbf16> to vector<1x1x32x128xbf16>
    tpu.vector_store %arg5[%c0_74, %c0_75, %c0_76, %c0_77], %73 {strides = array<i32>} : memref<1x1x32x128xbf16, #tpu.memory_space<vmem>>, vector<1x1x32x128xbf16>,
    return
  }
  func.func @transform_0(%arg0: i32, %arg1: i32) -> (i32, i32, i32, i32, i32) {
    %c0_i32 = arith.constant 0 : i32
    %c0_i32_0 = arith.constant 0 : i32
    %c0_i32_1 = arith.constant 0 : i32
    %c0_i32_2 = arith.constant 0 : i32
    return %arg0, %arg1, %c0_i32, %c0_i32_0, %c0_i32_1 : i32, i32, i32, i32, i32
  }
  func.func @transform_1(%arg0: i32, %arg1: i32) -> (i32, i32, i32) {
    %c0_i32 = arith.constant 0 : i32
    %c0_i32_0 = arith.constant 0 : i32
    %c0_i32_1 = arith.constant 0 : i32
    return %arg0, %c0_i32, %c0_i32_0 : i32, i32, i32
  }
  func.func @transform_2(%arg0: i32, %arg1: i32) -> (i32, i32, i32) {
    %c0_i32 = arith.constant 0 : i32
    %c0_i32_0 = arith.constant 0 : i32
    %c0_i32_1 = arith.constant 0 : i32
    return %arg0, %c0_i32, %c0_i32_0 : i32, i32, i32
  }
  func.func @transform_3(%arg0: i32, %arg1: i32) -> (i32, i32, i32, i32) {
    %c0_i32 = arith.constant 0 : i32
    %c0_i32_0 = arith.constant 0 : i32
    %c0_i32_1 = arith.constant 0 : i32
    return %arg0, %arg1, %c0_i32, %c0_i32_0 : i32, i32, i32, i32
  }
}

module attributes {stable_mosaic.version = 11 : i64} {
  func.func @_mm_kernel(%arg0: i32, %arg1: i32, %arg2: i32, %arg3: memref<1x32x512xbf16, #tpu.memory_space<vmem>>, %arg4: memref<1x512x256xbf16, #tpu.memory_space<vmem>>, %arg5: memref<1x1x256xf32, #tpu.memory_space<vmem>>, %arg6: memref<1x32x256xbf16, #tpu.memory_space<vmem>>) attributes {dimension_semantics = [#tpu.dimension_semantics<parallel>, #tpu.dimension_semantics<parallel>, #tpu.dimension_semantics<parallel>], iteration_bounds = array<i64: 2, 1, 1>, scalar_prefetch = 0 : i64, scratch_operands = 0 : i64, tpu.core_type = #tpu.core_type<tc>, window_params = [{transform_indices = @transform_0, window_bounds = array<i64: 1, 32, 512>}, {transform_indices = @transform_1, window_bounds = array<i64: 1, 512, 256>}, {transform_indices = @transform_2, window_bounds = array<i64: 1, 1, 256>}, {transform_indices = @transform_3, window_bounds = array<i64: 1, 32, 256>}]} {
    %c0 = arith.constant 0 : index
    %c0_0 = arith.constant 0 : index
    %c0_1 = arith.constant 0 : index
    %0 = vector.load %arg3[%c0, %c0_0, %c0_1] : memref<1x32x512xbf16, #tpu.memory_space<vmem>>, vector<1x32x512xbf16>
    %1 = vector.shape_cast %0 : vector<1x32x512xbf16> to vector<32x512xbf16>
    %c0_2 = arith.constant 0 : index
    %c0_3 = arith.constant 0 : index
    %c0_4 = arith.constant 0 : index
    %2 = vector.load %arg4[%c0_2, %c0_3, %c0_4] : memref<1x512x256xbf16, #tpu.memory_space<vmem>>, vector<1x512x256xbf16>
    %3 = vector.shape_cast %2 : vector<1x512x256xbf16> to vector<512x256xbf16>
    %cst = arith.constant dense<0.000000e+00> : vector<32x256xf32>
    %4 = tpu.matmul %1, %3, %cst {dimension_numbers = #tpu.dot_dimension_numbers<[1], [0], [0], [1], [0, 0, 1, 1], [], []>} : vector<32x512xbf16>, vector<512x256xbf16>, vector<32x256xf32> -> vector<32x256xf32>
    %c0_5 = arith.constant 0 : index
    %c0_6 = arith.constant 0 : index
    %c0_7 = arith.constant 0 : index
    %5 = vector.load %arg5[%c0_5, %c0_6, %c0_7] : memref<1x1x256xf32, #tpu.memory_space<vmem>>, vector<1x1x256xf32>
    %6 = vector.shape_cast %5 : vector<1x1x256xf32> to vector<1x256xf32>
    %7 = vector.broadcast %6 : vector<1x256xf32> to vector<32x256xf32>
    %8 = arith.addf %4, %7 : vector<32x256xf32>
    %cst_8 = arith.constant 0.000000e+00 : f32
    %9 = vector.broadcast %cst_8 : f32 to vector<32x256xf32>
    %10 = arith.maximumf %8, %9 : vector<32x256xf32>
    %11 = arith.truncf %10 : vector<32x256xf32> to vector<32x256xbf16>
    %c0_9 = arith.constant 0 : index
    %c0_10 = arith.constant 0 : index
    %c0_11 = arith.constant 0 : index
    %12 = vector.load %arg6[%c0_9, %c0_10, %c0_11] : memref<1x32x256xbf16, #tpu.memory_space<vmem>>, vector<1x32x256xbf16>
    %13 = vector.shape_cast %12 : vector<1x32x256xbf16> to vector<32x256xbf16>
    %14 = vector.shape_cast %11 : vector<32x256xbf16> to vector<1x32x256xbf16>
    tpu.vector_store %arg6[%c0_9, %c0_10, %c0_11], %14 {strides = array<i32>} : memref<1x32x256xbf16, #tpu.memory_space<vmem>>, vector<1x32x256xbf16>,
    return
  }
  func.func @transform_0(%arg0: i32, %arg1: i32, %arg2: i32) -> (i32, i32, i32) {
    %c0_i32 = arith.constant 0 : i32
    %c0_i32_0 = arith.constant 0 : i32
    return %arg0, %arg1, %c0_i32 : i32, i32, i32
  }
  func.func @transform_1(%arg0: i32, %arg1: i32, %arg2: i32) -> (i32, i32, i32) {
    %c0_i32 = arith.constant 0 : i32
    %c0_i32_0 = arith.constant 0 : i32
    return %arg0, %c0_i32, %arg2 : i32, i32, i32
  }
  func.func @transform_2(%arg0: i32, %arg1: i32, %arg2: i32) -> (i32, i32, i32) {
    %c0_i32 = arith.constant 0 : i32
    %c0_i32_0 = arith.constant 0 : i32
    return %arg0, %c0_i32, %arg2 : i32, i32, i32
  }
  func.func @transform_3(%arg0: i32, %arg1: i32, %arg2: i32) -> (i32, i32, i32) {
    %c0_i32 = arith.constant 0 : i32
    return %arg0, %arg1, %arg2 : i32, i32, i32
  }
}

module attributes {stable_mosaic.version = 11 : i64} {
  func.func @_mm_kernel(%arg0: i32, %arg1: i32, %arg2: i32, %arg3: memref<1x8x2304xbf16, #tpu.memory_space<vmem>>, %arg4: memref<1x2304x256xbf16, #tpu.memory_space<vmem>>, %arg5: memref<1x1x256xf32, #tpu.memory_space<vmem>>, %arg6: memref<1x8x256xbf16, #tpu.memory_space<vmem>>) attributes {dimension_semantics = [#tpu.dimension_semantics<parallel>, #tpu.dimension_semantics<parallel>, #tpu.dimension_semantics<parallel>], iteration_bounds = array<i64: 2, 1, 1>, scalar_prefetch = 0 : i64, scratch_operands = 0 : i64, tpu.core_type = #tpu.core_type<tc>, window_params = [{transform_indices = @transform_0, window_bounds = array<i64: 1, 8, 2304>}, {transform_indices = @transform_1, window_bounds = array<i64: 1, 2304, 256>}, {transform_indices = @transform_2, window_bounds = array<i64: 1, 1, 256>}, {transform_indices = @transform_3, window_bounds = array<i64: 1, 8, 256>}]} {
    %c0 = arith.constant 0 : index
    %c0_0 = arith.constant 0 : index
    %c0_1 = arith.constant 0 : index
    %0 = vector.load %arg3[%c0, %c0_0, %c0_1] : memref<1x8x2304xbf16, #tpu.memory_space<vmem>>, vector<1x8x2304xbf16>
    %1 = vector.shape_cast %0 : vector<1x8x2304xbf16> to vector<8x2304xbf16>
    %c0_2 = arith.constant 0 : index
    %c0_3 = arith.constant 0 : index
    %c0_4 = arith.constant 0 : index
    %2 = vector.load %arg4[%c0_2, %c0_3, %c0_4] : memref<1x2304x256xbf16, #tpu.memory_space<vmem>>, vector<1x2304x256xbf16>
    %3 = vector.shape_cast %2 : vector<1x2304x256xbf16> to vector<2304x256xbf16>
    %cst = arith.constant dense<0.000000e+00> : vector<8x256xf32>
    %4 = tpu.matmul %1, %3, %cst {dimension_numbers = #tpu.dot_dimension_numbers<[1], [0], [0], [1], [0, 0, 1, 1], [], []>} : vector<8x2304xbf16>, vector<2304x256xbf16>, vector<8x256xf32> -> vector<8x256xf32>
    %c0_5 = arith.constant 0 : index
    %c0_6 = arith.constant 0 : index
    %c0_7 = arith.constant 0 : index
    %5 = vector.load %arg5[%c0_5, %c0_6, %c0_7] : memref<1x1x256xf32, #tpu.memory_space<vmem>>, vector<1x1x256xf32>
    %6 = vector.shape_cast %5 : vector<1x1x256xf32> to vector<1x256xf32>
    %7 = vector.broadcast %6 : vector<1x256xf32> to vector<8x256xf32>
    %8 = arith.addf %4, %7 : vector<8x256xf32>
    %cst_8 = arith.constant 0.000000e+00 : f32
    %9 = vector.broadcast %cst_8 : f32 to vector<8x256xf32>
    %10 = arith.maximumf %8, %9 : vector<8x256xf32>
    %11 = arith.truncf %10 : vector<8x256xf32> to vector<8x256xbf16>
    %c0_9 = arith.constant 0 : index
    %c0_10 = arith.constant 0 : index
    %c0_11 = arith.constant 0 : index
    %12 = vector.load %arg6[%c0_9, %c0_10, %c0_11] : memref<1x8x256xbf16, #tpu.memory_space<vmem>>, vector<1x8x256xbf16>
    %13 = vector.shape_cast %12 : vector<1x8x256xbf16> to vector<8x256xbf16>
    %14 = vector.shape_cast %11 : vector<8x256xbf16> to vector<1x8x256xbf16>
    tpu.vector_store %arg6[%c0_9, %c0_10, %c0_11], %14 {strides = array<i32>} : memref<1x8x256xbf16, #tpu.memory_space<vmem>>, vector<1x8x256xbf16>,
    return
  }
  func.func @transform_0(%arg0: i32, %arg1: i32, %arg2: i32) -> (i32, i32, i32) {
    %c0_i32 = arith.constant 0 : i32
    %c0_i32_0 = arith.constant 0 : i32
    return %arg0, %arg1, %c0_i32 : i32, i32, i32
  }
  func.func @transform_1(%arg0: i32, %arg1: i32, %arg2: i32) -> (i32, i32, i32) {
    %c0_i32 = arith.constant 0 : i32
    %c0_i32_0 = arith.constant 0 : i32
    return %arg0, %c0_i32, %arg2 : i32, i32, i32
  }
  func.func @transform_2(%arg0: i32, %arg1: i32, %arg2: i32) -> (i32, i32, i32) {
    %c0_i32 = arith.constant 0 : i32
    %c0_i32_0 = arith.constant 0 : i32
    return %arg0, %c0_i32, %arg2 : i32, i32, i32
  }
  func.func @transform_3(%arg0: i32, %arg1: i32, %arg2: i32) -> (i32, i32, i32) {
    %c0_i32 = arith.constant 0 : i32
    return %arg0, %arg1, %arg2 : i32, i32, i32
  }
}

module attributes {stable_mosaic.version = 11 : i64} {
  func.func @_mm_kernel(%arg0: i32, %arg1: i32, %arg2: i32, %arg3: memref<1x8x512xbf16, #tpu.memory_space<vmem>>, %arg4: memref<1x512x1024xbf16, #tpu.memory_space<vmem>>, %arg5: memref<1x1x1024xf32, #tpu.memory_space<vmem>>, %arg6: memref<1x8x1024xbf16, #tpu.memory_space<vmem>>) attributes {dimension_semantics = [#tpu.dimension_semantics<parallel>, #tpu.dimension_semantics<parallel>, #tpu.dimension_semantics<parallel>], iteration_bounds = array<i64: 2, 1, 1>, scalar_prefetch = 0 : i64, scratch_operands = 0 : i64, tpu.core_type = #tpu.core_type<tc>, window_params = [{transform_indices = @transform_0, window_bounds = array<i64: 1, 8, 512>}, {transform_indices = @transform_1, window_bounds = array<i64: 1, 512, 1024>}, {transform_indices = @transform_2, window_bounds = array<i64: 1, 1, 1024>}, {transform_indices = @transform_3, window_bounds = array<i64: 1, 8, 1024>}]} {
    %c0 = arith.constant 0 : index
    %c0_0 = arith.constant 0 : index
    %c0_1 = arith.constant 0 : index
    %0 = vector.load %arg3[%c0, %c0_0, %c0_1] : memref<1x8x512xbf16, #tpu.memory_space<vmem>>, vector<1x8x512xbf16>
    %1 = vector.shape_cast %0 : vector<1x8x512xbf16> to vector<8x512xbf16>
    %c0_2 = arith.constant 0 : index
    %c0_3 = arith.constant 0 : index
    %c0_4 = arith.constant 0 : index
    %2 = vector.load %arg4[%c0_2, %c0_3, %c0_4] : memref<1x512x1024xbf16, #tpu.memory_space<vmem>>, vector<1x512x1024xbf16>
    %3 = vector.shape_cast %2 : vector<1x512x1024xbf16> to vector<512x1024xbf16>
    %cst = arith.constant dense<0.000000e+00> : vector<8x1024xf32>
    %4 = tpu.matmul %1, %3, %cst {dimension_numbers = #tpu.dot_dimension_numbers<[1], [0], [0], [1], [0, 0, 1, 1], [], []>} : vector<8x512xbf16>, vector<512x1024xbf16>, vector<8x1024xf32> -> vector<8x1024xf32>
    %c0_5 = arith.constant 0 : index
    %c0_6 = arith.constant 0 : index
    %c0_7 = arith.constant 0 : index
    %5 = vector.load %arg5[%c0_5, %c0_6, %c0_7] : memref<1x1x1024xf32, #tpu.memory_space<vmem>>, vector<1x1x1024xf32>
    %6 = vector.shape_cast %5 : vector<1x1x1024xf32> to vector<1x1024xf32>
    %7 = vector.broadcast %6 : vector<1x1024xf32> to vector<8x1024xf32>
    %8 = arith.addf %4, %7 : vector<8x1024xf32>
    %9 = arith.truncf %8 : vector<8x1024xf32> to vector<8x1024xbf16>
    %c0_8 = arith.constant 0 : index
    %c0_9 = arith.constant 0 : index
    %c0_10 = arith.constant 0 : index
    %10 = vector.load %arg6[%c0_8, %c0_9, %c0_10] : memref<1x8x1024xbf16, #tpu.memory_space<vmem>>, vector<1x8x1024xbf16>
    %11 = vector.shape_cast %10 : vector<1x8x1024xbf16> to vector<8x1024xbf16>
    %12 = vector.shape_cast %9 : vector<8x1024xbf16> to vector<1x8x1024xbf16>
    tpu.vector_store %arg6[%c0_8, %c0_9, %c0_10], %12 {strides = array<i32>} : memref<1x8x1024xbf16, #tpu.memory_space<vmem>>, vector<1x8x1024xbf16>,
    return
  }
  func.func @transform_0(%arg0: i32, %arg1: i32, %arg2: i32) -> (i32, i32, i32) {
    %c0_i32 = arith.constant 0 : i32
    %c0_i32_0 = arith.constant 0 : i32
    return %arg0, %arg1, %c0_i32 : i32, i32, i32
  }
  func.func @transform_1(%arg0: i32, %arg1: i32, %arg2: i32) -> (i32, i32, i32) {
    %c0_i32 = arith.constant 0 : i32
    %c0_i32_0 = arith.constant 0 : i32
    return %arg0, %c0_i32, %arg2 : i32, i32, i32
  }
  func.func @transform_2(%arg0: i32, %arg1: i32, %arg2: i32) -> (i32, i32, i32) {
    %c0_i32 = arith.constant 0 : i32
    %c0_i32_0 = arith.constant 0 : i32
    return %arg0, %c0_i32, %arg2 : i32, i32, i32
  }
  func.func @transform_3(%arg0: i32, %arg1: i32, %arg2: i32) -> (i32, i32, i32) {
    %c0_i32 = arith.constant 0 : i32
    return %arg0, %arg1, %arg2 : i32, i32, i32
  }
}

module attributes {stable_mosaic.version = 11 : i64} {
  func.func @_mm_res_kernel(%arg0: i32, %arg1: i32, %arg2: i32, %arg3: memref<1x8x256xbf16, #tpu.memory_space<vmem>>, %arg4: memref<1x256x1024xbf16, #tpu.memory_space<vmem>>, %arg5: memref<1x1x1024xf32, #tpu.memory_space<vmem>>, %arg6: memref<1x8x1024xbf16, #tpu.memory_space<vmem>>, %arg7: memref<1x8x1024xbf16, #tpu.memory_space<vmem>>) attributes {dimension_semantics = [#tpu.dimension_semantics<parallel>, #tpu.dimension_semantics<parallel>, #tpu.dimension_semantics<parallel>], iteration_bounds = array<i64: 2, 1, 1>, scalar_prefetch = 0 : i64, scratch_operands = 0 : i64, tpu.core_type = #tpu.core_type<tc>, window_params = [{transform_indices = @transform_0, window_bounds = array<i64: 1, 8, 256>}, {transform_indices = @transform_1, window_bounds = array<i64: 1, 256, 1024>}, {transform_indices = @transform_2, window_bounds = array<i64: 1, 1, 1024>}, {transform_indices = @transform_3, window_bounds = array<i64: 1, 8, 1024>}, {transform_indices = @transform_4, window_bounds = array<i64: 1, 8, 1024>}]} {
    %c0 = arith.constant 0 : index
    %c0_0 = arith.constant 0 : index
    %c0_1 = arith.constant 0 : index
    %0 = vector.load %arg3[%c0, %c0_0, %c0_1] : memref<1x8x256xbf16, #tpu.memory_space<vmem>>, vector<1x8x256xbf16>
    %1 = vector.shape_cast %0 : vector<1x8x256xbf16> to vector<8x256xbf16>
    %c0_2 = arith.constant 0 : index
    %c0_3 = arith.constant 0 : index
    %c0_4 = arith.constant 0 : index
    %2 = vector.load %arg4[%c0_2, %c0_3, %c0_4] : memref<1x256x1024xbf16, #tpu.memory_space<vmem>>, vector<1x256x1024xbf16>
    %3 = vector.shape_cast %2 : vector<1x256x1024xbf16> to vector<256x1024xbf16>
    %cst = arith.constant dense<0.000000e+00> : vector<8x1024xf32>
    %4 = tpu.matmul %1, %3, %cst {dimension_numbers = #tpu.dot_dimension_numbers<[1], [0], [0], [1], [0, 0, 1, 1], [], []>} : vector<8x256xbf16>, vector<256x1024xbf16>, vector<8x1024xf32> -> vector<8x1024xf32>
    %c0_5 = arith.constant 0 : index
    %c0_6 = arith.constant 0 : index
    %c0_7 = arith.constant 0 : index
    %5 = vector.load %arg5[%c0_5, %c0_6, %c0_7] : memref<1x1x1024xf32, #tpu.memory_space<vmem>>, vector<1x1x1024xf32>
    %6 = vector.shape_cast %5 : vector<1x1x1024xf32> to vector<1x1024xf32>
    %7 = vector.broadcast %6 : vector<1x1024xf32> to vector<8x1024xf32>
    %8 = arith.addf %4, %7 : vector<8x1024xf32>
    %c0_8 = arith.constant 0 : index
    %c0_9 = arith.constant 0 : index
    %c0_10 = arith.constant 0 : index
    %9 = vector.load %arg6[%c0_8, %c0_9, %c0_10] : memref<1x8x1024xbf16, #tpu.memory_space<vmem>>, vector<1x8x1024xbf16>
    %10 = vector.shape_cast %9 : vector<1x8x1024xbf16> to vector<8x1024xbf16>
    %11 = arith.extf %10 : vector<8x1024xbf16> to vector<8x1024xf32>
    %12 = arith.addf %8, %11 : vector<8x1024xf32>
    %cst_11 = arith.constant 0.000000e+00 : f32
    %13 = vector.broadcast %cst_11 : f32 to vector<8x1024xf32>
    %14 = arith.maximumf %12, %13 : vector<8x1024xf32>
    %15 = arith.truncf %14 : vector<8x1024xf32> to vector<8x1024xbf16>
    %c0_12 = arith.constant 0 : index
    %c0_13 = arith.constant 0 : index
    %c0_14 = arith.constant 0 : index
    %16 = vector.load %arg7[%c0_12, %c0_13, %c0_14] : memref<1x8x1024xbf16, #tpu.memory_space<vmem>>, vector<1x8x1024xbf16>
    %17 = vector.shape_cast %16 : vector<1x8x1024xbf16> to vector<8x1024xbf16>
    %18 = vector.shape_cast %15 : vector<8x1024xbf16> to vector<1x8x1024xbf16>
    tpu.vector_store %arg7[%c0_12, %c0_13, %c0_14], %18 {strides = array<i32>} : memref<1x8x1024xbf16, #tpu.memory_space<vmem>>, vector<1x8x1024xbf16>,
    return
  }
  func.func @transform_0(%arg0: i32, %arg1: i32, %arg2: i32) -> (i32, i32, i32) {
    %c0_i32 = arith.constant 0 : i32
    %c0_i32_0 = arith.constant 0 : i32
    return %arg0, %arg1, %c0_i32 : i32, i32, i32
  }
  func.func @transform_1(%arg0: i32, %arg1: i32, %arg2: i32) -> (i32, i32, i32) {
    %c0_i32 = arith.constant 0 : i32
    %c0_i32_0 = arith.constant 0 : i32
    return %arg0, %c0_i32, %arg2 : i32, i32, i32
  }
  func.func @transform_2(%arg0: i32, %arg1: i32, %arg2: i32) -> (i32, i32, i32) {
    %c0_i32 = arith.constant 0 : i32
    %c0_i32_0 = arith.constant 0 : i32
    return %arg0, %c0_i32, %arg2 : i32, i32, i32
  }
  func.func @transform_3(%arg0: i32, %arg1: i32, %arg2: i32) -> (i32, i32, i32) {
    %c0_i32 = arith.constant 0 : i32
    return %arg0, %arg1, %arg2 : i32, i32, i32
  }
  func.func @transform_4(%arg0: i32, %arg1: i32, %arg2: i32) -> (i32, i32, i32) {
    %c0_i32 = arith.constant 0 : i32
    return %arg0, %arg1, %arg2 : i32, i32, i32
  }
}

module attributes {stable_mosaic.version = 11 : i64} {
  func.func @_mm_kernel(%arg0: i32, %arg1: i32, %arg2: i32, %arg3: memref<1x8x1024xbf16, #tpu.memory_space<vmem>>, %arg4: memref<1x1024x256xbf16, #tpu.memory_space<vmem>>, %arg5: memref<1x1x256xf32, #tpu.memory_space<vmem>>, %arg6: memref<1x8x256xbf16, #tpu.memory_space<vmem>>) attributes {dimension_semantics = [#tpu.dimension_semantics<parallel>, #tpu.dimension_semantics<parallel>, #tpu.dimension_semantics<parallel>], iteration_bounds = array<i64: 2, 1, 1>, scalar_prefetch = 0 : i64, scratch_operands = 0 : i64, tpu.core_type = #tpu.core_type<tc>, window_params = [{transform_indices = @transform_0, window_bounds = array<i64: 1, 8, 1024>}, {transform_indices = @transform_1, window_bounds = array<i64: 1, 1024, 256>}, {transform_indices = @transform_2, window_bounds = array<i64: 1, 1, 256>}, {transform_indices = @transform_3, window_bounds = array<i64: 1, 8, 256>}]} {
    %c0 = arith.constant 0 : index
    %c0_0 = arith.constant 0 : index
    %c0_1 = arith.constant 0 : index
    %0 = vector.load %arg3[%c0, %c0_0, %c0_1] : memref<1x8x1024xbf16, #tpu.memory_space<vmem>>, vector<1x8x1024xbf16>
    %1 = vector.shape_cast %0 : vector<1x8x1024xbf16> to vector<8x1024xbf16>
    %c0_2 = arith.constant 0 : index
    %c0_3 = arith.constant 0 : index
    %c0_4 = arith.constant 0 : index
    %2 = vector.load %arg4[%c0_2, %c0_3, %c0_4] : memref<1x1024x256xbf16, #tpu.memory_space<vmem>>, vector<1x1024x256xbf16>
    %3 = vector.shape_cast %2 : vector<1x1024x256xbf16> to vector<1024x256xbf16>
    %cst = arith.constant dense<0.000000e+00> : vector<8x256xf32>
    %4 = tpu.matmul %1, %3, %cst {dimension_numbers = #tpu.dot_dimension_numbers<[1], [0], [0], [1], [0, 0, 1, 1], [], []>} : vector<8x1024xbf16>, vector<1024x256xbf16>, vector<8x256xf32> -> vector<8x256xf32>
    %c0_5 = arith.constant 0 : index
    %c0_6 = arith.constant 0 : index
    %c0_7 = arith.constant 0 : index
    %5 = vector.load %arg5[%c0_5, %c0_6, %c0_7] : memref<1x1x256xf32, #tpu.memory_space<vmem>>, vector<1x1x256xf32>
    %6 = vector.shape_cast %5 : vector<1x1x256xf32> to vector<1x256xf32>
    %7 = vector.broadcast %6 : vector<1x256xf32> to vector<8x256xf32>
    %8 = arith.addf %4, %7 : vector<8x256xf32>
    %cst_8 = arith.constant 0.000000e+00 : f32
    %9 = vector.broadcast %cst_8 : f32 to vector<8x256xf32>
    %10 = arith.maximumf %8, %9 : vector<8x256xf32>
    %11 = arith.truncf %10 : vector<8x256xf32> to vector<8x256xbf16>
    %c0_9 = arith.constant 0 : index
    %c0_10 = arith.constant 0 : index
    %c0_11 = arith.constant 0 : index
    %12 = vector.load %arg6[%c0_9, %c0_10, %c0_11] : memref<1x8x256xbf16, #tpu.memory_space<vmem>>, vector<1x8x256xbf16>
    %13 = vector.shape_cast %12 : vector<1x8x256xbf16> to vector<8x256xbf16>
    %14 = vector.shape_cast %11 : vector<8x256xbf16> to vector<1x8x256xbf16>
    tpu.vector_store %arg6[%c0_9, %c0_10, %c0_11], %14 {strides = array<i32>} : memref<1x8x256xbf16, #tpu.memory_space<vmem>>, vector<1x8x256xbf16>,
    return
  }
  func.func @transform_0(%arg0: i32, %arg1: i32, %arg2: i32) -> (i32, i32, i32) {
    %c0_i32 = arith.constant 0 : i32
    %c0_i32_0 = arith.constant 0 : i32
    return %arg0, %arg1, %c0_i32 : i32, i32, i32
  }
  func.func @transform_1(%arg0: i32, %arg1: i32, %arg2: i32) -> (i32, i32, i32) {
    %c0_i32 = arith.constant 0 : i32
    %c0_i32_0 = arith.constant 0 : i32
    return %arg0, %c0_i32, %arg2 : i32, i32, i32
  }
  func.func @transform_2(%arg0: i32, %arg1: i32, %arg2: i32) -> (i32, i32, i32) {
    %c0_i32 = arith.constant 0 : i32
    %c0_i32_0 = arith.constant 0 : i32
    return %arg0, %c0_i32, %arg2 : i32, i32, i32
  }
  func.func @transform_3(%arg0: i32, %arg1: i32, %arg2: i32) -> (i32, i32, i32) {
    %c0_i32 = arith.constant 0 : i32
    return %arg0, %arg1, %arg2 : i32, i32, i32
  }
}

module attributes {stable_mosaic.version = 11 : i64} {
  func.func @_conv3x3_kernel(%arg0: i32, %arg1: i32, %arg2: memref<1x1x4x10x256xbf16, #tpu.memory_space<vmem>>, %arg3: memref<1x2304x256xbf16, #tpu.memory_space<vmem>>, %arg4: memref<1x1x256xf32, #tpu.memory_space<vmem>>, %arg5: memref<1x1x16x256xbf16, #tpu.memory_space<vmem>>) attributes {dimension_semantics = [#tpu.dimension_semantics<parallel>, #tpu.dimension_semantics<parallel>], iteration_bounds = array<i64: 2, 2>, scalar_prefetch = 0 : i64, scratch_operands = 0 : i64, tpu.core_type = #tpu.core_type<tc>, window_params = [{transform_indices = @transform_0, window_bounds = array<i64: 1, 1, 4, 10, 256>}, {transform_indices = @transform_1, window_bounds = array<i64: 1, 2304, 256>}, {transform_indices = @transform_2, window_bounds = array<i64: 1, 1, 256>}, {transform_indices = @transform_3, window_bounds = array<i64: 1, 1, 16, 256>}]} {
    %cst = arith.constant 0.000000e+00 : f32
    %0 = vector.broadcast %cst : f32 to vector<16x256xf32>
    %c0 = arith.constant 0 : index
    %c0_0 = arith.constant 0 : index
    %c0_1 = arith.constant 0 : index
    %c0_2 = arith.constant 0 : index
    %c0_3 = arith.constant 0 : index
    %1 = vector.load %arg2[%c0, %c0_0, %c0_1, %c0_2, %c0_3] : memref<1x1x4x10x256xbf16, #tpu.memory_space<vmem>>, vector<1x1x2x8x256xbf16>
    %2 = vector.shape_cast %1 : vector<1x1x2x8x256xbf16> to vector<2x8x256xbf16>
    %3 = vector.shape_cast %2 : vector<2x8x256xbf16> to vector<16x256xbf16>
    %c0_4 = arith.constant 0 : index
    %c0_5 = arith.constant 0 : index
    %c0_6 = arith.constant 0 : index
    %4 = vector.load %arg3[%c0_4, %c0_5, %c0_6] : memref<1x2304x256xbf16, #tpu.memory_space<vmem>>, vector<1x256x256xbf16>
    %5 = vector.shape_cast %4 : vector<1x256x256xbf16> to vector<256x256xbf16>
    %cst_7 = arith.constant dense<0.000000e+00> : vector<16x256xf32>
    %6 = tpu.matmul %3, %5, %cst_7 {dimension_numbers = #tpu.dot_dimension_numbers<[1], [0], [0], [1], [0, 0, 1, 1], [], []>} : vector<16x256xbf16>, vector<256x256xbf16>, vector<16x256xf32> -> vector<16x256xf32>
    %7 = arith.addf %0, %6 : vector<16x256xf32>
    %c0_8 = arith.constant 0 : index
    %c0_9 = arith.constant 0 : index
    %c0_10 = arith.constant 0 : index
    %c1 = arith.constant 1 : index
    %c0_11 = arith.constant 0 : index
    %8 = vector.load %arg2[%c0_8, %c0_9, %c0_10, %c1, %c0_11] : memref<1x1x4x10x256xbf16, #tpu.memory_space<vmem>>, vector<1x1x2x8x256xbf16>
    %9 = vector.shape_cast %8 : vector<1x1x2x8x256xbf16> to vector<2x8x256xbf16>
    %10 = vector.shape_cast %9 : vector<2x8x256xbf16> to vector<16x256xbf16>
    %c0_12 = arith.constant 0 : index
    %c256 = arith.constant 256 : index
    %c0_13 = arith.constant 0 : index
    %11 = vector.load %arg3[%c0_12, %c256, %c0_13] : memref<1x2304x256xbf16, #tpu.memory_space<vmem>>, vector<1x256x256xbf16>
    %12 = vector.shape_cast %11 : vector<1x256x256xbf16> to vector<256x256xbf16>
    %cst_14 = arith.constant dense<0.000000e+00> : vector<16x256xf32>
    %13 = tpu.matmul %10, %12, %cst_14 {dimension_numbers = #tpu.dot_dimension_numbers<[1], [0], [0], [1], [0, 0, 1, 1], [], []>} : vector<16x256xbf16>, vector<256x256xbf16>, vector<16x256xf32> -> vector<16x256xf32>
    %14 = arith.addf %7, %13 : vector<16x256xf32>
    %c0_15 = arith.constant 0 : index
    %c0_16 = arith.constant 0 : index
    %c0_17 = arith.constant 0 : index
    %c2 = arith.constant 2 : index
    %c0_18 = arith.constant 0 : index
    %15 = vector.load %arg2[%c0_15, %c0_16, %c0_17, %c2, %c0_18] : memref<1x1x4x10x256xbf16, #tpu.memory_space<vmem>>, vector<1x1x2x8x256xbf16>
    %16 = vector.shape_cast %15 : vector<1x1x2x8x256xbf16> to vector<2x8x256xbf16>
    %17 = vector.shape_cast %16 : vector<2x8x256xbf16> to vector<16x256xbf16>
    %c0_19 = arith.constant 0 : index
    %c512 = arith.constant 512 : index
    %c0_20 = arith.constant 0 : index
    %18 = vector.load %arg3[%c0_19, %c512, %c0_20] : memref<1x2304x256xbf16, #tpu.memory_space<vmem>>, vector<1x256x256xbf16>
    %19 = vector.shape_cast %18 : vector<1x256x256xbf16> to vector<256x256xbf16>
    %cst_21 = arith.constant dense<0.000000e+00> : vector<16x256xf32>
    %20 = tpu.matmul %17, %19, %cst_21 {dimension_numbers = #tpu.dot_dimension_numbers<[1], [0], [0], [1], [0, 0, 1, 1], [], []>} : vector<16x256xbf16>, vector<256x256xbf16>, vector<16x256xf32> -> vector<16x256xf32>
    %21 = arith.addf %14, %20 : vector<16x256xf32>
    %c0_22 = arith.constant 0 : index
    %c0_23 = arith.constant 0 : index
    %c1_24 = arith.constant 1 : index
    %c0_25 = arith.constant 0 : index
    %c0_26 = arith.constant 0 : index
    %22 = vector.load %arg2[%c0_22, %c0_23, %c1_24, %c0_25, %c0_26] : memref<1x1x4x10x256xbf16, #tpu.memory_space<vmem>>, vector<1x1x2x8x256xbf16>
    %23 = vector.shape_cast %22 : vector<1x1x2x8x256xbf16> to vector<2x8x256xbf16>
    %24 = vector.shape_cast %23 : vector<2x8x256xbf16> to vector<16x256xbf16>
    %c0_27 = arith.constant 0 : index
    %c768 = arith.constant 768 : index
    %c0_28 = arith.constant 0 : index
    %25 = vector.load %arg3[%c0_27, %c768, %c0_28] : memref<1x2304x256xbf16, #tpu.memory_space<vmem>>, vector<1x256x256xbf16>
    %26 = vector.shape_cast %25 : vector<1x256x256xbf16> to vector<256x256xbf16>
    %cst_29 = arith.constant dense<0.000000e+00> : vector<16x256xf32>
    %27 = tpu.matmul %24, %26, %cst_29 {dimension_numbers = #tpu.dot_dimension_numbers<[1], [0], [0], [1], [0, 0, 1, 1], [], []>} : vector<16x256xbf16>, vector<256x256xbf16>, vector<16x256xf32> -> vector<16x256xf32>
    %28 = arith.addf %21, %27 : vector<16x256xf32>
    %c0_30 = arith.constant 0 : index
    %c0_31 = arith.constant 0 : index
    %c1_32 = arith.constant 1 : index
    %c1_33 = arith.constant 1 : index
    %c0_34 = arith.constant 0 : index
    %29 = vector.load %arg2[%c0_30, %c0_31, %c1_32, %c1_33, %c0_34] : memref<1x1x4x10x256xbf16, #tpu.memory_space<vmem>>, vector<1x1x2x8x256xbf16>
    %30 = vector.shape_cast %29 : vector<1x1x2x8x256xbf16> to vector<2x8x256xbf16>
    %31 = vector.shape_cast %30 : vector<2x8x256xbf16> to vector<16x256xbf16>
    %c0_35 = arith.constant 0 : index
    %c1024 = arith.constant 1024 : index
    %c0_36 = arith.constant 0 : index
    %32 = vector.load %arg3[%c0_35, %c1024, %c0_36] : memref<1x2304x256xbf16, #tpu.memory_space<vmem>>, vector<1x256x256xbf16>
    %33 = vector.shape_cast %32 : vector<1x256x256xbf16> to vector<256x256xbf16>
    %cst_37 = arith.constant dense<0.000000e+00> : vector<16x256xf32>
    %34 = tpu.matmul %31, %33, %cst_37 {dimension_numbers = #tpu.dot_dimension_numbers<[1], [0], [0], [1], [0, 0, 1, 1], [], []>} : vector<16x256xbf16>, vector<256x256xbf16>, vector<16x256xf32> -> vector<16x256xf32>
    %35 = arith.addf %28, %34 : vector<16x256xf32>
    %c0_38 = arith.constant 0 : index
    %c0_39 = arith.constant 0 : index
    %c1_40 = arith.constant 1 : index
    %c2_41 = arith.constant 2 : index
    %c0_42 = arith.constant 0 : index
    %36 = vector.load %arg2[%c0_38, %c0_39, %c1_40, %c2_41, %c0_42] : memref<1x1x4x10x256xbf16, #tpu.memory_space<vmem>>, vector<1x1x2x8x256xbf16>
    %37 = vector.shape_cast %36 : vector<1x1x2x8x256xbf16> to vector<2x8x256xbf16>
    %38 = vector.shape_cast %37 : vector<2x8x256xbf16> to vector<16x256xbf16>
    %c0_43 = arith.constant 0 : index
    %c1280 = arith.constant 1280 : index
    %c0_44 = arith.constant 0 : index
    %39 = vector.load %arg3[%c0_43, %c1280, %c0_44] : memref<1x2304x256xbf16, #tpu.memory_space<vmem>>, vector<1x256x256xbf16>
    %40 = vector.shape_cast %39 : vector<1x256x256xbf16> to vector<256x256xbf16>
    %cst_45 = arith.constant dense<0.000000e+00> : vector<16x256xf32>
    %41 = tpu.matmul %38, %40, %cst_45 {dimension_numbers = #tpu.dot_dimension_numbers<[1], [0], [0], [1], [0, 0, 1, 1], [], []>} : vector<16x256xbf16>, vector<256x256xbf16>, vector<16x256xf32> -> vector<16x256xf32>
    %42 = arith.addf %35, %41 : vector<16x256xf32>
    %c0_46 = arith.constant 0 : index
    %c0_47 = arith.constant 0 : index
    %c2_48 = arith.constant 2 : index
    %c0_49 = arith.constant 0 : index
    %c0_50 = arith.constant 0 : index
    %43 = vector.load %arg2[%c0_46, %c0_47, %c2_48, %c0_49, %c0_50] : memref<1x1x4x10x256xbf16, #tpu.memory_space<vmem>>, vector<1x1x2x8x256xbf16>
    %44 = vector.shape_cast %43 : vector<1x1x2x8x256xbf16> to vector<2x8x256xbf16>
    %45 = vector.shape_cast %44 : vector<2x8x256xbf16> to vector<16x256xbf16>
    %c0_51 = arith.constant 0 : index
    %c1536 = arith.constant 1536 : index
    %c0_52 = arith.constant 0 : index
    %46 = vector.load %arg3[%c0_51, %c1536, %c0_52] : memref<1x2304x256xbf16, #tpu.memory_space<vmem>>, vector<1x256x256xbf16>
    %47 = vector.shape_cast %46 : vector<1x256x256xbf16> to vector<256x256xbf16>
    %cst_53 = arith.constant dense<0.000000e+00> : vector<16x256xf32>
    %48 = tpu.matmul %45, %47, %cst_53 {dimension_numbers = #tpu.dot_dimension_numbers<[1], [0], [0], [1], [0, 0, 1, 1], [], []>} : vector<16x256xbf16>, vector<256x256xbf16>, vector<16x256xf32> -> vector<16x256xf32>
    %49 = arith.addf %42, %48 : vector<16x256xf32>
    %c0_54 = arith.constant 0 : index
    %c0_55 = arith.constant 0 : index
    %c2_56 = arith.constant 2 : index
    %c1_57 = arith.constant 1 : index
    %c0_58 = arith.constant 0 : index
    %50 = vector.load %arg2[%c0_54, %c0_55, %c2_56, %c1_57, %c0_58] : memref<1x1x4x10x256xbf16, #tpu.memory_space<vmem>>, vector<1x1x2x8x256xbf16>
    %51 = vector.shape_cast %50 : vector<1x1x2x8x256xbf16> to vector<2x8x256xbf16>
    %52 = vector.shape_cast %51 : vector<2x8x256xbf16> to vector<16x256xbf16>
    %c0_59 = arith.constant 0 : index
    %c1792 = arith.constant 1792 : index
    %c0_60 = arith.constant 0 : index
    %53 = vector.load %arg3[%c0_59, %c1792, %c0_60] : memref<1x2304x256xbf16, #tpu.memory_space<vmem>>, vector<1x256x256xbf16>
    %54 = vector.shape_cast %53 : vector<1x256x256xbf16> to vector<256x256xbf16>
    %cst_61 = arith.constant dense<0.000000e+00> : vector<16x256xf32>
    %55 = tpu.matmul %52, %54, %cst_61 {dimension_numbers = #tpu.dot_dimension_numbers<[1], [0], [0], [1], [0, 0, 1, 1], [], []>} : vector<16x256xbf16>, vector<256x256xbf16>, vector<16x256xf32> -> vector<16x256xf32>
    %56 = arith.addf %49, %55 : vector<16x256xf32>
    %c0_62 = arith.constant 0 : index
    %c0_63 = arith.constant 0 : index
    %c2_64 = arith.constant 2 : index
    %c2_65 = arith.constant 2 : index
    %c0_66 = arith.constant 0 : index
    %57 = vector.load %arg2[%c0_62, %c0_63, %c2_64, %c2_65, %c0_66] : memref<1x1x4x10x256xbf16, #tpu.memory_space<vmem>>, vector<1x1x2x8x256xbf16>
    %58 = vector.shape_cast %57 : vector<1x1x2x8x256xbf16> to vector<2x8x256xbf16>
    %59 = vector.shape_cast %58 : vector<2x8x256xbf16> to vector<16x256xbf16>
    %c0_67 = arith.constant 0 : index
    %c2048 = arith.constant 2048 : index
    %c0_68 = arith.constant 0 : index
    %60 = vector.load %arg3[%c0_67, %c2048, %c0_68] : memref<1x2304x256xbf16, #tpu.memory_space<vmem>>, vector<1x256x256xbf16>
    %61 = vector.shape_cast %60 : vector<1x256x256xbf16> to vector<256x256xbf16>
    %cst_69 = arith.constant dense<0.000000e+00> : vector<16x256xf32>
    %62 = tpu.matmul %59, %61, %cst_69 {dimension_numbers = #tpu.dot_dimension_numbers<[1], [0], [0], [1], [0, 0, 1, 1], [], []>} : vector<16x256xbf16>, vector<256x256xbf16>, vector<16x256xf32> -> vector<16x256xf32>
    %63 = arith.addf %56, %62 : vector<16x256xf32>
    %c0_70 = arith.constant 0 : index
    %c0_71 = arith.constant 0 : index
    %c0_72 = arith.constant 0 : index
    %64 = vector.load %arg4[%c0_70, %c0_71, %c0_72] : memref<1x1x256xf32, #tpu.memory_space<vmem>>, vector<1x1x256xf32>
    %65 = vector.shape_cast %64 : vector<1x1x256xf32> to vector<1x256xf32>
    %66 = vector.broadcast %65 : vector<1x256xf32> to vector<16x256xf32>
    %67 = arith.addf %63, %66 : vector<16x256xf32>
    %cst_73 = arith.constant 0.000000e+00 : f32
    %68 = vector.broadcast %cst_73 : f32 to vector<16x256xf32>
    %69 = arith.maximumf %67, %68 : vector<16x256xf32>
    %70 = arith.truncf %69 : vector<16x256xf32> to vector<16x256xbf16>
    %c0_74 = arith.constant 0 : index
    %c0_75 = arith.constant 0 : index
    %c0_76 = arith.constant 0 : index
    %c0_77 = arith.constant 0 : index
    %71 = vector.load %arg5[%c0_74, %c0_75, %c0_76, %c0_77] : memref<1x1x16x256xbf16, #tpu.memory_space<vmem>>, vector<1x1x16x256xbf16>
    %72 = vector.shape_cast %71 : vector<1x1x16x256xbf16> to vector<16x256xbf16>
    %73 = vector.shape_cast %70 : vector<16x256xbf16> to vector<1x1x16x256xbf16>
    tpu.vector_store %arg5[%c0_74, %c0_75, %c0_76, %c0_77], %73 {strides = array<i32>} : memref<1x1x16x256xbf16, #tpu.memory_space<vmem>>, vector<1x1x16x256xbf16>,
    return
  }
  func.func @transform_0(%arg0: i32, %arg1: i32) -> (i32, i32, i32, i32, i32) {
    %c0_i32 = arith.constant 0 : i32
    %c0_i32_0 = arith.constant 0 : i32
    %c0_i32_1 = arith.constant 0 : i32
    %c0_i32_2 = arith.constant 0 : i32
    return %arg0, %arg1, %c0_i32, %c0_i32_0, %c0_i32_1 : i32, i32, i32, i32, i32
  }
  func.func @transform_1(%arg0: i32, %arg1: i32) -> (i32, i32, i32) {
    %c0_i32 = arith.constant 0 : i32
    %c0_i32_0 = arith.constant 0 : i32
    %c0_i32_1 = arith.constant 0 : i32
    return %arg0, %c0_i32, %c0_i32_0 : i32, i32, i32
  }
  func.func @transform_2(%arg0: i32, %arg1: i32) -> (i32, i32, i32) {
    %c0_i32 = arith.constant 0 : i32
    %c0_i32_0 = arith.constant 0 : i32
    %c0_i32_1 = arith.constant 0 : i32
    return %arg0, %c0_i32, %c0_i32_0 : i32, i32, i32
  }
  func.func @transform_3(%arg0: i32, %arg1: i32) -> (i32, i32, i32, i32) {
    %c0_i32 = arith.constant 0 : i32
    %c0_i32_0 = arith.constant 0 : i32
    %c0_i32_1 = arith.constant 0 : i32
    return %arg0, %arg1, %c0_i32, %c0_i32_0 : i32, i32, i32, i32
  }
}

module attributes {stable_mosaic.version = 11 : i64} {
  func.func @_mm_kernel(%arg0: i32, %arg1: i32, %arg2: i32, %arg3: memref<1x8x1024xbf16, #tpu.memory_space<vmem>>, %arg4: memref<1x1024x512xbf16, #tpu.memory_space<vmem>>, %arg5: memref<1x1x512xf32, #tpu.memory_space<vmem>>, %arg6: memref<1x8x512xbf16, #tpu.memory_space<vmem>>) attributes {dimension_semantics = [#tpu.dimension_semantics<parallel>, #tpu.dimension_semantics<parallel>, #tpu.dimension_semantics<parallel>], iteration_bounds = array<i64: 2, 1, 1>, scalar_prefetch = 0 : i64, scratch_operands = 0 : i64, tpu.core_type = #tpu.core_type<tc>, window_params = [{transform_indices = @transform_0, window_bounds = array<i64: 1, 8, 1024>}, {transform_indices = @transform_1, window_bounds = array<i64: 1, 1024, 512>}, {transform_indices = @transform_2, window_bounds = array<i64: 1, 1, 512>}, {transform_indices = @transform_3, window_bounds = array<i64: 1, 8, 512>}]} {
    %c0 = arith.constant 0 : index
    %c0_0 = arith.constant 0 : index
    %c0_1 = arith.constant 0 : index
    %0 = vector.load %arg3[%c0, %c0_0, %c0_1] : memref<1x8x1024xbf16, #tpu.memory_space<vmem>>, vector<1x8x1024xbf16>
    %1 = vector.shape_cast %0 : vector<1x8x1024xbf16> to vector<8x1024xbf16>
    %c0_2 = arith.constant 0 : index
    %c0_3 = arith.constant 0 : index
    %c0_4 = arith.constant 0 : index
    %2 = vector.load %arg4[%c0_2, %c0_3, %c0_4] : memref<1x1024x512xbf16, #tpu.memory_space<vmem>>, vector<1x1024x512xbf16>
    %3 = vector.shape_cast %2 : vector<1x1024x512xbf16> to vector<1024x512xbf16>
    %cst = arith.constant dense<0.000000e+00> : vector<8x512xf32>
    %4 = tpu.matmul %1, %3, %cst {dimension_numbers = #tpu.dot_dimension_numbers<[1], [0], [0], [1], [0, 0, 1, 1], [], []>} : vector<8x1024xbf16>, vector<1024x512xbf16>, vector<8x512xf32> -> vector<8x512xf32>
    %c0_5 = arith.constant 0 : index
    %c0_6 = arith.constant 0 : index
    %c0_7 = arith.constant 0 : index
    %5 = vector.load %arg5[%c0_5, %c0_6, %c0_7] : memref<1x1x512xf32, #tpu.memory_space<vmem>>, vector<1x1x512xf32>
    %6 = vector.shape_cast %5 : vector<1x1x512xf32> to vector<1x512xf32>
    %7 = vector.broadcast %6 : vector<1x512xf32> to vector<8x512xf32>
    %8 = arith.addf %4, %7 : vector<8x512xf32>
    %cst_8 = arith.constant 0.000000e+00 : f32
    %9 = vector.broadcast %cst_8 : f32 to vector<8x512xf32>
    %10 = arith.maximumf %8, %9 : vector<8x512xf32>
    %11 = arith.truncf %10 : vector<8x512xf32> to vector<8x512xbf16>
    %c0_9 = arith.constant 0 : index
    %c0_10 = arith.constant 0 : index
    %c0_11 = arith.constant 0 : index
    %12 = vector.load %arg6[%c0_9, %c0_10, %c0_11] : memref<1x8x512xbf16, #tpu.memory_space<vmem>>, vector<1x8x512xbf16>
    %13 = vector.shape_cast %12 : vector<1x8x512xbf16> to vector<8x512xbf16>
    %14 = vector.shape_cast %11 : vector<8x512xbf16> to vector<1x8x512xbf16>
    tpu.vector_store %arg6[%c0_9, %c0_10, %c0_11], %14 {strides = array<i32>} : memref<1x8x512xbf16, #tpu.memory_space<vmem>>, vector<1x8x512xbf16>,
    return
  }
  func.func @transform_0(%arg0: i32, %arg1: i32, %arg2: i32) -> (i32, i32, i32) {
    %c0_i32 = arith.constant 0 : i32
    %c0_i32_0 = arith.constant 0 : i32
    return %arg0, %arg1, %c0_i32 : i32, i32, i32
  }
  func.func @transform_1(%arg0: i32, %arg1: i32, %arg2: i32) -> (i32, i32, i32) {
    %c0_i32 = arith.constant 0 : i32
    %c0_i32_0 = arith.constant 0 : i32
    return %arg0, %c0_i32, %arg2 : i32, i32, i32
  }
  func.func @transform_2(%arg0: i32, %arg1: i32, %arg2: i32) -> (i32, i32, i32) {
    %c0_i32 = arith.constant 0 : i32
    %c0_i32_0 = arith.constant 0 : i32
    return %arg0, %c0_i32, %arg2 : i32, i32, i32
  }
  func.func @transform_3(%arg0: i32, %arg1: i32, %arg2: i32) -> (i32, i32, i32) {
    %c0_i32 = arith.constant 0 : i32
    return %arg0, %arg1, %arg2 : i32, i32, i32
  }
}

module attributes {stable_mosaic.version = 11 : i64} {
  func.func @_mm_kernel(%arg0: i32, %arg1: i32, %arg2: i32, %arg3: memref<1x2x4608xbf16, #tpu.memory_space<vmem>>, %arg4: memref<1x4608x512xbf16, #tpu.memory_space<vmem>>, %arg5: memref<1x1x512xf32, #tpu.memory_space<vmem>>, %arg6: memref<1x2x512xbf16, #tpu.memory_space<vmem>>) attributes {dimension_semantics = [#tpu.dimension_semantics<parallel>, #tpu.dimension_semantics<parallel>, #tpu.dimension_semantics<parallel>], iteration_bounds = array<i64: 2, 1, 1>, scalar_prefetch = 0 : i64, scratch_operands = 0 : i64, tpu.core_type = #tpu.core_type<tc>, window_params = [{transform_indices = @transform_0, window_bounds = array<i64: 1, 2, 4608>}, {transform_indices = @transform_1, window_bounds = array<i64: 1, 4608, 512>}, {transform_indices = @transform_2, window_bounds = array<i64: 1, 1, 512>}, {transform_indices = @transform_3, window_bounds = array<i64: 1, 2, 512>}]} {
    %c0 = arith.constant 0 : index
    %c0_0 = arith.constant 0 : index
    %c0_1 = arith.constant 0 : index
    %0 = vector.load %arg3[%c0, %c0_0, %c0_1] : memref<1x2x4608xbf16, #tpu.memory_space<vmem>>, vector<1x2x4608xbf16>
    %1 = vector.shape_cast %0 : vector<1x2x4608xbf16> to vector<2x4608xbf16>
    %c0_2 = arith.constant 0 : index
    %c0_3 = arith.constant 0 : index
    %c0_4 = arith.constant 0 : index
    %2 = vector.load %arg4[%c0_2, %c0_3, %c0_4] : memref<1x4608x512xbf16, #tpu.memory_space<vmem>>, vector<1x4608x512xbf16>
    %3 = vector.shape_cast %2 : vector<1x4608x512xbf16> to vector<4608x512xbf16>
    %cst = arith.constant dense<0.000000e+00> : vector<2x512xf32>
    %4 = tpu.matmul %1, %3, %cst {dimension_numbers = #tpu.dot_dimension_numbers<[1], [0], [0], [1], [0, 0, 1, 1], [], []>} : vector<2x4608xbf16>, vector<4608x512xbf16>, vector<2x512xf32> -> vector<2x512xf32>
    %c0_5 = arith.constant 0 : index
    %c0_6 = arith.constant 0 : index
    %c0_7 = arith.constant 0 : index
    %5 = vector.load %arg5[%c0_5, %c0_6, %c0_7] : memref<1x1x512xf32, #tpu.memory_space<vmem>>, vector<1x1x512xf32>
    %6 = vector.shape_cast %5 : vector<1x1x512xf32> to vector<1x512xf32>
    %7 = vector.broadcast %6 : vector<1x512xf32> to vector<2x512xf32>
    %8 = arith.addf %4, %7 : vector<2x512xf32>
    %cst_8 = arith.constant 0.000000e+00 : f32
    %9 = vector.broadcast %cst_8 : f32 to vector<2x512xf32>
    %10 = arith.maximumf %8, %9 : vector<2x512xf32>
    %11 = arith.truncf %10 : vector<2x512xf32> to vector<2x512xbf16>
    %c0_9 = arith.constant 0 : index
    %c0_10 = arith.constant 0 : index
    %c0_11 = arith.constant 0 : index
    %12 = vector.load %arg6[%c0_9, %c0_10, %c0_11] : memref<1x2x512xbf16, #tpu.memory_space<vmem>>, vector<1x2x512xbf16>
    %13 = vector.shape_cast %12 : vector<1x2x512xbf16> to vector<2x512xbf16>
    %14 = vector.shape_cast %11 : vector<2x512xbf16> to vector<1x2x512xbf16>
    tpu.vector_store %arg6[%c0_9, %c0_10, %c0_11], %14 {strides = array<i32>} : memref<1x2x512xbf16, #tpu.memory_space<vmem>>, vector<1x2x512xbf16>,
    return
  }
  func.func @transform_0(%arg0: i32, %arg1: i32, %arg2: i32) -> (i32, i32, i32) {
    %c0_i32 = arith.constant 0 : i32
    %c0_i32_0 = arith.constant 0 : i32
    return %arg0, %arg1, %c0_i32 : i32, i32, i32
  }
  func.func @transform_1(%arg0: i32, %arg1: i32, %arg2: i32) -> (i32, i32, i32) {
    %c0_i32 = arith.constant 0 : i32
    %c0_i32_0 = arith.constant 0 : i32
    return %arg0, %c0_i32, %arg2 : i32, i32, i32
  }
  func.func @transform_2(%arg0: i32, %arg1: i32, %arg2: i32) -> (i32, i32, i32) {
    %c0_i32 = arith.constant 0 : i32
    %c0_i32_0 = arith.constant 0 : i32
    return %arg0, %c0_i32, %arg2 : i32, i32, i32
  }
  func.func @transform_3(%arg0: i32, %arg1: i32, %arg2: i32) -> (i32, i32, i32) {
    %c0_i32 = arith.constant 0 : i32
    return %arg0, %arg1, %arg2 : i32, i32, i32
  }
}

module attributes {stable_mosaic.version = 11 : i64} {
  func.func @_mm_kernel(%arg0: i32, %arg1: i32, %arg2: i32, %arg3: memref<1x2x1024xbf16, #tpu.memory_space<vmem>>, %arg4: memref<1x1024x2048xbf16, #tpu.memory_space<vmem>>, %arg5: memref<1x1x2048xf32, #tpu.memory_space<vmem>>, %arg6: memref<1x2x2048xbf16, #tpu.memory_space<vmem>>) attributes {dimension_semantics = [#tpu.dimension_semantics<parallel>, #tpu.dimension_semantics<parallel>, #tpu.dimension_semantics<parallel>], iteration_bounds = array<i64: 2, 1, 1>, scalar_prefetch = 0 : i64, scratch_operands = 0 : i64, tpu.core_type = #tpu.core_type<tc>, window_params = [{transform_indices = @transform_0, window_bounds = array<i64: 1, 2, 1024>}, {transform_indices = @transform_1, window_bounds = array<i64: 1, 1024, 2048>}, {transform_indices = @transform_2, window_bounds = array<i64: 1, 1, 2048>}, {transform_indices = @transform_3, window_bounds = array<i64: 1, 2, 2048>}]} {
    %c0 = arith.constant 0 : index
    %c0_0 = arith.constant 0 : index
    %c0_1 = arith.constant 0 : index
    %0 = vector.load %arg3[%c0, %c0_0, %c0_1] : memref<1x2x1024xbf16, #tpu.memory_space<vmem>>, vector<1x2x1024xbf16>
    %1 = vector.shape_cast %0 : vector<1x2x1024xbf16> to vector<2x1024xbf16>
    %c0_2 = arith.constant 0 : index
    %c0_3 = arith.constant 0 : index
    %c0_4 = arith.constant 0 : index
    %2 = vector.load %arg4[%c0_2, %c0_3, %c0_4] : memref<1x1024x2048xbf16, #tpu.memory_space<vmem>>, vector<1x1024x2048xbf16>
    %3 = vector.shape_cast %2 : vector<1x1024x2048xbf16> to vector<1024x2048xbf16>
    %cst = arith.constant dense<0.000000e+00> : vector<2x2048xf32>
    %4 = tpu.matmul %1, %3, %cst {dimension_numbers = #tpu.dot_dimension_numbers<[1], [0], [0], [1], [0, 0, 1, 1], [], []>} : vector<2x1024xbf16>, vector<1024x2048xbf16>, vector<2x2048xf32> -> vector<2x2048xf32>
    %c0_5 = arith.constant 0 : index
    %c0_6 = arith.constant 0 : index
    %c0_7 = arith.constant 0 : index
    %5 = vector.load %arg5[%c0_5, %c0_6, %c0_7] : memref<1x1x2048xf32, #tpu.memory_space<vmem>>, vector<1x1x2048xf32>
    %6 = vector.shape_cast %5 : vector<1x1x2048xf32> to vector<1x2048xf32>
    %7 = vector.broadcast %6 : vector<1x2048xf32> to vector<2x2048xf32>
    %8 = arith.addf %4, %7 : vector<2x2048xf32>
    %9 = arith.truncf %8 : vector<2x2048xf32> to vector<2x2048xbf16>
    %c0_8 = arith.constant 0 : index
    %c0_9 = arith.constant 0 : index
    %c0_10 = arith.constant 0 : index
    %10 = vector.load %arg6[%c0_8, %c0_9, %c0_10] : memref<1x2x2048xbf16, #tpu.memory_space<vmem>>, vector<1x2x2048xbf16>
    %11 = vector.shape_cast %10 : vector<1x2x2048xbf16> to vector<2x2048xbf16>
    %12 = vector.shape_cast %9 : vector<2x2048xbf16> to vector<1x2x2048xbf16>
    tpu.vector_store %arg6[%c0_8, %c0_9, %c0_10], %12 {strides = array<i32>} : memref<1x2x2048xbf16, #tpu.memory_space<vmem>>, vector<1x2x2048xbf16>,
    return
  }
  func.func @transform_0(%arg0: i32, %arg1: i32, %arg2: i32) -> (i32, i32, i32) {
    %c0_i32 = arith.constant 0 : i32
    %c0_i32_0 = arith.constant 0 : i32
    return %arg0, %arg1, %c0_i32 : i32, i32, i32
  }
  func.func @transform_1(%arg0: i32, %arg1: i32, %arg2: i32) -> (i32, i32, i32) {
    %c0_i32 = arith.constant 0 : i32
    %c0_i32_0 = arith.constant 0 : i32
    return %arg0, %c0_i32, %arg2 : i32, i32, i32
  }
  func.func @transform_2(%arg0: i32, %arg1: i32, %arg2: i32) -> (i32, i32, i32) {
    %c0_i32 = arith.constant 0 : i32
    %c0_i32_0 = arith.constant 0 : i32
    return %arg0, %c0_i32, %arg2 : i32, i32, i32
  }
  func.func @transform_3(%arg0: i32, %arg1: i32, %arg2: i32) -> (i32, i32, i32) {
    %c0_i32 = arith.constant 0 : i32
    return %arg0, %arg1, %arg2 : i32, i32, i32
  }
}

module attributes {stable_mosaic.version = 11 : i64} {
  func.func @_mm_res_kernel(%arg0: i32, %arg1: i32, %arg2: i32, %arg3: memref<1x2x512xbf16, #tpu.memory_space<vmem>>, %arg4: memref<1x512x2048xbf16, #tpu.memory_space<vmem>>, %arg5: memref<1x1x2048xf32, #tpu.memory_space<vmem>>, %arg6: memref<1x2x2048xbf16, #tpu.memory_space<vmem>>, %arg7: memref<1x2x2048xbf16, #tpu.memory_space<vmem>>) attributes {dimension_semantics = [#tpu.dimension_semantics<parallel>, #tpu.dimension_semantics<parallel>, #tpu.dimension_semantics<parallel>], iteration_bounds = array<i64: 2, 1, 1>, scalar_prefetch = 0 : i64, scratch_operands = 0 : i64, tpu.core_type = #tpu.core_type<tc>, window_params = [{transform_indices = @transform_0, window_bounds = array<i64: 1, 2, 512>}, {transform_indices = @transform_1, window_bounds = array<i64: 1, 512, 2048>}, {transform_indices = @transform_2, window_bounds = array<i64: 1, 1, 2048>}, {transform_indices = @transform_3, window_bounds = array<i64: 1, 2, 2048>}, {transform_indices = @transform_4, window_bounds = array<i64: 1, 2, 2048>}]} {
    %c0 = arith.constant 0 : index
    %c0_0 = arith.constant 0 : index
    %c0_1 = arith.constant 0 : index
    %0 = vector.load %arg3[%c0, %c0_0, %c0_1] : memref<1x2x512xbf16, #tpu.memory_space<vmem>>, vector<1x2x512xbf16>
    %1 = vector.shape_cast %0 : vector<1x2x512xbf16> to vector<2x512xbf16>
    %c0_2 = arith.constant 0 : index
    %c0_3 = arith.constant 0 : index
    %c0_4 = arith.constant 0 : index
    %2 = vector.load %arg4[%c0_2, %c0_3, %c0_4] : memref<1x512x2048xbf16, #tpu.memory_space<vmem>>, vector<1x512x2048xbf16>
    %3 = vector.shape_cast %2 : vector<1x512x2048xbf16> to vector<512x2048xbf16>
    %cst = arith.constant dense<0.000000e+00> : vector<2x2048xf32>
    %4 = tpu.matmul %1, %3, %cst {dimension_numbers = #tpu.dot_dimension_numbers<[1], [0], [0], [1], [0, 0, 1, 1], [], []>} : vector<2x512xbf16>, vector<512x2048xbf16>, vector<2x2048xf32> -> vector<2x2048xf32>
    %c0_5 = arith.constant 0 : index
    %c0_6 = arith.constant 0 : index
    %c0_7 = arith.constant 0 : index
    %5 = vector.load %arg5[%c0_5, %c0_6, %c0_7] : memref<1x1x2048xf32, #tpu.memory_space<vmem>>, vector<1x1x2048xf32>
    %6 = vector.shape_cast %5 : vector<1x1x2048xf32> to vector<1x2048xf32>
    %7 = vector.broadcast %6 : vector<1x2048xf32> to vector<2x2048xf32>
    %8 = arith.addf %4, %7 : vector<2x2048xf32>
    %c0_8 = arith.constant 0 : index
    %c0_9 = arith.constant 0 : index
    %c0_10 = arith.constant 0 : index
    %9 = vector.load %arg6[%c0_8, %c0_9, %c0_10] : memref<1x2x2048xbf16, #tpu.memory_space<vmem>>, vector<1x2x2048xbf16>
    %10 = vector.shape_cast %9 : vector<1x2x2048xbf16> to vector<2x2048xbf16>
    %11 = arith.extf %10 : vector<2x2048xbf16> to vector<2x2048xf32>
    %12 = arith.addf %8, %11 : vector<2x2048xf32>
    %cst_11 = arith.constant 0.000000e+00 : f32
    %13 = vector.broadcast %cst_11 : f32 to vector<2x2048xf32>
    %14 = arith.maximumf %12, %13 : vector<2x2048xf32>
    %15 = arith.truncf %14 : vector<2x2048xf32> to vector<2x2048xbf16>
    %c0_12 = arith.constant 0 : index
    %c0_13 = arith.constant 0 : index
    %c0_14 = arith.constant 0 : index
    %16 = vector.load %arg7[%c0_12, %c0_13, %c0_14] : memref<1x2x2048xbf16, #tpu.memory_space<vmem>>, vector<1x2x2048xbf16>
    %17 = vector.shape_cast %16 : vector<1x2x2048xbf16> to vector<2x2048xbf16>
    %18 = vector.shape_cast %15 : vector<2x2048xbf16> to vector<1x2x2048xbf16>
    tpu.vector_store %arg7[%c0_12, %c0_13, %c0_14], %18 {strides = array<i32>} : memref<1x2x2048xbf16, #tpu.memory_space<vmem>>, vector<1x2x2048xbf16>,
    return
  }
  func.func @transform_0(%arg0: i32, %arg1: i32, %arg2: i32) -> (i32, i32, i32) {
    %c0_i32 = arith.constant 0 : i32
    %c0_i32_0 = arith.constant 0 : i32
    return %arg0, %arg1, %c0_i32 : i32, i32, i32
  }
  func.func @transform_1(%arg0: i32, %arg1: i32, %arg2: i32) -> (i32, i32, i32) {
    %c0_i32 = arith.constant 0 : i32
    %c0_i32_0 = arith.constant 0 : i32
    return %arg0, %c0_i32, %arg2 : i32, i32, i32
  }
  func.func @transform_2(%arg0: i32, %arg1: i32, %arg2: i32) -> (i32, i32, i32) {
    %c0_i32 = arith.constant 0 : i32
    %c0_i32_0 = arith.constant 0 : i32
    return %arg0, %c0_i32, %arg2 : i32, i32, i32
  }
  func.func @transform_3(%arg0: i32, %arg1: i32, %arg2: i32) -> (i32, i32, i32) {
    %c0_i32 = arith.constant 0 : i32
    return %arg0, %arg1, %arg2 : i32, i32, i32
  }
  func.func @transform_4(%arg0: i32, %arg1: i32, %arg2: i32) -> (i32, i32, i32) {
    %c0_i32 = arith.constant 0 : i32
    return %arg0, %arg1, %arg2 : i32, i32, i32
  }
}

module attributes {stable_mosaic.version = 11 : i64} {
  func.func @_mm_kernel(%arg0: i32, %arg1: i32, %arg2: i32, %arg3: memref<1x2x2048xbf16, #tpu.memory_space<vmem>>, %arg4: memref<1x2048x512xbf16, #tpu.memory_space<vmem>>, %arg5: memref<1x1x512xf32, #tpu.memory_space<vmem>>, %arg6: memref<1x2x512xbf16, #tpu.memory_space<vmem>>) attributes {dimension_semantics = [#tpu.dimension_semantics<parallel>, #tpu.dimension_semantics<parallel>, #tpu.dimension_semantics<parallel>], iteration_bounds = array<i64: 2, 1, 1>, scalar_prefetch = 0 : i64, scratch_operands = 0 : i64, tpu.core_type = #tpu.core_type<tc>, window_params = [{transform_indices = @transform_0, window_bounds = array<i64: 1, 2, 2048>}, {transform_indices = @transform_1, window_bounds = array<i64: 1, 2048, 512>}, {transform_indices = @transform_2, window_bounds = array<i64: 1, 1, 512>}, {transform_indices = @transform_3, window_bounds = array<i64: 1, 2, 512>}]} {
    %c0 = arith.constant 0 : index
    %c0_0 = arith.constant 0 : index
    %c0_1 = arith.constant 0 : index
    %0 = vector.load %arg3[%c0, %c0_0, %c0_1] : memref<1x2x2048xbf16, #tpu.memory_space<vmem>>, vector<1x2x2048xbf16>
    %1 = vector.shape_cast %0 : vector<1x2x2048xbf16> to vector<2x2048xbf16>
    %c0_2 = arith.constant 0 : index
    %c0_3 = arith.constant 0 : index
    %c0_4 = arith.constant 0 : index
    %2 = vector.load %arg4[%c0_2, %c0_3, %c0_4] : memref<1x2048x512xbf16, #tpu.memory_space<vmem>>, vector<1x2048x512xbf16>
    %3 = vector.shape_cast %2 : vector<1x2048x512xbf16> to vector<2048x512xbf16>
    %cst = arith.constant dense<0.000000e+00> : vector<2x512xf32>
    %4 = tpu.matmul %1, %3, %cst {dimension_numbers = #tpu.dot_dimension_numbers<[1], [0], [0], [1], [0, 0, 1, 1], [], []>} : vector<2x2048xbf16>, vector<2048x512xbf16>, vector<2x512xf32> -> vector<2x512xf32>
    %c0_5 = arith.constant 0 : index
    %c0_6 = arith.constant 0 : index
    %c0_7 = arith.constant 0 : index
    %5 = vector.load %arg5[%c0_5, %c0_6, %c0_7] : memref<1x1x512xf32, #tpu.memory_space<vmem>>, vector<1x1x512xf32>
    %6 = vector.shape_cast %5 : vector<1x1x512xf32> to vector<1x512xf32>
    %7 = vector.broadcast %6 : vector<1x512xf32> to vector<2x512xf32>
    %8 = arith.addf %4, %7 : vector<2x512xf32>
    %cst_8 = arith.constant 0.000000e+00 : f32
    %9 = vector.broadcast %cst_8 : f32 to vector<2x512xf32>
    %10 = arith.maximumf %8, %9 : vector<2x512xf32>
    %11 = arith.truncf %10 : vector<2x512xf32> to vector<2x512xbf16>
    %c0_9 = arith.constant 0 : index
    %c0_10 = arith.constant 0 : index
    %c0_11 = arith.constant 0 : index
    %12 = vector.load %arg6[%c0_9, %c0_10, %c0_11] : memref<1x2x512xbf16, #tpu.memory_space<vmem>>, vector<1x2x512xbf16>
    %13 = vector.shape_cast %12 : vector<1x2x512xbf16> to vector<2x512xbf16>
    %14 = vector.shape_cast %11 : vector<2x512xbf16> to vector<1x2x512xbf16>
    tpu.vector_store %arg6[%c0_9, %c0_10, %c0_11], %14 {strides = array<i32>} : memref<1x2x512xbf16, #tpu.memory_space<vmem>>, vector<1x2x512xbf16>,
    return
  }
  func.func @transform_0(%arg0: i32, %arg1: i32, %arg2: i32) -> (i32, i32, i32) {
    %c0_i32 = arith.constant 0 : i32
    %c0_i32_0 = arith.constant 0 : i32
    return %arg0, %arg1, %c0_i32 : i32, i32, i32
  }
  func.func @transform_1(%arg0: i32, %arg1: i32, %arg2: i32) -> (i32, i32, i32) {
    %c0_i32 = arith.constant 0 : i32
    %c0_i32_0 = arith.constant 0 : i32
    return %arg0, %c0_i32, %arg2 : i32, i32, i32
  }
  func.func @transform_2(%arg0: i32, %arg1: i32, %arg2: i32) -> (i32, i32, i32) {
    %c0_i32 = arith.constant 0 : i32
    %c0_i32_0 = arith.constant 0 : i32
    return %arg0, %c0_i32, %arg2 : i32, i32, i32
  }
  func.func @transform_3(%arg0: i32, %arg1: i32, %arg2: i32) -> (i32, i32, i32) {
    %c0_i32 = arith.constant 0 : i32
    return %arg0, %arg1, %arg2 : i32, i32, i32
  }
}

module attributes {stable_mosaic.version = 11 : i64} {
  func.func @_conv3x3_kernel(%arg0: i32, %arg1: i32, %arg2: memref<1x1x3x10x512xbf16, #tpu.memory_space<vmem>>, %arg3: memref<1x4608x512xbf16, #tpu.memory_space<vmem>>, %arg4: memref<1x1x512xf32, #tpu.memory_space<vmem>>, %arg5: memref<1x1x8x512xbf16, #tpu.memory_space<vmem>>) attributes {dimension_semantics = [#tpu.dimension_semantics<parallel>, #tpu.dimension_semantics<parallel>], iteration_bounds = array<i64: 2, 2>, scalar_prefetch = 0 : i64, scratch_operands = 0 : i64, tpu.core_type = #tpu.core_type<tc>, window_params = [{transform_indices = @transform_0, window_bounds = array<i64: 1, 1, 3, 10, 512>}, {transform_indices = @transform_1, window_bounds = array<i64: 1, 4608, 512>}, {transform_indices = @transform_2, window_bounds = array<i64: 1, 1, 512>}, {transform_indices = @transform_3, window_bounds = array<i64: 1, 1, 8, 512>}]} {
    %cst = arith.constant 0.000000e+00 : f32
    %0 = vector.broadcast %cst : f32 to vector<8x512xf32>
    %c0 = arith.constant 0 : index
    %c0_0 = arith.constant 0 : index
    %c0_1 = arith.constant 0 : index
    %c0_2 = arith.constant 0 : index
    %c0_3 = arith.constant 0 : index
    %1 = vector.load %arg2[%c0, %c0_0, %c0_1, %c0_2, %c0_3] : memref<1x1x3x10x512xbf16, #tpu.memory_space<vmem>>, vector<1x1x1x8x512xbf16>
    %2 = vector.shape_cast %1 : vector<1x1x1x8x512xbf16> to vector<1x8x512xbf16>
    %3 = vector.shape_cast %2 : vector<1x8x512xbf16> to vector<8x512xbf16>
    %c0_4 = arith.constant 0 : index
    %c0_5 = arith.constant 0 : index
    %c0_6 = arith.constant 0 : index
    %4 = vector.load %arg3[%c0_4, %c0_5, %c0_6] : memref<1x4608x512xbf16, #tpu.memory_space<vmem>>, vector<1x512x512xbf16>
    %5 = vector.shape_cast %4 : vector<1x512x512xbf16> to vector<512x512xbf16>
    %cst_7 = arith.constant dense<0.000000e+00> : vector<8x512xf32>
    %6 = tpu.matmul %3, %5, %cst_7 {dimension_numbers = #tpu.dot_dimension_numbers<[1], [0], [0], [1], [0, 0, 1, 1], [], []>} : vector<8x512xbf16>, vector<512x512xbf16>, vector<8x512xf32> -> vector<8x512xf32>
    %7 = arith.addf %0, %6 : vector<8x512xf32>
    %c0_8 = arith.constant 0 : index
    %c0_9 = arith.constant 0 : index
    %c0_10 = arith.constant 0 : index
    %c1 = arith.constant 1 : index
    %c0_11 = arith.constant 0 : index
    %8 = vector.load %arg2[%c0_8, %c0_9, %c0_10, %c1, %c0_11] : memref<1x1x3x10x512xbf16, #tpu.memory_space<vmem>>, vector<1x1x1x8x512xbf16>
    %9 = vector.shape_cast %8 : vector<1x1x1x8x512xbf16> to vector<1x8x512xbf16>
    %10 = vector.shape_cast %9 : vector<1x8x512xbf16> to vector<8x512xbf16>
    %c0_12 = arith.constant 0 : index
    %c512 = arith.constant 512 : index
    %c0_13 = arith.constant 0 : index
    %11 = vector.load %arg3[%c0_12, %c512, %c0_13] : memref<1x4608x512xbf16, #tpu.memory_space<vmem>>, vector<1x512x512xbf16>
    %12 = vector.shape_cast %11 : vector<1x512x512xbf16> to vector<512x512xbf16>
    %cst_14 = arith.constant dense<0.000000e+00> : vector<8x512xf32>
    %13 = tpu.matmul %10, %12, %cst_14 {dimension_numbers = #tpu.dot_dimension_numbers<[1], [0], [0], [1], [0, 0, 1, 1], [], []>} : vector<8x512xbf16>, vector<512x512xbf16>, vector<8x512xf32> -> vector<8x512xf32>
    %14 = arith.addf %7, %13 : vector<8x512xf32>
    %c0_15 = arith.constant 0 : index
    %c0_16 = arith.constant 0 : index
    %c0_17 = arith.constant 0 : index
    %c2 = arith.constant 2 : index
    %c0_18 = arith.constant 0 : index
    %15 = vector.load %arg2[%c0_15, %c0_16, %c0_17, %c2, %c0_18] : memref<1x1x3x10x512xbf16, #tpu.memory_space<vmem>>, vector<1x1x1x8x512xbf16>
    %16 = vector.shape_cast %15 : vector<1x1x1x8x512xbf16> to vector<1x8x512xbf16>
    %17 = vector.shape_cast %16 : vector<1x8x512xbf16> to vector<8x512xbf16>
    %c0_19 = arith.constant 0 : index
    %c1024 = arith.constant 1024 : index
    %c0_20 = arith.constant 0 : index
    %18 = vector.load %arg3[%c0_19, %c1024, %c0_20] : memref<1x4608x512xbf16, #tpu.memory_space<vmem>>, vector<1x512x512xbf16>
    %19 = vector.shape_cast %18 : vector<1x512x512xbf16> to vector<512x512xbf16>
    %cst_21 = arith.constant dense<0.000000e+00> : vector<8x512xf32>
    %20 = tpu.matmul %17, %19, %cst_21 {dimension_numbers = #tpu.dot_dimension_numbers<[1], [0], [0], [1], [0, 0, 1, 1], [], []>} : vector<8x512xbf16>, vector<512x512xbf16>, vector<8x512xf32> -> vector<8x512xf32>
    %21 = arith.addf %14, %20 : vector<8x512xf32>
    %c0_22 = arith.constant 0 : index
    %c0_23 = arith.constant 0 : index
    %c1_24 = arith.constant 1 : index
    %c0_25 = arith.constant 0 : index
    %c0_26 = arith.constant 0 : index
    %22 = vector.load %arg2[%c0_22, %c0_23, %c1_24, %c0_25, %c0_26] : memref<1x1x3x10x512xbf16, #tpu.memory_space<vmem>>, vector<1x1x1x8x512xbf16>
    %23 = vector.shape_cast %22 : vector<1x1x1x8x512xbf16> to vector<1x8x512xbf16>
    %24 = vector.shape_cast %23 : vector<1x8x512xbf16> to vector<8x512xbf16>
    %c0_27 = arith.constant 0 : index
    %c1536 = arith.constant 1536 : index
    %c0_28 = arith.constant 0 : index
    %25 = vector.load %arg3[%c0_27, %c1536, %c0_28] : memref<1x4608x512xbf16, #tpu.memory_space<vmem>>, vector<1x512x512xbf16>
    %26 = vector.shape_cast %25 : vector<1x512x512xbf16> to vector<512x512xbf16>
    %cst_29 = arith.constant dense<0.000000e+00> : vector<8x512xf32>
    %27 = tpu.matmul %24, %26, %cst_29 {dimension_numbers = #tpu.dot_dimension_numbers<[1], [0], [0], [1], [0, 0, 1, 1], [], []>} : vector<8x512xbf16>, vector<512x512xbf16>, vector<8x512xf32> -> vector<8x512xf32>
    %28 = arith.addf %21, %27 : vector<8x512xf32>
    %c0_30 = arith.constant 0 : index
    %c0_31 = arith.constant 0 : index
    %c1_32 = arith.constant 1 : index
    %c1_33 = arith.constant 1 : index
    %c0_34 = arith.constant 0 : index
    %29 = vector.load %arg2[%c0_30, %c0_31, %c1_32, %c1_33, %c0_34] : memref<1x1x3x10x512xbf16, #tpu.memory_space<vmem>>, vector<1x1x1x8x512xbf16>
    %30 = vector.shape_cast %29 : vector<1x1x1x8x512xbf16> to vector<1x8x512xbf16>
    %31 = vector.shape_cast %30 : vector<1x8x512xbf16> to vector<8x512xbf16>
    %c0_35 = arith.constant 0 : index
    %c2048 = arith.constant 2048 : index
    %c0_36 = arith.constant 0 : index
    %32 = vector.load %arg3[%c0_35, %c2048, %c0_36] : memref<1x4608x512xbf16, #tpu.memory_space<vmem>>, vector<1x512x512xbf16>
    %33 = vector.shape_cast %32 : vector<1x512x512xbf16> to vector<512x512xbf16>
    %cst_37 = arith.constant dense<0.000000e+00> : vector<8x512xf32>
    %34 = tpu.matmul %31, %33, %cst_37 {dimension_numbers = #tpu.dot_dimension_numbers<[1], [0], [0], [1], [0, 0, 1, 1], [], []>} : vector<8x512xbf16>, vector<512x512xbf16>, vector<8x512xf32> -> vector<8x512xf32>
    %35 = arith.addf %28, %34 : vector<8x512xf32>
    %c0_38 = arith.constant 0 : index
    %c0_39 = arith.constant 0 : index
    %c1_40 = arith.constant 1 : index
    %c2_41 = arith.constant 2 : index
    %c0_42 = arith.constant 0 : index
    %36 = vector.load %arg2[%c0_38, %c0_39, %c1_40, %c2_41, %c0_42] : memref<1x1x3x10x512xbf16, #tpu.memory_space<vmem>>, vector<1x1x1x8x512xbf16>
    %37 = vector.shape_cast %36 : vector<1x1x1x8x512xbf16> to vector<1x8x512xbf16>
    %38 = vector.shape_cast %37 : vector<1x8x512xbf16> to vector<8x512xbf16>
    %c0_43 = arith.constant 0 : index
    %c2560 = arith.constant 2560 : index
    %c0_44 = arith.constant 0 : index
    %39 = vector.load %arg3[%c0_43, %c2560, %c0_44] : memref<1x4608x512xbf16, #tpu.memory_space<vmem>>, vector<1x512x512xbf16>
    %40 = vector.shape_cast %39 : vector<1x512x512xbf16> to vector<512x512xbf16>
    %cst_45 = arith.constant dense<0.000000e+00> : vector<8x512xf32>
    %41 = tpu.matmul %38, %40, %cst_45 {dimension_numbers = #tpu.dot_dimension_numbers<[1], [0], [0], [1], [0, 0, 1, 1], [], []>} : vector<8x512xbf16>, vector<512x512xbf16>, vector<8x512xf32> -> vector<8x512xf32>
    %42 = arith.addf %35, %41 : vector<8x512xf32>
    %c0_46 = arith.constant 0 : index
    %c0_47 = arith.constant 0 : index
    %c2_48 = arith.constant 2 : index
    %c0_49 = arith.constant 0 : index
    %c0_50 = arith.constant 0 : index
    %43 = vector.load %arg2[%c0_46, %c0_47, %c2_48, %c0_49, %c0_50] : memref<1x1x3x10x512xbf16, #tpu.memory_space<vmem>>, vector<1x1x1x8x512xbf16>
    %44 = vector.shape_cast %43 : vector<1x1x1x8x512xbf16> to vector<1x8x512xbf16>
    %45 = vector.shape_cast %44 : vector<1x8x512xbf16> to vector<8x512xbf16>
    %c0_51 = arith.constant 0 : index
    %c3072 = arith.constant 3072 : index
    %c0_52 = arith.constant 0 : index
    %46 = vector.load %arg3[%c0_51, %c3072, %c0_52] : memref<1x4608x512xbf16, #tpu.memory_space<vmem>>, vector<1x512x512xbf16>
    %47 = vector.shape_cast %46 : vector<1x512x512xbf16> to vector<512x512xbf16>
    %cst_53 = arith.constant dense<0.000000e+00> : vector<8x512xf32>
    %48 = tpu.matmul %45, %47, %cst_53 {dimension_numbers = #tpu.dot_dimension_numbers<[1], [0], [0], [1], [0, 0, 1, 1], [], []>} : vector<8x512xbf16>, vector<512x512xbf16>, vector<8x512xf32> -> vector<8x512xf32>
    %49 = arith.addf %42, %48 : vector<8x512xf32>
    %c0_54 = arith.constant 0 : index
    %c0_55 = arith.constant 0 : index
    %c2_56 = arith.constant 2 : index
    %c1_57 = arith.constant 1 : index
    %c0_58 = arith.constant 0 : index
    %50 = vector.load %arg2[%c0_54, %c0_55, %c2_56, %c1_57, %c0_58] : memref<1x1x3x10x512xbf16, #tpu.memory_space<vmem>>, vector<1x1x1x8x512xbf16>
    %51 = vector.shape_cast %50 : vector<1x1x1x8x512xbf16> to vector<1x8x512xbf16>
    %52 = vector.shape_cast %51 : vector<1x8x512xbf16> to vector<8x512xbf16>
    %c0_59 = arith.constant 0 : index
    %c3584 = arith.constant 3584 : index
    %c0_60 = arith.constant 0 : index
    %53 = vector.load %arg3[%c0_59, %c3584, %c0_60] : memref<1x4608x512xbf16, #tpu.memory_space<vmem>>, vector<1x512x512xbf16>
    %54 = vector.shape_cast %53 : vector<1x512x512xbf16> to vector<512x512xbf16>
    %cst_61 = arith.constant dense<0.000000e+00> : vector<8x512xf32>
    %55 = tpu.matmul %52, %54, %cst_61 {dimension_numbers = #tpu.dot_dimension_numbers<[1], [0], [0], [1], [0, 0, 1, 1], [], []>} : vector<8x512xbf16>, vector<512x512xbf16>, vector<8x512xf32> -> vector<8x512xf32>
    %56 = arith.addf %49, %55 : vector<8x512xf32>
    %c0_62 = arith.constant 0 : index
    %c0_63 = arith.constant 0 : index
    %c2_64 = arith.constant 2 : index
    %c2_65 = arith.constant 2 : index
    %c0_66 = arith.constant 0 : index
    %57 = vector.load %arg2[%c0_62, %c0_63, %c2_64, %c2_65, %c0_66] : memref<1x1x3x10x512xbf16, #tpu.memory_space<vmem>>, vector<1x1x1x8x512xbf16>
    %58 = vector.shape_cast %57 : vector<1x1x1x8x512xbf16> to vector<1x8x512xbf16>
    %59 = vector.shape_cast %58 : vector<1x8x512xbf16> to vector<8x512xbf16>
    %c0_67 = arith.constant 0 : index
    %c4096 = arith.constant 4096 : index
    %c0_68 = arith.constant 0 : index
    %60 = vector.load %arg3[%c0_67, %c4096, %c0_68] : memref<1x4608x512xbf16, #tpu.memory_space<vmem>>, vector<1x512x512xbf16>
    %61 = vector.shape_cast %60 : vector<1x512x512xbf16> to vector<512x512xbf16>
    %cst_69 = arith.constant dense<0.000000e+00> : vector<8x512xf32>
    %62 = tpu.matmul %59, %61, %cst_69 {dimension_numbers = #tpu.dot_dimension_numbers<[1], [0], [0], [1], [0, 0, 1, 1], [], []>} : vector<8x512xbf16>, vector<512x512xbf16>, vector<8x512xf32> -> vector<8x512xf32>
    %63 = arith.addf %56, %62 : vector<8x512xf32>
    %c0_70 = arith.constant 0 : index
    %c0_71 = arith.constant 0 : index
    %c0_72 = arith.constant 0 : index
    %64 = vector.load %arg4[%c0_70, %c0_71, %c0_72] : memref<1x1x512xf32, #tpu.memory_space<vmem>>, vector<1x1x512xf32>
    %65 = vector.shape_cast %64 : vector<1x1x512xf32> to vector<1x512xf32>
    %66 = vector.broadcast %65 : vector<1x512xf32> to vector<8x512xf32>
    %67 = arith.addf %63, %66 : vector<8x512xf32>
    %cst_73 = arith.constant 0.000000e+00 : f32
    %68 = vector.broadcast %cst_73 : f32 to vector<8x512xf32>
    %69 = arith.maximumf %67, %68 : vector<8x512xf32>
    %70 = arith.truncf %69 : vector<8x512xf32> to vector<8x512xbf16>
    %c0_74 = arith.constant 0 : index
    %c0_75 = arith.constant 0 : index
    %c0_76 = arith.constant 0 : index
    %c0_77 = arith.constant 0 : index
    %71 = vector.load %arg5[%c0_74, %c0_75, %c0_76, %c0_77] : memref<1x1x8x512xbf16, #tpu.memory_space<vmem>>, vector<1x1x8x512xbf16>
    %72 = vector.shape_cast %71 : vector<1x1x8x512xbf16> to vector<8x512xbf16>
    %73 = vector.shape_cast %70 : vector<8x512xbf16> to vector<1x1x8x512xbf16>
    tpu.vector_store %arg5[%c0_74, %c0_75, %c0_76, %c0_77], %73 {strides = array<i32>} : memref<1x1x8x512xbf16, #tpu.memory_space<vmem>>, vector<1x1x8x512xbf16>,
    return
  }
  func.func @transform_0(%arg0: i32, %arg1: i32) -> (i32, i32, i32, i32, i32) {
    %c0_i32 = arith.constant 0 : i32
    %c0_i32_0 = arith.constant 0 : i32
    %c0_i32_1 = arith.constant 0 : i32
    %c0_i32_2 = arith.constant 0 : i32
    return %arg0, %arg1, %c0_i32, %c0_i32_0, %c0_i32_1 : i32, i32, i32, i32, i32
  }
  func.func @transform_1(%arg0: i32, %arg1: i32) -> (i32, i32, i32) {
    %c0_i32 = arith.constant 0 : i32
    %c0_i32_0 = arith.constant 0 : i32
    %c0_i32_1 = arith.constant 0 : i32
    return %arg0, %c0_i32, %c0_i32_0 : i32, i32, i32
  }
  func.func @transform_2(%arg0: i32, %arg1: i32) -> (i32, i32, i32) {
    %c0_i32 = arith.constant 0 : i32
    %c0_i32_0 = arith.constant 0 : i32
    %c0_i32_1 = arith.constant 0 : i32
    return %arg0, %c0_i32, %c0_i32_0 : i32, i32, i32
  }
  func.func @transform_3(%arg0: i32, %arg1: i32) -> (i32, i32, i32, i32) {
    %c0_i32 = arith.constant 0 : i32
    %c0_i32_0 = arith.constant 0 : i32
    %c0_i32_1 = arith.constant 0 : i32
    return %arg0, %arg1, %c0_i32, %c0_i32_0 : i32, i32, i32, i32
  }
}

module attributes {stable_mosaic.version = 11 : i64} {
  func.func @_avgpool_kernel(%arg0: i32, %arg1: memref<1x1x2048xbf16, #tpu.memory_space<vmem>>, %arg2: memref<1x1x2048xf32, #tpu.memory_space<vmem>>) attributes {dimension_semantics = [#tpu.dimension_semantics<parallel>], iteration_bounds = array<i64: 4>, scalar_prefetch = 0 : i64, scratch_operands = 0 : i64, tpu.core_type = #tpu.core_type<tc>, window_params = [{transform_indices = @transform_0, window_bounds = array<i64: 1, 1, 2048>}, {transform_indices = @transform_1, window_bounds = array<i64: 1, 1, 2048>}]} {
    %c0 = arith.constant 0 : index
    %c0_0 = arith.constant 0 : index
    %c0_1 = arith.constant 0 : index
    %0 = vector.load %arg1[%c0, %c0_0, %c0_1] : memref<1x1x2048xbf16, #tpu.memory_space<vmem>>, vector<1x1x2048xbf16>
    %1 = arith.extf %0 : vector<1x1x2048xbf16> to vector<1x1x2048xf32>
    %cst = arith.constant dense<0.000000e+00> : vector<1x2048xf32>
    %2 = vector.multi_reduction <add>, %1, %cst [1] : vector<1x1x2048xf32> to vector<1x2048xf32>
    %3 = vector.shape_cast %2 : vector<1x2048xf32> to vector<1x1x2048xf32>
    %cst_2 = arith.constant 1.000000e+00 : f32
    %4 = vector.broadcast %cst_2 : f32 to vector<1x1x2048xf32>
    %5 = arith.divf %3, %4 : vector<1x1x2048xf32>
    %c0_3 = arith.constant 0 : index
    %c0_4 = arith.constant 0 : index
    %c0_5 = arith.constant 0 : index
    %6 = vector.load %arg2[%c0_3, %c0_4, %c0_5] : memref<1x1x2048xf32, #tpu.memory_space<vmem>>, vector<1x1x2048xf32>
    tpu.vector_store %arg2[%c0_3, %c0_4, %c0_5], %5 {strides = array<i32>} : memref<1x1x2048xf32, #tpu.memory_space<vmem>>, vector<1x1x2048xf32>,
    return
  }
  func.func @transform_0(%arg0: i32) -> (i32, i32, i32) {
    %c0_i32 = arith.constant 0 : i32
    %c0_i32_0 = arith.constant 0 : i32
    %c0_i32_1 = arith.constant 0 : i32
    return %arg0, %c0_i32, %c0_i32_0 : i32, i32, i32
  }
  func.func @transform_1(%arg0: i32) -> (i32, i32, i32) {
    %c0_i32 = arith.constant 0 : i32
    %c0_i32_0 = arith.constant 0 : i32
    %c0_i32_1 = arith.constant 0 : i32
    return %arg0, %c0_i32, %c0_i32_0 : i32, i32, i32
  }
}

module attributes {stable_mosaic.version = 11 : i64} {
  func.func @_mm_kernel(%arg0: i32, %arg1: i32, %arg2: i32, %arg3: memref<1x8x256xbf16, #tpu.memory_space<vmem>>, %arg4: memref<1x256x512xbf16, #tpu.memory_space<vmem>>, %arg5: memref<1x1x512xf32, #tpu.memory_space<vmem>>, %arg6: memref<1x8x512xbf16, #tpu.memory_space<vmem>>) attributes {dimension_semantics = [#tpu.dimension_semantics<parallel>, #tpu.dimension_semantics<parallel>, #tpu.dimension_semantics<parallel>], iteration_bounds = array<i64: 1, 1, 1>, scalar_prefetch = 0 : i64, scratch_operands = 0 : i64, tpu.core_type = #tpu.core_type<tc>, window_params = [{transform_indices = @transform_0, window_bounds = array<i64: 1, 8, 256>}, {transform_indices = @transform_1, window_bounds = array<i64: 1, 256, 512>}, {transform_indices = @transform_2, window_bounds = array<i64: 1, 1, 512>}, {transform_indices = @transform_3, window_bounds = array<i64: 1, 8, 512>}]} {
    %c0 = arith.constant 0 : index
    %c0_0 = arith.constant 0 : index
    %c0_1 = arith.constant 0 : index
    %0 = vector.load %arg3[%c0, %c0_0, %c0_1] : memref<1x8x256xbf16, #tpu.memory_space<vmem>>, vector<1x8x256xbf16>
    %1 = vector.shape_cast %0 : vector<1x8x256xbf16> to vector<8x256xbf16>
    %c0_2 = arith.constant 0 : index
    %c0_3 = arith.constant 0 : index
    %c0_4 = arith.constant 0 : index
    %2 = vector.load %arg4[%c0_2, %c0_3, %c0_4] : memref<1x256x512xbf16, #tpu.memory_space<vmem>>, vector<1x256x512xbf16>
    %3 = vector.shape_cast %2 : vector<1x256x512xbf16> to vector<256x512xbf16>
    %cst = arith.constant dense<0.000000e+00> : vector<8x512xf32>
    %4 = tpu.matmul %1, %3, %cst {dimension_numbers = #tpu.dot_dimension_numbers<[1], [0], [0], [1], [0, 0, 1, 1], [], []>} : vector<8x256xbf16>, vector<256x512xbf16>, vector<8x512xf32> -> vector<8x512xf32>
    %c0_5 = arith.constant 0 : index
    %c0_6 = arith.constant 0 : index
    %c0_7 = arith.constant 0 : index
    %5 = vector.load %arg5[%c0_5, %c0_6, %c0_7] : memref<1x1x512xf32, #tpu.memory_space<vmem>>, vector<1x1x512xf32>
    %6 = vector.shape_cast %5 : vector<1x1x512xf32> to vector<1x512xf32>
    %7 = vector.broadcast %6 : vector<1x512xf32> to vector<8x512xf32>
    %8 = arith.addf %4, %7 : vector<8x512xf32>
    %cst_8 = arith.constant 0.000000e+00 : f32
    %9 = vector.broadcast %cst_8 : f32 to vector<8x512xf32>
    %10 = arith.maximumf %8, %9 : vector<8x512xf32>
    %11 = arith.truncf %10 : vector<8x512xf32> to vector<8x512xbf16>
    %c0_9 = arith.constant 0 : index
    %c0_10 = arith.constant 0 : index
    %c0_11 = arith.constant 0 : index
    %12 = vector.load %arg6[%c0_9, %c0_10, %c0_11] : memref<1x8x512xbf16, #tpu.memory_space<vmem>>, vector<1x8x512xbf16>
    %13 = vector.shape_cast %12 : vector<1x8x512xbf16> to vector<8x512xbf16>
    %14 = vector.shape_cast %11 : vector<8x512xbf16> to vector<1x8x512xbf16>
    tpu.vector_store %arg6[%c0_9, %c0_10, %c0_11], %14 {strides = array<i32>} : memref<1x8x512xbf16, #tpu.memory_space<vmem>>, vector<1x8x512xbf16>,
    return
  }
  func.func @transform_0(%arg0: i32, %arg1: i32, %arg2: i32) -> (i32, i32, i32) {
    %c0_i32 = arith.constant 0 : i32
    %c0_i32_0 = arith.constant 0 : i32
    return %arg0, %arg1, %c0_i32 : i32, i32, i32
  }
  func.func @transform_1(%arg0: i32, %arg1: i32, %arg2: i32) -> (i32, i32, i32) {
    %c0_i32 = arith.constant 0 : i32
    %c0_i32_0 = arith.constant 0 : i32
    return %arg0, %c0_i32, %arg2 : i32, i32, i32
  }
  func.func @transform_2(%arg0: i32, %arg1: i32, %arg2: i32) -> (i32, i32, i32) {
    %c0_i32 = arith.constant 0 : i32
    %c0_i32_0 = arith.constant 0 : i32
    return %arg0, %c0_i32, %arg2 : i32, i32, i32
  }
  func.func @transform_3(%arg0: i32, %arg1: i32, %arg2: i32) -> (i32, i32, i32) {
    %c0_i32 = arith.constant 0 : i32
    return %arg0, %arg1, %arg2 : i32, i32, i32
  }
}

module attributes {stable_mosaic.version = 11 : i64} {
  func.func @_seqmax_kernel(%arg0: i32, %arg1: memref<1x4x512xbf16, #tpu.memory_space<vmem>>, %arg2: memref<1x1x512xbf16, #tpu.memory_space<vmem>>) attributes {dimension_semantics = [#tpu.dimension_semantics<parallel>], iteration_bounds = array<i64: 2>, scalar_prefetch = 0 : i64, scratch_operands = 0 : i64, tpu.core_type = #tpu.core_type<tc>, window_params = [{transform_indices = @transform_0, window_bounds = array<i64: 1, 4, 512>}, {transform_indices = @transform_1, window_bounds = array<i64: 1, 1, 512>}]} {
    %c0 = arith.constant 0 : index
    %c0_0 = arith.constant 0 : index
    %c0_1 = arith.constant 0 : index
    %0 = vector.load %arg1[%c0, %c0_0, %c0_1] : memref<1x4x512xbf16, #tpu.memory_space<vmem>>, vector<1x4x512xbf16>
    %cst = arith.constant dense<0xFF80> : vector<1x512xbf16>
    %1 = vector.multi_reduction <maximumf>, %0, %cst [1] : vector<1x4x512xbf16> to vector<1x512xbf16>
    %2 = vector.shape_cast %1 : vector<1x512xbf16> to vector<1x1x512xbf16>
    %c0_2 = arith.constant 0 : index
    %c0_3 = arith.constant 0 : index
    %c0_4 = arith.constant 0 : index
    %3 = vector.load %arg2[%c0_2, %c0_3, %c0_4] : memref<1x1x512xbf16, #tpu.memory_space<vmem>>, vector<1x1x512xbf16>
    tpu.vector_store %arg2[%c0_2, %c0_3, %c0_4], %2 {strides = array<i32>} : memref<1x1x512xbf16, #tpu.memory_space<vmem>>, vector<1x1x512xbf16>,
    return
  }
  func.func @transform_0(%arg0: i32) -> (i32, i32, i32) {
    %c0_i32 = arith.constant 0 : i32
    %c0_i32_0 = arith.constant 0 : i32
    %c0_i32_1 = arith.constant 0 : i32
    return %arg0, %c0_i32, %c0_i32_0 : i32, i32, i32
  }
  func.func @transform_1(%arg0: i32) -> (i32, i32, i32) {
    %c0_i32 = arith.constant 0 : i32
    %c0_i32_0 = arith.constant 0 : i32
    %c0_i32_1 = arith.constant 0 : i32
    return %arg0, %c0_i32, %c0_i32_0 : i32, i32, i32
  }
}

module attributes {stable_mosaic.version = 11 : i64} {
  func.func @_mm_kernel(%arg0: i32, %arg1: i32, %arg2: i32, %arg3: memref<1x10x128xbf16, #tpu.memory_space<vmem>>, %arg4: memref<1x128x512xbf16, #tpu.memory_space<vmem>>, %arg5: memref<1x1x512xf32, #tpu.memory_space<vmem>>, %arg6: memref<1x10x512xbf16, #tpu.memory_space<vmem>>) attributes {dimension_semantics = [#tpu.dimension_semantics<parallel>, #tpu.dimension_semantics<parallel>, #tpu.dimension_semantics<parallel>], iteration_bounds = array<i64: 1, 1, 1>, scalar_prefetch = 0 : i64, scratch_operands = 0 : i64, tpu.core_type = #tpu.core_type<tc>, window_params = [{transform_indices = @transform_0, window_bounds = array<i64: 1, 10, 128>}, {transform_indices = @transform_1, window_bounds = array<i64: 1, 128, 512>}, {transform_indices = @transform_2, window_bounds = array<i64: 1, 1, 512>}, {transform_indices = @transform_3, window_bounds = array<i64: 1, 10, 512>}]} {
    %c0 = arith.constant 0 : index
    %c0_0 = arith.constant 0 : index
    %c0_1 = arith.constant 0 : index
    %0 = vector.load %arg3[%c0, %c0_0, %c0_1] : memref<1x10x128xbf16, #tpu.memory_space<vmem>>, vector<1x10x128xbf16>
    %1 = vector.shape_cast %0 : vector<1x10x128xbf16> to vector<10x128xbf16>
    %c0_2 = arith.constant 0 : index
    %c0_3 = arith.constant 0 : index
    %c0_4 = arith.constant 0 : index
    %2 = vector.load %arg4[%c0_2, %c0_3, %c0_4] : memref<1x128x512xbf16, #tpu.memory_space<vmem>>, vector<1x128x512xbf16>
    %3 = vector.shape_cast %2 : vector<1x128x512xbf16> to vector<128x512xbf16>
    %cst = arith.constant dense<0.000000e+00> : vector<10x512xf32>
    %4 = tpu.matmul %1, %3, %cst {dimension_numbers = #tpu.dot_dimension_numbers<[1], [0], [0], [1], [0, 0, 1, 1], [], []>} : vector<10x128xbf16>, vector<128x512xbf16>, vector<10x512xf32> -> vector<10x512xf32>
    %c0_5 = arith.constant 0 : index
    %c0_6 = arith.constant 0 : index
    %c0_7 = arith.constant 0 : index
    %5 = vector.load %arg5[%c0_5, %c0_6, %c0_7] : memref<1x1x512xf32, #tpu.memory_space<vmem>>, vector<1x1x512xf32>
    %6 = vector.shape_cast %5 : vector<1x1x512xf32> to vector<1x512xf32>
    %7 = vector.broadcast %6 : vector<1x512xf32> to vector<10x512xf32>
    %8 = arith.addf %4, %7 : vector<10x512xf32>
    %cst_8 = arith.constant 0.000000e+00 : f32
    %9 = vector.broadcast %cst_8 : f32 to vector<10x512xf32>
    %10 = arith.maximumf %8, %9 : vector<10x512xf32>
    %11 = arith.truncf %10 : vector<10x512xf32> to vector<10x512xbf16>
    %c0_9 = arith.constant 0 : index
    %c0_10 = arith.constant 0 : index
    %c0_11 = arith.constant 0 : index
    %12 = vector.load %arg6[%c0_9, %c0_10, %c0_11] : memref<1x10x512xbf16, #tpu.memory_space<vmem>>, vector<1x10x512xbf16>
    %13 = vector.shape_cast %12 : vector<1x10x512xbf16> to vector<10x512xbf16>
    %14 = vector.shape_cast %11 : vector<10x512xbf16> to vector<1x10x512xbf16>
    tpu.vector_store %arg6[%c0_9, %c0_10, %c0_11], %14 {strides = array<i32>} : memref<1x10x512xbf16, #tpu.memory_space<vmem>>, vector<1x10x512xbf16>,
    return
  }
  func.func @transform_0(%arg0: i32, %arg1: i32, %arg2: i32) -> (i32, i32, i32) {
    %c0_i32 = arith.constant 0 : i32
    %c0_i32_0 = arith.constant 0 : i32
    return %arg0, %arg1, %c0_i32 : i32, i32, i32
  }
  func.func @transform_1(%arg0: i32, %arg1: i32, %arg2: i32) -> (i32, i32, i32) {
    %c0_i32 = arith.constant 0 : i32
    %c0_i32_0 = arith.constant 0 : i32
    return %arg0, %c0_i32, %arg2 : i32, i32, i32
  }
  func.func @transform_2(%arg0: i32, %arg1: i32, %arg2: i32) -> (i32, i32, i32) {
    %c0_i32 = arith.constant 0 : i32
    %c0_i32_0 = arith.constant 0 : i32
    return %arg0, %c0_i32, %arg2 : i32, i32, i32
  }
  func.func @transform_3(%arg0: i32, %arg1: i32, %arg2: i32) -> (i32, i32, i32) {
    %c0_i32 = arith.constant 0 : i32
    return %arg0, %arg1, %arg2 : i32, i32, i32
  }
}

module attributes {stable_mosaic.version = 11 : i64} {
  func.func @_seqmax_kernel(%arg0: i32, %arg1: memref<1x5x512xbf16, #tpu.memory_space<vmem>>, %arg2: memref<1x1x512xbf16, #tpu.memory_space<vmem>>) attributes {dimension_semantics = [#tpu.dimension_semantics<parallel>], iteration_bounds = array<i64: 2>, scalar_prefetch = 0 : i64, scratch_operands = 0 : i64, tpu.core_type = #tpu.core_type<tc>, window_params = [{transform_indices = @transform_0, window_bounds = array<i64: 1, 5, 512>}, {transform_indices = @transform_1, window_bounds = array<i64: 1, 1, 512>}]} {
    %c0 = arith.constant 0 : index
    %c0_0 = arith.constant 0 : index
    %c0_1 = arith.constant 0 : index
    %0 = vector.load %arg1[%c0, %c0_0, %c0_1] : memref<1x5x512xbf16, #tpu.memory_space<vmem>>, vector<1x5x512xbf16>
    %cst = arith.constant dense<0xFF80> : vector<1x512xbf16>
    %1 = vector.multi_reduction <maximumf>, %0, %cst [1] : vector<1x5x512xbf16> to vector<1x512xbf16>
    %2 = vector.shape_cast %1 : vector<1x512xbf16> to vector<1x1x512xbf16>
    %c0_2 = arith.constant 0 : index
    %c0_3 = arith.constant 0 : index
    %c0_4 = arith.constant 0 : index
    %3 = vector.load %arg2[%c0_2, %c0_3, %c0_4] : memref<1x1x512xbf16, #tpu.memory_space<vmem>>, vector<1x1x512xbf16>
    tpu.vector_store %arg2[%c0_2, %c0_3, %c0_4], %2 {strides = array<i32>} : memref<1x1x512xbf16, #tpu.memory_space<vmem>>, vector<1x1x512xbf16>,
    return
  }
  func.func @transform_0(%arg0: i32) -> (i32, i32, i32) {
    %c0_i32 = arith.constant 0 : i32
    %c0_i32_0 = arith.constant 0 : i32
    %c0_i32_1 = arith.constant 0 : i32
    return %arg0, %c0_i32, %c0_i32_0 : i32, i32, i32
  }
  func.func @transform_1(%arg0: i32) -> (i32, i32, i32) {
    %c0_i32 = arith.constant 0 : i32
    %c0_i32_0 = arith.constant 0 : i32
    %c0_i32_1 = arith.constant 0 : i32
    return %arg0, %c0_i32, %c0_i32_0 : i32, i32, i32
  }
}

module attributes {stable_mosaic.version = 11 : i64} {
  func.func @_mm_kernel(%arg0: i32, %arg1: i32, %arg2: i32, %arg3: memref<1x12x128xbf16, #tpu.memory_space<vmem>>, %arg4: memref<1x128x512xbf16, #tpu.memory_space<vmem>>, %arg5: memref<1x1x512xf32, #tpu.memory_space<vmem>>, %arg6: memref<1x12x512xbf16, #tpu.memory_space<vmem>>) attributes {dimension_semantics = [#tpu.dimension_semantics<parallel>, #tpu.dimension_semantics<parallel>, #tpu.dimension_semantics<parallel>], iteration_bounds = array<i64: 1, 1, 1>, scalar_prefetch = 0 : i64, scratch_operands = 0 : i64, tpu.core_type = #tpu.core_type<tc>, window_params = [{transform_indices = @transform_0, window_bounds = array<i64: 1, 12, 128>}, {transform_indices = @transform_1, window_bounds = array<i64: 1, 128, 512>}, {transform_indices = @transform_2, window_bounds = array<i64: 1, 1, 512>}, {transform_indices = @transform_3, window_bounds = array<i64: 1, 12, 512>}]} {
    %c0 = arith.constant 0 : index
    %c0_0 = arith.constant 0 : index
    %c0_1 = arith.constant 0 : index
    %0 = vector.load %arg3[%c0, %c0_0, %c0_1] : memref<1x12x128xbf16, #tpu.memory_space<vmem>>, vector<1x12x128xbf16>
    %1 = vector.shape_cast %0 : vector<1x12x128xbf16> to vector<12x128xbf16>
    %c0_2 = arith.constant 0 : index
    %c0_3 = arith.constant 0 : index
    %c0_4 = arith.constant 0 : index
    %2 = vector.load %arg4[%c0_2, %c0_3, %c0_4] : memref<1x128x512xbf16, #tpu.memory_space<vmem>>, vector<1x128x512xbf16>
    %3 = vector.shape_cast %2 : vector<1x128x512xbf16> to vector<128x512xbf16>
    %cst = arith.constant dense<0.000000e+00> : vector<12x512xf32>
    %4 = tpu.matmul %1, %3, %cst {dimension_numbers = #tpu.dot_dimension_numbers<[1], [0], [0], [1], [0, 0, 1, 1], [], []>} : vector<12x128xbf16>, vector<128x512xbf16>, vector<12x512xf32> -> vector<12x512xf32>
    %c0_5 = arith.constant 0 : index
    %c0_6 = arith.constant 0 : index
    %c0_7 = arith.constant 0 : index
    %5 = vector.load %arg5[%c0_5, %c0_6, %c0_7] : memref<1x1x512xf32, #tpu.memory_space<vmem>>, vector<1x1x512xf32>
    %6 = vector.shape_cast %5 : vector<1x1x512xf32> to vector<1x512xf32>
    %7 = vector.broadcast %6 : vector<1x512xf32> to vector<12x512xf32>
    %8 = arith.addf %4, %7 : vector<12x512xf32>
    %cst_8 = arith.constant 0.000000e+00 : f32
    %9 = vector.broadcast %cst_8 : f32 to vector<12x512xf32>
    %10 = arith.maximumf %8, %9 : vector<12x512xf32>
    %11 = arith.truncf %10 : vector<12x512xf32> to vector<12x512xbf16>
    %c0_9 = arith.constant 0 : index
    %c0_10 = arith.constant 0 : index
    %c0_11 = arith.constant 0 : index
    %12 = vector.load %arg6[%c0_9, %c0_10, %c0_11] : memref<1x12x512xbf16, #tpu.memory_space<vmem>>, vector<1x12x512xbf16>
    %13 = vector.shape_cast %12 : vector<1x12x512xbf16> to vector<12x512xbf16>
    %14 = vector.shape_cast %11 : vector<12x512xbf16> to vector<1x12x512xbf16>
    tpu.vector_store %arg6[%c0_9, %c0_10, %c0_11], %14 {strides = array<i32>} : memref<1x12x512xbf16, #tpu.memory_space<vmem>>, vector<1x12x512xbf16>,
    return
  }
  func.func @transform_0(%arg0: i32, %arg1: i32, %arg2: i32) -> (i32, i32, i32) {
    %c0_i32 = arith.constant 0 : i32
    %c0_i32_0 = arith.constant 0 : i32
    return %arg0, %arg1, %c0_i32 : i32, i32, i32
  }
  func.func @transform_1(%arg0: i32, %arg1: i32, %arg2: i32) -> (i32, i32, i32) {
    %c0_i32 = arith.constant 0 : i32
    %c0_i32_0 = arith.constant 0 : i32
    return %arg0, %c0_i32, %arg2 : i32, i32, i32
  }
  func.func @transform_2(%arg0: i32, %arg1: i32, %arg2: i32) -> (i32, i32, i32) {
    %c0_i32 = arith.constant 0 : i32
    %c0_i32_0 = arith.constant 0 : i32
    return %arg0, %c0_i32, %arg2 : i32, i32, i32
  }
  func.func @transform_3(%arg0: i32, %arg1: i32, %arg2: i32) -> (i32, i32, i32) {
    %c0_i32 = arith.constant 0 : i32
    return %arg0, %arg1, %arg2 : i32, i32, i32
  }
}

module attributes {stable_mosaic.version = 11 : i64} {
  func.func @_seqmax_kernel(%arg0: i32, %arg1: memref<1x6x512xbf16, #tpu.memory_space<vmem>>, %arg2: memref<1x1x512xbf16, #tpu.memory_space<vmem>>) attributes {dimension_semantics = [#tpu.dimension_semantics<parallel>], iteration_bounds = array<i64: 2>, scalar_prefetch = 0 : i64, scratch_operands = 0 : i64, tpu.core_type = #tpu.core_type<tc>, window_params = [{transform_indices = @transform_0, window_bounds = array<i64: 1, 6, 512>}, {transform_indices = @transform_1, window_bounds = array<i64: 1, 1, 512>}]} {
    %c0 = arith.constant 0 : index
    %c0_0 = arith.constant 0 : index
    %c0_1 = arith.constant 0 : index
    %0 = vector.load %arg1[%c0, %c0_0, %c0_1] : memref<1x6x512xbf16, #tpu.memory_space<vmem>>, vector<1x6x512xbf16>
    %cst = arith.constant dense<0xFF80> : vector<1x512xbf16>
    %1 = vector.multi_reduction <maximumf>, %0, %cst [1] : vector<1x6x512xbf16> to vector<1x512xbf16>
    %2 = vector.shape_cast %1 : vector<1x512xbf16> to vector<1x1x512xbf16>
    %c0_2 = arith.constant 0 : index
    %c0_3 = arith.constant 0 : index
    %c0_4 = arith.constant 0 : index
    %3 = vector.load %arg2[%c0_2, %c0_3, %c0_4] : memref<1x1x512xbf16, #tpu.memory_space<vmem>>, vector<1x1x512xbf16>
    tpu.vector_store %arg2[%c0_2, %c0_3, %c0_4], %2 {strides = array<i32>} : memref<1x1x512xbf16, #tpu.memory_space<vmem>>, vector<1x1x512xbf16>,
    return
  }
  func.func @transform_0(%arg0: i32) -> (i32, i32, i32) {
    %c0_i32 = arith.constant 0 : i32
    %c0_i32_0 = arith.constant 0 : i32
    %c0_i32_1 = arith.constant 0 : i32
    return %arg0, %c0_i32, %c0_i32_0 : i32, i32, i32
  }
  func.func @transform_1(%arg0: i32) -> (i32, i32, i32) {
    %c0_i32 = arith.constant 0 : i32
    %c0_i32_0 = arith.constant 0 : i32
    %c0_i32_1 = arith.constant 0 : i32
    return %arg0, %c0_i32, %c0_i32_0 : i32, i32, i32
  }
}

module attributes {stable_mosaic.version = 11 : i64} {
  func.func @_merge_kernel(%arg0: i32, %arg1: memref<2x2048xf32, #tpu.memory_space<vmem>>, %arg2: memref<2x2048xf32, #tpu.memory_space<vmem>>, %arg3: memref<2x2048xf32, #tpu.memory_space<vmem>>, %arg4: memref<2x2048xf32, #tpu.memory_space<vmem>>, %arg5: memref<1x1xf32, #tpu.memory_space<vmem>>, %arg6: memref<1x1xf32, #tpu.memory_space<vmem>>) attributes {dimension_semantics = [#tpu.dimension_semantics<arbitrary>], iteration_bounds = array<i64: 1>, scalar_prefetch = 0 : i64, scratch_operands = 1 : i64, tpu.core_type = #tpu.core_type<tc>, window_params = [{transform_indices = @transform_0, window_bounds = array<i64: 2, 2048>}, {transform_indices = @transform_1, window_bounds = array<i64: 2, 2048>}, {transform_indices = @transform_2, window_bounds = array<i64: 2, 2048>}, {transform_indices = @transform_3, window_bounds = array<i64: 2, 2048>}, {pipeline_mode = #tpu.pipeline_mode<synchronous>, transform_indices = @transform_4, window_bounds = array<i64: 1, 1>}]} {
    %c0_i32 = arith.constant 0 : i32
    %0 = arith.cmpi eq, %arg0, %c0_i32 : i32
    %1 = arith.extui %0 : i1 to i32
    %c0_i32_0 = arith.constant 0 : i32
    %2 = arith.cmpi ne, %1, %c0_i32_0 : i32
    scf.if %2 {
      %cst_18 = arith.constant 0.000000e+00 : f32
      %27 = vector.broadcast %cst_18 : f32 to vector<1x1xf32>
      %c0_19 = arith.constant 0 : index
      %c0_20 = arith.constant 0 : index
      %28 = vector.load %arg6[%c0_19, %c0_20] : memref<1x1xf32, #tpu.memory_space<vmem>>, vector<1x1xf32>
      tpu.vector_store %arg6[%c0_19, %c0_20], %27 {strides = array<i32>} : memref<1x1xf32, #tpu.memory_space<vmem>>, vector<1x1xf32>,
    } else {
    }
    %c0 = arith.constant 0 : index
    %c0_1 = arith.constant 0 : index
    %3 = vector.load %arg1[%c0, %c0_1] : memref<2x2048xf32, #tpu.memory_space<vmem>>, vector<2x2048xf32>
    %c0_2 = arith.constant 0 : index
    %c0_3 = arith.constant 0 : index
    %4 = vector.load %arg2[%c0_2, %c0_3] : memref<2x2048xf32, #tpu.memory_space<vmem>>, vector<2x2048xf32>
    %c0_4 = arith.constant 0 : index
    %c0_5 = arith.constant 0 : index
    %5 = vector.load %arg3[%c0_4, %c0_5] : memref<2x2048xf32, #tpu.memory_space<vmem>>, vector<2x2048xf32>
    %cst = arith.constant 3.000000e-01 : f32
    %6 = vector.broadcast %cst : f32 to vector<2x2048xf32>
    %7 = arith.mulf %6, %3 : vector<2x2048xf32>
    %cst_6 = arith.constant 3.000000e-01 : f32
    %8 = vector.broadcast %cst_6 : f32 to vector<2x2048xf32>
    %9 = arith.mulf %8, %4 : vector<2x2048xf32>
    %10 = arith.addf %7, %9 : vector<2x2048xf32>
    %cst_7 = arith.constant 4.000000e-01 : f32
    %11 = vector.broadcast %cst_7 : f32 to vector<2x2048xf32>
    %12 = arith.mulf %11, %5 : vector<2x2048xf32>
    %13 = arith.addf %10, %12 : vector<2x2048xf32>
    %c0_8 = arith.constant 0 : index
    %c0_9 = arith.constant 0 : index
    %14 = vector.load %arg4[%c0_8, %c0_9] : memref<2x2048xf32, #tpu.memory_space<vmem>>, vector<2x2048xf32>
    tpu.vector_store %arg4[%c0_8, %c0_9], %13 {strides = array<i32>} : memref<2x2048xf32, #tpu.memory_space<vmem>>, vector<2x2048xf32>,
    %15 = arith.subf %3, %13 : vector<2x2048xf32>
    %16 = arith.mulf %15, %15 : vector<2x2048xf32>
    %cst_10 = arith.constant dense<0.000000e+00> : vector<2xf32>
    %17 = vector.multi_reduction <add>, %16, %cst_10 [1] : vector<2x2048xf32> to vector<2xf32>
    %18 = vector.shape_cast %17 : vector<2xf32> to vector<2x1xf32>
    %c0_11 = arith.constant 0 : index
    %c0_12 = arith.constant 0 : index
    %19 = vector.load %arg6[%c0_11, %c0_12] : memref<1x1xf32, #tpu.memory_space<vmem>>, vector<1x1xf32>
    %cst_13 = arith.constant dense<0.000000e+00> : vector<1xf32>
    %20 = vector.multi_reduction <add>, %18, %cst_13 [0] : vector<2x1xf32> to vector<1xf32>
    %21 = vector.shape_cast %20 : vector<1xf32> to vector<1x1xf32>
    %22 = arith.addf %19, %21 : vector<1x1xf32>
    %c0_14 = arith.constant 0 : index
    %c0_15 = arith.constant 0 : index
    %23 = vector.load %arg6[%c0_14, %c0_15] : memref<1x1xf32, #tpu.memory_space<vmem>>, vector<1x1xf32>
    tpu.vector_store %arg6[%c0_14, %c0_15], %22 {strides = array<i32>} : memref<1x1xf32, #tpu.memory_space<vmem>>, vector<1x1xf32>,
    %c0_i32_16 = arith.constant 0 : i32
    %24 = arith.cmpi eq, %arg0, %c0_i32_16 : i32
    %25 = arith.extui %24 : i1 to i32
    %c0_i32_17 = arith.constant 0 : i32
    %26 = arith.cmpi ne, %25, %c0_i32_17 : i32
    scf.if %26 {
      %c0_18 = arith.constant 0 : index
      %c0_19 = arith.constant 0 : index
      %27 = vector.load %arg6[%c0_18, %c0_19] : memref<1x1xf32, #tpu.memory_space<vmem>>, vector<1x1xf32>
      %28 = math.sqrt %27 : vector<1x1xf32>
      %c0_20 = arith.constant 0 : index
      %c0_21 = arith.constant 0 : index
      %29 = vector.load %arg5[%c0_20, %c0_21] : memref<1x1xf32, #tpu.memory_space<vmem>>, vector<1x1xf32>
      tpu.vector_store %arg5[%c0_20, %c0_21], %28 {strides = array<i32>} : memref<1x1xf32, #tpu.memory_space<vmem>>, vector<1x1xf32>,
    } else {
    }
    return
  }
  func.func @transform_0(%arg0: i32) -> (i32, i32) {
    %c0_i32 = arith.constant 0 : i32
    %c0_i32_0 = arith.constant 0 : i32
    return %arg0, %c0_i32 : i32, i32
  }
  func.func @transform_1(%arg0: i32) -> (i32, i32) {
    %c0_i32 = arith.constant 0 : i32
    %c0_i32_0 = arith.constant 0 : i32
    return %arg0, %c0_i32 : i32, i32
  }
  func.func @transform_2(%arg0: i32) -> (i32, i32) {
    %c0_i32 = arith.constant 0 : i32
    %c0_i32_0 = arith.constant 0 : i32
    return %arg0, %c0_i32 : i32, i32
  }
  func.func @transform_3(%arg0: i32) -> (i32, i32) {
    %c0_i32 = arith.constant 0 : i32
    %c0_i32_0 = arith.constant 0 : i32
    return %arg0, %c0_i32 : i32, i32
  }
  func.func @transform_4(%arg0: i32) -> (i32, i32) {
    %c0_i32 = arith.constant 0 : i32
    %c0_i32_0 = arith.constant 0 : i32
    %c0_i32_1 = arith.constant 0 : i32
    return %c0_i32, %c0_i32_0 : i32, i32
  }
}

module attributes {stable_mosaic.version = 11 : i64} {
  func.func @_mm_kernel(%arg0: i32, %arg1: i32, %arg2: i32, %arg3: memref<1x2x1536xbf16, #tpu.memory_space<vmem>>, %arg4: memref<1x1536x2048xbf16, #tpu.memory_space<vmem>>, %arg5: memref<1x1x2048xf32, #tpu.memory_space<vmem>>, %arg6: memref<1x2x2048xf32, #tpu.memory_space<vmem>>) attributes {dimension_semantics = [#tpu.dimension_semantics<parallel>, #tpu.dimension_semantics<parallel>, #tpu.dimension_semantics<parallel>], iteration_bounds = array<i64: 1, 1, 1>, scalar_prefetch = 0 : i64, scratch_operands = 0 : i64, tpu.core_type = #tpu.core_type<tc>, window_params = [{transform_indices = @transform_0, window_bounds = array<i64: 1, 2, 1536>}, {transform_indices = @transform_1, window_bounds = array<i64: 1, 1536, 2048>}, {transform_indices = @transform_2, window_bounds = array<i64: 1, 1, 2048>}, {transform_indices = @transform_3, window_bounds = array<i64: 1, 2, 2048>}]} {
    %c0 = arith.constant 0 : index
    %c0_0 = arith.constant 0 : index
    %c0_1 = arith.constant 0 : index
    %0 = vector.load %arg3[%c0, %c0_0, %c0_1] : memref<1x2x1536xbf16, #tpu.memory_space<vmem>>, vector<1x2x1536xbf16>
    %1 = vector.shape_cast %0 : vector<1x2x1536xbf16> to vector<2x1536xbf16>
    %c0_2 = arith.constant 0 : index
    %c0_3 = arith.constant 0 : index
    %c0_4 = arith.constant 0 : index
    %2 = vector.load %arg4[%c0_2, %c0_3, %c0_4] : memref<1x1536x2048xbf16, #tpu.memory_space<vmem>>, vector<1x1536x2048xbf16>
    %3 = vector.shape_cast %2 : vector<1x1536x2048xbf16> to vector<1536x2048xbf16>
    %cst = arith.constant dense<0.000000e+00> : vector<2x2048xf32>
    %4 = tpu.matmul %1, %3, %cst {dimension_numbers = #tpu.dot_dimension_numbers<[1], [0], [0], [1], [0, 0, 1, 1], [], []>} : vector<2x1536xbf16>, vector<1536x2048xbf16>, vector<2x2048xf32> -> vector<2x2048xf32>
    %c0_5 = arith.constant 0 : index
    %c0_6 = arith.constant 0 : index
    %c0_7 = arith.constant 0 : index
    %5 = vector.load %arg5[%c0_5, %c0_6, %c0_7] : memref<1x1x2048xf32, #tpu.memory_space<vmem>>, vector<1x1x2048xf32>
    %6 = vector.shape_cast %5 : vector<1x1x2048xf32> to vector<1x2048xf32>
    %7 = vector.broadcast %6 : vector<1x2048xf32> to vector<2x2048xf32>
    %8 = arith.addf %4, %7 : vector<2x2048xf32>
    %c0_8 = arith.constant 0 : index
    %c0_9 = arith.constant 0 : index
    %c0_10 = arith.constant 0 : index
    %9 = vector.load %arg6[%c0_8, %c0_9, %c0_10] : memref<1x2x2048xf32, #tpu.memory_space<vmem>>, vector<1x2x2048xf32>
    %10 = vector.shape_cast %9 : vector<1x2x2048xf32> to vector<2x2048xf32>
    %11 = vector.shape_cast %8 : vector<2x2048xf32> to vector<1x2x2048xf32>
    tpu.vector_store %arg6[%c0_8, %c0_9, %c0_10], %11 {strides = array<i32>} : memref<1x2x2048xf32, #tpu.memory_space<vmem>>, vector<1x2x2048xf32>,
    return
  }
  func.func @transform_0(%arg0: i32, %arg1: i32, %arg2: i32) -> (i32, i32, i32) {
    %c0_i32 = arith.constant 0 : i32
    %c0_i32_0 = arith.constant 0 : i32
    return %arg0, %arg1, %c0_i32 : i32, i32, i32
  }
  func.func @transform_1(%arg0: i32, %arg1: i32, %arg2: i32) -> (i32, i32, i32) {
    %c0_i32 = arith.constant 0 : i32
    %c0_i32_0 = arith.constant 0 : i32
    return %arg0, %c0_i32, %arg2 : i32, i32, i32
  }
  func.func @transform_2(%arg0: i32, %arg1: i32, %arg2: i32) -> (i32, i32, i32) {
    %c0_i32 = arith.constant 0 : i32
    %c0_i32_0 = arith.constant 0 : i32
    return %arg0, %c0_i32, %arg2 : i32, i32, i32
  }
  func.func @transform_3(%arg0: i32, %arg1: i32, %arg2: i32) -> (i32, i32, i32) {
    %c0_i32 = arith.constant 0 : i32
    return %arg0, %arg1, %arg2 : i32, i32, i32
  }
}

module attributes {stable_mosaic.version = 11 : i64} {
  func.func @_mm_kernel(%arg0: i32, %arg1: i32, %arg2: i32, %arg3: memref<1x2x2048xbf16, #tpu.memory_space<vmem>>, %arg4: memref<1x2048x512xbf16, #tpu.memory_space<vmem>>, %arg5: memref<1x1x512xf32, #tpu.memory_space<vmem>>, %arg6: memref<1x2x512xf32, #tpu.memory_space<vmem>>) attributes {dimension_semantics = [#tpu.dimension_semantics<parallel>, #tpu.dimension_semantics<parallel>, #tpu.dimension_semantics<parallel>], iteration_bounds = array<i64: 1, 1, 1>, scalar_prefetch = 0 : i64, scratch_operands = 0 : i64, tpu.core_type = #tpu.core_type<tc>, window_params = [{transform_indices = @transform_0, window_bounds = array<i64: 1, 2, 2048>}, {transform_indices = @transform_1, window_bounds = array<i64: 1, 2048, 512>}, {transform_indices = @transform_2, window_bounds = array<i64: 1, 1, 512>}, {transform_indices = @transform_3, window_bounds = array<i64: 1, 2, 512>}]} {
    %c0 = arith.constant 0 : index
    %c0_0 = arith.constant 0 : index
    %c0_1 = arith.constant 0 : index
    %0 = vector.load %arg3[%c0, %c0_0, %c0_1] : memref<1x2x2048xbf16, #tpu.memory_space<vmem>>, vector<1x2x2048xbf16>
    %1 = vector.shape_cast %0 : vector<1x2x2048xbf16> to vector<2x2048xbf16>
    %c0_2 = arith.constant 0 : index
    %c0_3 = arith.constant 0 : index
    %c0_4 = arith.constant 0 : index
    %2 = vector.load %arg4[%c0_2, %c0_3, %c0_4] : memref<1x2048x512xbf16, #tpu.memory_space<vmem>>, vector<1x2048x512xbf16>
    %3 = vector.shape_cast %2 : vector<1x2048x512xbf16> to vector<2048x512xbf16>
    %cst = arith.constant dense<0.000000e+00> : vector<2x512xf32>
    %4 = tpu.matmul %1, %3, %cst {dimension_numbers = #tpu.dot_dimension_numbers<[1], [0], [0], [1], [0, 0, 1, 1], [], []>} : vector<2x2048xbf16>, vector<2048x512xbf16>, vector<2x512xf32> -> vector<2x512xf32>
    %c0_5 = arith.constant 0 : index
    %c0_6 = arith.constant 0 : index
    %c0_7 = arith.constant 0 : index
    %5 = vector.load %arg5[%c0_5, %c0_6, %c0_7] : memref<1x1x512xf32, #tpu.memory_space<vmem>>, vector<1x1x512xf32>
    %6 = vector.shape_cast %5 : vector<1x1x512xf32> to vector<1x512xf32>
    %7 = vector.broadcast %6 : vector<1x512xf32> to vector<2x512xf32>
    %8 = arith.addf %4, %7 : vector<2x512xf32>
    %c0_8 = arith.constant 0 : index
    %c0_9 = arith.constant 0 : index
    %c0_10 = arith.constant 0 : index
    %9 = vector.load %arg6[%c0_8, %c0_9, %c0_10] : memref<1x2x512xf32, #tpu.memory_space<vmem>>, vector<1x2x512xf32>
    %10 = vector.shape_cast %9 : vector<1x2x512xf32> to vector<2x512xf32>
    %11 = vector.shape_cast %8 : vector<2x512xf32> to vector<1x2x512xf32>
    tpu.vector_store %arg6[%c0_8, %c0_9, %c0_10], %11 {strides = array<i32>} : memref<1x2x512xf32, #tpu.memory_space<vmem>>, vector<1x2x512xf32>,
    return
  }
  func.func @transform_0(%arg0: i32, %arg1: i32, %arg2: i32) -> (i32, i32, i32) {
    %c0_i32 = arith.constant 0 : i32
    %c0_i32_0 = arith.constant 0 : i32
    return %arg0, %arg1, %c0_i32 : i32, i32, i32
  }
  func.func @transform_1(%arg0: i32, %arg1: i32, %arg2: i32) -> (i32, i32, i32) {
    %c0_i32 = arith.constant 0 : i32
    %c0_i32_0 = arith.constant 0 : i32
    return %arg0, %c0_i32, %arg2 : i32, i32, i32
  }
  func.func @transform_2(%arg0: i32, %arg1: i32, %arg2: i32) -> (i32, i32, i32) {
    %c0_i32 = arith.constant 0 : i32
    %c0_i32_0 = arith.constant 0 : i32
    return %arg0, %c0_i32, %arg2 : i32, i32, i32
  }
  func.func @transform_3(%arg0: i32, %arg1: i32, %arg2: i32) -> (i32, i32, i32) {
    %c0_i32 = arith.constant 0 : i32
    return %arg0, %arg1, %arg2 : i32, i32, i32
  }
}

module attributes {stable_mosaic.version = 11 : i64} {
  func.func @_mm_kernel(%arg0: i32, %arg1: i32, %arg2: i32, %arg3: memref<1x2x512xbf16, #tpu.memory_space<vmem>>, %arg4: memref<1x512x128xbf16, #tpu.memory_space<vmem>>, %arg5: memref<1x1x128xf32, #tpu.memory_space<vmem>>, %arg6: memref<1x2x128xf32, #tpu.memory_space<vmem>>) attributes {dimension_semantics = [#tpu.dimension_semantics<parallel>, #tpu.dimension_semantics<parallel>, #tpu.dimension_semantics<parallel>], iteration_bounds = array<i64: 1, 1, 1>, scalar_prefetch = 0 : i64, scratch_operands = 0 : i64, tpu.core_type = #tpu.core_type<tc>, window_params = [{transform_indices = @transform_0, window_bounds = array<i64: 1, 2, 512>}, {transform_indices = @transform_1, window_bounds = array<i64: 1, 512, 128>}, {transform_indices = @transform_2, window_bounds = array<i64: 1, 1, 128>}, {transform_indices = @transform_3, window_bounds = array<i64: 1, 2, 128>}]} {
    %c0 = arith.constant 0 : index
    %c0_0 = arith.constant 0 : index
    %c0_1 = arith.constant 0 : index
    %0 = vector.load %arg3[%c0, %c0_0, %c0_1] : memref<1x2x512xbf16, #tpu.memory_space<vmem>>, vector<1x2x512xbf16>
    %1 = vector.shape_cast %0 : vector<1x2x512xbf16> to vector<2x512xbf16>
    %c0_2 = arith.constant 0 : index
    %c0_3 = arith.constant 0 : index
    %c0_4 = arith.constant 0 : index
    %2 = vector.load %arg4[%c0_2, %c0_3, %c0_4] : memref<1x512x128xbf16, #tpu.memory_space<vmem>>, vector<1x512x128xbf16>
    %3 = vector.shape_cast %2 : vector<1x512x128xbf16> to vector<512x128xbf16>
    %cst = arith.constant dense<0.000000e+00> : vector<2x128xf32>
    %4 = tpu.matmul %1, %3, %cst {dimension_numbers = #tpu.dot_dimension_numbers<[1], [0], [0], [1], [0, 0, 1, 1], [], []>} : vector<2x512xbf16>, vector<512x128xbf16>, vector<2x128xf32> -> vector<2x128xf32>
    %c0_5 = arith.constant 0 : index
    %c0_6 = arith.constant 0 : index
    %c0_7 = arith.constant 0 : index
    %5 = vector.load %arg5[%c0_5, %c0_6, %c0_7] : memref<1x1x128xf32, #tpu.memory_space<vmem>>, vector<1x1x128xf32>
    %6 = vector.shape_cast %5 : vector<1x1x128xf32> to vector<1x128xf32>
    %7 = vector.broadcast %6 : vector<1x128xf32> to vector<2x128xf32>
    %8 = arith.addf %4, %7 : vector<2x128xf32>
    %c0_8 = arith.constant 0 : index
    %c0_9 = arith.constant 0 : index
    %c0_10 = arith.constant 0 : index
    %9 = vector.load %arg6[%c0_8, %c0_9, %c0_10] : memref<1x2x128xf32, #tpu.memory_space<vmem>>, vector<1x2x128xf32>
    %10 = vector.shape_cast %9 : vector<1x2x128xf32> to vector<2x128xf32>
    %11 = vector.shape_cast %8 : vector<2x128xf32> to vector<1x2x128xf32>
    tpu.vector_store %arg6[%c0_8, %c0_9, %c0_10], %11 {strides = array<i32>} : memref<1x2x128xf32, #tpu.memory_space<vmem>>, vector<1x2x128xf32>,
    return
  }
  func.func @transform_0(%arg0: i32, %arg1: i32, %arg2: i32) -> (i32, i32, i32) {
    %c0_i32 = arith.constant 0 : i32
    %c0_i32_0 = arith.constant 0 : i32
    return %arg0, %arg1, %c0_i32 : i32, i32, i32
  }
  func.func @transform_1(%arg0: i32, %arg1: i32, %arg2: i32) -> (i32, i32, i32) {
    %c0_i32 = arith.constant 0 : i32
    %c0_i32_0 = arith.constant 0 : i32
    return %arg0, %c0_i32, %arg2 : i32, i32, i32
  }
  func.func @transform_2(%arg0: i32, %arg1: i32, %arg2: i32) -> (i32, i32, i32) {
    %c0_i32 = arith.constant 0 : i32
    %c0_i32_0 = arith.constant 0 : i32
    return %arg0, %c0_i32, %arg2 : i32, i32, i32
  }
  func.func @transform_3(%arg0: i32, %arg1: i32, %arg2: i32) -> (i32, i32, i32) {
    %c0_i32 = arith.constant 0 : i32
    return %arg0, %arg1, %arg2 : i32, i32, i32
  }
}

</mosaic_0001>

<bundles_post_ra>
// kernel: squeeze.14
= control target key start
LH: loop header
LB: loop body
LE: loop exit
PB: predicated region body
PF: predicated region fallthrough
CT: control target
= control target key end

     0   :  { %v171_v9 = vmov 0.0   ;;  %s212_s0 = inlined_call_operand.vmem [shape: bf16[1,8,512], index: 0, kind: input, shape index: {}]   ;;  %s213_s1 = inlined_call_operand.vmem [shape: bf16[2,4,512], index: 1, kind: output, shape index: {}]  }
   0x1   :  { %v169_v0 = vld [vmem:[%s212_s0 + $0x8] sm:$0xff]   ;;  %v166_v1 = vld [vmem:[%s212_s0] sm:$0xff]  }
   0x2   :  { %v163_v2 = vunpack.c.l.bf16 %v169_v0  ;;  %v164_v3 = vunpack.c.h.bf16 %v169_v0  ;;  %v167_v4 = vunpack.c.l.bf16 %v166_v1  ;;  %v168_v5 = vunpack.c.h.bf16 %v166_v1 }
   0x4   :  { %66 = vst [vmem:[#allocation0] sm:$0xf] %v167_v4   ;;  %68 = vst [vmem:[#allocation0 + $0x1c] sm:$0xf0] %v167_v4  }
   0x5   :  { %72 = vst [vmem:[#allocation0 + $0x8] sm:$0xf] %v168_v5   ;;  %74 = vst [vmem:[#allocation0 + $0x24] sm:$0xf0] %v168_v5  }
   0x6   :  { %78 = vst [vmem:[#allocation0 + $0x10] sm:$0xf] %v163_v2   ;;  %80 = vst [vmem:[#allocation0 + $0x2c] sm:$0xf0] %v163_v2  }
   0x7   :  { %84 = vst [vmem:[#allocation0 + $0x18] sm:$0xf] %v164_v3   ;;  %86 = vst [vmem:[#allocation0 + $0x34] sm:$0xf0] %v164_v3  }
   0xb   :  { %v91_v6 = vld [vmem:[#allocation0] sm:$0xf] }
   0xc   :  { %v96_v7 = vld [vmem:[#allocation0 + $0x8] sm:$0xf]  ;;  %v92_v10 = vpack.c.bf16 %v171_v9, %v91_v6  ;;  %v116_v14 = vld [vmem:[#allocation0 + $0x20] sm:$0xf] }
   0xd   :  { %v102_v8 = vld [vmem:[#allocation0 + $0x10] sm:$0xf]  ;;  %v97_v11 = vpack.c.bf16 %v171_v9, %v96_v7  ;;  %v123_v15 = vld [vmem:[#allocation0 + $0x28] sm:$0xf]  ;;  %v117_v17 = vpack.c.bf16 %v171_v9, %v116_v14 }
   0xe   :  { %v103_v12 = vpack.c.bf16 %v171_v9, %v102_v8  ;;  %v109_v13 = vld [vmem:[#allocation0 + $0x18] sm:$0xf]  ;;  %v124_v18 = vpack.c.bf16 %v171_v9, %v123_v15  ;;  %v130_v19 = vld [vmem:[#allocation0 + $0x30] sm:$0xf]  ;;  %94 = vst [vmem:[%s213_s1] sm:$0x3] %v92_v10 }
   0xf   :  { %v110_v16 = vpack.c.bf16 %v171_v9, %v109_v13  ;;  %v137_v20 = vld [vmem:[#allocation0 + $0x38] sm:$0xf]  ;;  %154 = vst [vmem:[%s213_s1 + $0x2] sm:$0x3] %v97_v11  ;;  %v131_v21 = vpack.c.bf16 %v171_v9, %v130_v19  ;;  %157 = vst [vmem:[%s213_s1 + $0x8] sm:$0x3] %v117_v17 }
  0x10   :  { %155 = vst [vmem:[%s213_s1 + $0x4] sm:$0x3] %v103_v12  ;;  %v138_v22 = vpack.c.bf16 %v171_v9, %v137_v20  ;;  %158 = vst [vmem:[%s213_s1 + $0xa] sm:$0x3] %v124_v18 }
  0x11   :  { %156 = vst [vmem:[%s213_s1 + $0x6] sm:$0x3] %v110_v16  ;;  %159 = vst [vmem:[%s213_s1 + $0xc] sm:$0x3] %v131_v21 }
  0x12   :  { %160 = vst [vmem:[%s213_s1 + $0xe] sm:$0x3] %v138_v22 }

// kernel: squeeze.13
= control target key start
LH: loop header
LB: loop body
LE: loop exit
PB: predicated region body
PF: predicated region fallthrough
CT: control target
= control target key end

     0   :  { %s325_s0 = inlined_call_operand.vmem [shape: bf16[1,10,512], index: 0, kind: input, shape index: {}]   ;;  %s326_s1 = inlined_call_operand.vmem [shape: bf16[2,5,512], index: 1, kind: output, shape index: {}]  }
   0x1   :  { %v285_v0 = vld [vmem:[%s325_s0 + $0x18] sm:$0xff]   ;;  %v286_v1 = vld [vmem:[%s325_s0 + $0x10] sm:$0xff]   ;;  %v287_v2 = vld [vmem:[%s325_s0 + $0x8] sm:$0xff]  }
   0x2   :  { %v251_v3 = vunpack.c.l.bf16 %v285_v0  ;;  %v252_v4 = vunpack.c.h.bf16 %v285_v0  ;;  %v255_v5 = vunpack.c.l.bf16 %v286_v1  ;;  %v256_v6 = vunpack.c.h.bf16 %v286_v1  ;;  %v262_v7 = vld [vmem:[%s325_s0] sm:$0xff]  }
   0x3   :  { %v259_v8 = vunpack.c.l.bf16 %v287_v2  ;;  %v260_v9 = vunpack.c.h.bf16 %v287_v2  ;;  %v263_v10 = vunpack.c.l.bf16 %v262_v7  ;;  %v264_v11 = vunpack.c.h.bf16 %v262_v7 }
   0x4   :  { %20 = vst [vmem:[#allocation1 + $0x38] sm:$0xff] %v252_v4  ;;  %36 = vst [vmem:[#allocation1 + $0x30] sm:$0xff] %v251_v3 }
   0x5   :  { %52 = vst [vmem:[#allocation1 + $0x28] sm:$0xff] %v256_v6  ;;  %68 = vst [vmem:[#allocation1 + $0x20] sm:$0xff] %v255_v5 }
   0x6   :  { %130 = vst [vmem:[#allocation0] sm:$0x1f] %v263_v10   ;;  %132 = vst [vmem:[#allocation0 + $0x1b] sm:$0xe0] %v263_v10  }
   0x7   :  { %136 = vst [vmem:[#allocation0 + $0x8] sm:$0x1f] %v264_v11   ;;  %138 = vst [vmem:[#allocation0 + $0x23] sm:$0xe0] %v264_v11  }
   0x8   :  { %142 = vst [vmem:[#allocation0 + $0x10] sm:$0x1f] %v259_v8   ;;  %144 = vst [vmem:[#allocation0 + $0x2b] sm:$0xe0] %v259_v8  }
   0x9   :  { %148 = vst [vmem:[#allocation0 + $0x18] sm:$0x1f] %v260_v9   ;;  %150 = vst [vmem:[#allocation0 + $0x33] sm:$0xe0] %v260_v9  }
   0xb   :  { %v160_v14 = vld [vmem:[#allocation1 + $0x30] sm:$0x3]   ;;  %v164_v15 = vld [vmem:[#allocation1 + $0x38] sm:$0x3]  }
   0xc   :  { %v152_v12 = vld [vmem:[#allocation1 + $0x20] sm:$0x3]   ;;  %v156_v13 = vld [vmem:[#allocation1 + $0x28] sm:$0x3]   ;;  %162 = vst [vmem:[#allocation0 + $0x33] sm:$0x3] %v160_v14  }
   0xd   :  { %154 = vst [vmem:[#allocation0 + $0x23] sm:$0x3] %v152_v12   ;;  %158 = vst [vmem:[#allocation0 + $0x2b] sm:$0x3] %v156_v13   ;;  %v171_v16 = vld [vmem:[#allocation0] sm:$0xff] }
   0xe   :  { %v176_v17 = vld [vmem:[#allocation0 + $0x8] sm:$0xff]  ;;  %166 = vst [vmem:[#allocation0 + $0x3b] sm:$0x3] %v164_v15  }
   0xf   :  { %v268_v18 = vpack.c.bf16 %v176_v17, %v171_v16  ;;  %v182_v19 = vld [vmem:[#allocation0 + $0x10] sm:$0xff] }
  0x10   :  { %v189_v20 = vld [vmem:[#allocation0 + $0x18] sm:$0xff] }
  0x11   :  { %v273_v21 = vpack.c.bf16 %v189_v20, %v182_v19  ;;  %269 = vst [vmem:[%s326_s1] sm:$0xff] %v268_v18  }
  0x13   :  { %288 = vst [vmem:[%s326_s1 + $0x8] sm:$0xff] %v273_v21   ;;  %v210_v24 = vld [vmem:[#allocation0 + $0x30] sm:$0xff] }
  0x14   :  { %v196_v22 = vld [vmem:[#allocation0 + $0x20] sm:$0xff]  ;;  %v203_v23 = vld [vmem:[#allocation0 + $0x28] sm:$0xff] }
  0x15   :  { %v278_v25 = vpack.c.bf16 %v203_v23, %v196_v22  ;;  %v217_v26 = vld [vmem:[#allocation0 + $0x38] sm:$0xff] }
  0x16   :  { %v283_v27 = vpack.c.bf16 %v217_v26, %v210_v24 }
  0x17   :  { %289 = vst [vmem:[%s326_s1 + $0x10] sm:$0xff] %v278_v25  }
  0x18   :  { %290 = vst [vmem:[%s326_s1 + $0x18] sm:$0xff] %v283_v27  }

// kernel: squeeze.12
= control target key start
LH: loop header
LB: loop body
LE: loop exit
PB: predicated region body
PF: predicated region fallthrough
CT: control target
= control target key end

     0   :  { %s325_s0 = inlined_call_operand.vmem [shape: bf16[1,12,512], index: 0, kind: input, shape index: {}]   ;;  %s326_s1 = inlined_call_operand.vmem [shape: bf16[2,6,512], index: 1, kind: output, shape index: {}]  }
   0x1   :  { %v285_v0 = vld [vmem:[%s325_s0 + $0x18] sm:$0xff]   ;;  %v286_v1 = vld [vmem:[%s325_s0 + $0x10] sm:$0xff]   ;;  %v287_v2 = vld [vmem:[%s325_s0 + $0x8] sm:$0xff]  }
   0x2   :  { %v251_v3 = vunpack.c.l.bf16 %v285_v0  ;;  %v252_v4 = vunpack.c.h.bf16 %v285_v0  ;;  %v255_v5 = vunpack.c.l.bf16 %v286_v1  ;;  %v256_v6 = vunpack.c.h.bf16 %v286_v1  ;;  %v262_v7 = vld [vmem:[%s325_s0] sm:$0xff]  }
   0x3   :  { %v259_v8 = vunpack.c.l.bf16 %v287_v2  ;;  %v260_v9 = vunpack.c.h.bf16 %v287_v2  ;;  %v263_v10 = vunpack.c.l.bf16 %v262_v7  ;;  %v264_v11 = vunpack.c.h.bf16 %v262_v7 }
   0x4   :  { %20 = vst [vmem:[#allocation1 + $0x38] sm:$0xff] %v252_v4  ;;  %36 = vst [vmem:[#allocation1 + $0x30] sm:$0xff] %v251_v3 }
   0x5   :  { %52 = vst [vmem:[#allocation1 + $0x28] sm:$0xff] %v256_v6  ;;  %68 = vst [vmem:[#allocation1 + $0x20] sm:$0xff] %v255_v5 }
   0x6   :  { %130 = vst [vmem:[#allocation0] sm:$0x3f] %v263_v10   ;;  %132 = vst [vmem:[#allocation0 + $0x1a] sm:$0xc0] %v263_v10  }
   0x7   :  { %136 = vst [vmem:[#allocation0 + $0x8] sm:$0x3f] %v264_v11   ;;  %138 = vst [vmem:[#allocation0 + $0x22] sm:$0xc0] %v264_v11  }
   0x8   :  { %142 = vst [vmem:[#allocation0 + $0x10] sm:$0x3f] %v259_v8   ;;  %144 = vst [vmem:[#allocation0 + $0x2a] sm:$0xc0] %v259_v8  }
   0x9   :  { %148 = vst [vmem:[#allocation0 + $0x18] sm:$0x3f] %v260_v9   ;;  %150 = vst [vmem:[#allocation0 + $0x32] sm:$0xc0] %v260_v9  }
   0xb   :  { %v160_v14 = vld [vmem:[#allocation1 + $0x30] sm:$0xf]   ;;  %v164_v15 = vld [vmem:[#allocation1 + $0x38] sm:$0xf]  }
   0xc   :  { %v152_v12 = vld [vmem:[#allocation1 + $0x20] sm:$0xf]   ;;  %v156_v13 = vld [vmem:[#allocation1 + $0x28] sm:$0xf]   ;;  %162 = vst [vmem:[#allocation0 + $0x32] sm:$0xf] %v160_v14  }
   0xd   :  { %154 = vst [vmem:[#allocation0 + $0x22] sm:$0xf] %v152_v12   ;;  %158 = vst [vmem:[#allocation0 + $0x2a] sm:$0xf] %v156_v13   ;;  %v171_v16 = vld [vmem:[#allocation0] sm:$0xff] }
   0xe   :  { %v176_v17 = vld [vmem:[#allocation0 + $0x8] sm:$0xff]  ;;  %166 = vst [vmem:[#allocation0 + $0x3a] sm:$0xf] %v164_v15  }
   0xf   :  { %v268_v18 = vpack.c.bf16 %v176_v17, %v171_v16  ;;  %v182_v19 = vld [vmem:[#allocation0 + $0x10] sm:$0xff] }
  0x10   :  { %v189_v20 = vld [vmem:[#allocation0 + $0x18] sm:$0xff] }
  0x11   :  { %v273_v21 = vpack.c.bf16 %v189_v20, %v182_v19  ;;  %269 = vst [vmem:[%s326_s1] sm:$0xff] %v268_v18  }
  0x13   :  { %288 = vst [vmem:[%s326_s1 + $0x8] sm:$0xff] %v273_v21   ;;  %v210_v24 = vld [vmem:[#allocation0 + $0x30] sm:$0xff] }
  0x14   :  { %v196_v22 = vld [vmem:[#allocation0 + $0x20] sm:$0xff]  ;;  %v203_v23 = vld [vmem:[#allocation0 + $0x28] sm:$0xff] }
  0x15   :  { %v278_v25 = vpack.c.bf16 %v203_v23, %v196_v22  ;;  %v217_v26 = vld [vmem:[#allocation0 + $0x38] sm:$0xff] }
  0x16   :  { %v283_v27 = vpack.c.bf16 %v217_v26, %v210_v24 }
  0x17   :  { %289 = vst [vmem:[%s326_s1 + $0x10] sm:$0xff] %v278_v25  }
  0x18   :  { %290 = vst [vmem:[%s326_s1 + $0x18] sm:$0xff] %v283_v27  }

</bundles_post_ra>
